<compile_context>
chip_gen: v5e
topology: v5e:2x2
jax: 0.10.0
libtpu: 0.0.40
codegen_flags: <defaults>
</compile_context>

<pallas_src>
import jax
import jax.numpy as jnp
from jax.experimental import pallas as pl
from jax.experimental.pallas import tpu as pltpu

_CPAD = 8  # lane padding for the 3-wide sphere / point-coordinate dims


# ----------------------------------------------------------------------------
# Pallas kernel: both folding MLPs (fused at the f1 boundary) for one
# (batch, point-tile) grid cell.
# ----------------------------------------------------------------------------
def foldnet_decoder_kernel(
    xb1_ref, xb4_ref, pts_ref,
    w1p_ref, w2_ref, b2_ref,
    w34_ref, w5_ref, b5_ref,
    w6_ref, b6_ref,
    out_ref):
  # xb1: (1,1,D) = code @ W1x + b1   (BN folded; realises input.repeat(1,1,m))
  # xb4: (1,1,D) = code @ W4x + b4 + b3 @ W4_app   (fusion bias folded in)
  # pts: (TN, 8) f32 sphere tile; lanes 3.. are exactly zero.
  pts = pts_ref[...]
  xb1 = xb1_ref[0]            # (1, D) f32
  xb4 = xb4_ref[0]            # (1, D) f32

  # folding1 layer 1: sphere part is a tiny K=8 f32 MXU matmul; codeword part
  # is the hoisted per-batch bias row xb1.
  h = jnp.maximum(
      jnp.dot(pts, w1p_ref[...], preferred_element_type=jnp.float32) + xb1, 0.0)
  # folding1 layer 2
  h = jnp.maximum(
      jnp.dot(h.astype(jnp.bfloat16), w2_ref[...],
              preferred_element_type=jnp.float32) + b2_ref[...], 0.0)
  # folding1 layer 3 fused with folding2 layer 1:
  #   pre = xb4 + h @ (W3^T @ W4_app^T)    (W34 folded in f32 in the wrapper)
  h = jnp.maximum(
      jnp.dot(h.astype(jnp.bfloat16), w34_ref[...],
              preferred_element_type=jnp.float32) + xb4, 0.0)
  # folding2 layer 2
  h = jnp.maximum(
      jnp.dot(h.astype(jnp.bfloat16), w5_ref[...],
              preferred_element_type=jnp.float32) + b5_ref[...], 0.0)
  # folding2 layer 3: (TN, D/2) @ (D/2, 8) -> compact 8-lane output
  out = jnp.dot(h.astype(jnp.bfloat16), w6_ref[...],
                preferred_element_type=jnp.float32) + b6_ref[...]
  out_ref[0] = out.astype(out_ref.dtype)


# ----------------------------------------------------------------------------
# Wrapper
# ----------------------------------------------------------------------------
def foldnet_decoder(inp_ncl, sphere, kparams, *, tn=1024):
  """inp_ncl: (B, feat_dims, 1) PyTorch-layout codeword; sphere: (N, 3).

  Returns (B, N, 3), matching FoldNetDecoder.forward.
  tn: point-tile size (multiple of 8; 512-2048 recommended).
  """
  B, D, _ = inp_ncl.shape
  N = sphere.shape[0]
  n_tiles = pl.cdiv(N, tn)
  n_pad = n_tiles * tn

  # Hoisted per-batch codeword projections (keeps degenerate M=1 matmuls and
  # the (D, D) codeword weights out of the kernel / VMEM).
  code = inp_ncl[:, :, 0]                                   # (B, D) f32
  p = kparams['proj']
  xb1 = (code @ p['w1x'] + p['b1'])[:, None, :]             # (B, 1, D) f32
  xb4 = (code @ p['w4x'] + p['b4'])[:, None, :]             # (B, 1, D) f32

  # Compact sphere: rows N -> n_pad (tile multiple), channels 3 -> 8.
  pts = jnp.zeros((n_pad, _CPAD), jnp.float32).at[:N, :3].set(sphere)

  m = kparams['mats']
  w1p, w2, b2 = m['w1p'], m['w2'], m['b2']
  w34, w5, b5 = m['w34'], m['w5'], m['b5']
  w6, b6 = m['w6'], m['b6']

  def resident(w):
    # Constant index_map: block stays resident in VMEM across the whole grid.
    # TODO(synk): pipeline_mode=pl.Buffered(1) would drop the ~260 KiB of
    # weight double-buffering; left at the default for portability.
    return pl.BlockSpec(w.shape, lambda b, n: (0, 0))

  in_specs = [
      pl.BlockSpec((1, 1, D), lambda b, n: (b, 0, 0)),      # xb1
      pl.BlockSpec((1, 1, D), lambda b, n: (b, 0, 0)),      # xb4
      pl.BlockSpec((tn, _CPAD), lambda b, n: (n, 0)),       # compact sphere tile
      resident(w1p), resident(w2), resident(b2),
      resident(w34), resident(w5), resident(b5),
      resident(w6), resident(b6),
  ]
  out_specs = pl.BlockSpec((1, tn, _CPAD), lambda b, n: (b, n, 0))

  operands = (xb1, xb4, pts, w1p, w2, b2, w34, w5, b5, w6, b6)
  flops = 2 * B * n_pad * (_CPAD * D + D * (D // 2) + (D // 2) * D
                           + D * (D // 2) + (D // 2) * _CPAD)
  bytes_accessed = sum(int(a.size) * a.dtype.itemsize for a in operands)
  bytes_accessed += B * n_pad * _CPAD * 4                   # output

  out = pl.pallas_call(
      foldnet_decoder_kernel,
      out_shape=jax.ShapeDtypeStruct((B, n_pad, _CPAD), jnp.float32),
      grid=(B, n_tiles),
      in_specs=in_specs,
      out_specs=out_specs,
      compiler_params=pltpu.CompilerParams(
          dimension_semantics=("parallel", "parallel"),
          vmem_limit_bytes=16 * 1024 * 1024),
      cost_estimate=pl.CostEstimate(
          flops=int(flops), transcendentals=0,
          bytes_accessed=int(bytes_accessed)),
  )(*operands)

  return out[:, :N, :3]                                     # (B, N, 3)


# ----------------------------------------------------------------------------
# Deterministic parameter construction (shapes from FoldNetDecoder.__init__)
# ----------------------------------------------------------------------------
def make_params(key, feat_dims):
  D = feat_dims
  keys = iter(jax.random.split(key, 64))

  def conv(cout, cin):
    k = 1.0 / jnp.sqrt(jnp.float32(cin))
    W = jax.random.uniform(next(keys), (cout, cin), jnp.float32, -k, k)
    b = jax.random.uniform(next(keys), (cout,), jnp.float32, -k, k)
    return W, b

  def bn(c):
    gamma = jax.random.uniform(next(keys), (c,), jnp.float32, 0.5, 1.5)
    beta = jax.random.uniform(next(keys), (c,), jnp.float32, -0.5, 0.5)
    mean = jax.random.uniform(next(keys), (c,), jnp.float32, -0.5, 0.5)
    var = jax.random.uniform(next(keys), (c,), jnp.float32, 0.5, 1.5)
    return gamma, beta, mean, var

  return {
      'f1': [conv(D, D + 3), conv(D // 2, D), conv(3, D // 2)],
      'f1_bn': [bn(D), bn(D // 2)],
      'f2': [conv(D, D + 3), conv(D // 2, D), conv(3, D // 2)],
      'f2_bn': [bn(D), bn(D // 2)],
  }


def _fold_bn(W, b, bn_p, eps=1e-5):
  g, be, mu, var = bn_p
  s = g / jnp.sqrt(var + eps)
  return W * s[:, None], (b - mu) * s + be


def kernel_params(raw, feat_dims):
  """Fold eval-mode BN into conv weights, split the (D+3)-channel input
  weights into hoisted codeword parts (wrapper) and appended-channel parts,
  fuse folding1's last conv into folding2's first conv (in f32), pad the
  3-wide dims to 8, and cast the in-kernel matmul weights to bf16 (biases and
  the K=8 sphere weight stay f32)."""
  D = feat_dims
  (W1, b1), (W2, b2), (W3, b3) = raw['f1']
  W1, b1 = _fold_bn(W1, b1, raw['f1_bn'][0])
  W2, b2 = _fold_bn(W2, b2, raw['f1_bn'][1])
  (W4, b4), (W5, b5), (W6, b6) = raw['f2']
  W4, b4 = _fold_bn(W4, b4, raw['f2_bn'][0])
  W5, b5 = _fold_bn(W5, b5, raw['f2_bn'][1])

  W1t, W4t = W1.T, W4.T                       # (D+3, D)
  w1xt, w1appt = W1t[:D], W1t[D:]             # (D, D), (3, D)
  w4xt, w4appt = W4t[:D], W4t[D:]

  # folding1 layer 1 sphere part: 3 rows zero-padded to 8 (f32, K=8 matmul)
  w1p = jnp.zeros((_CPAD, D), jnp.float32).at[:3].set(w1appt)

  # Fuse folding1's last conv into folding2's first conv, in f32:
  #   f1 = h @ W3^T + b3;  pre4 = xb4_base + f1 @ W4app^T
  #        = (xb4_base + b3 @ W4app^T) + h @ (W3^T @ W4app^T)
  w34 = W3.T @ w4appt                         # (D/2, D) f32
  b4_fused = b4 + b3 @ w4appt                 # (D,)

  # folding2 last conv: 3 output channels zero-padded to 8 lanes
  w6p = jnp.zeros((D // 2, _CPAD), jnp.float32).at[:, :3].set(W6.T)
  b6p = jnp.zeros((1, _CPAD), jnp.float32).at[0, :3].set(b6)

  mats = {
      'w1p': w1p,
      'w2': W2.T.astype(jnp.bfloat16), 'b2': b2[None, :],
      'w34': w34.astype(jnp.bfloat16),
      'w5': W5.T.astype(jnp.bfloat16), 'b5': b5[None, :],
      'w6': w6p.astype(jnp.bfloat16), 'b6': b6p,
  }
  proj = {'w1x': w1xt, 'b1': b1, 'w4x': w4xt, 'b4': b4_fused}  # f32, wrapper-side
  return {'proj': proj, 'mats': mats}


# ----------------------------------------------------------------------------
# Pure-JAX f32 reference mirroring the PyTorch NCL forward (eval-mode BN)
# ----------------------------------------------------------------------------
def ref_forward(inp_ncl, sphere, raw, eps=1e-5):
  B = inp_ncl.shape[0]
  N = sphere.shape[0]
  x = jnp.repeat(inp_ncl, N, axis=2)                        # input.repeat(1,1,m)
  pts = jnp.broadcast_to(sphere.T[None], (B, 3, N))         # build_grid().transpose(1,2)

  def conv(h, W, b):
    return jnp.einsum('oi,bin->bon', W, h) + b[None, :, None]

  def bnorm(h, p):
    g, be, mu, var = p
    s = g / jnp.sqrt(var + eps)
    return (h - mu[None, :, None]) * s[None, :, None] + be[None, :, None]

  def folding(h, convs, bns):
    (W1, b1), (W2, b2), (W3, b3) = convs
    p1, p2 = bns
    h = jnp.maximum(bnorm(conv(h, W1, b1), p1), 0.0)
    h = jnp.maximum(bnorm(conv(h, W2, b2), p2), 0.0)
    return conv(h, W3, b3)

  cat1 = jnp.concatenate([x, pts], axis=1)
  f1 = folding(cat1, raw['f1'], raw['f1_bn'])
  cat2 = jnp.concatenate([x, f1], axis=1)
  f2 = folding(cat2, raw['f2'], raw['f2_bn'])
  return jnp.transpose(f2, (0, 2, 1))                       # (B, m, 3)


if __name__ == "__main__":
  key = jax.random.PRNGKey(0)
  k_in, k_sph, k_par = jax.random.split(key, 3)

  # feat_dims=256 (module default -> channel dims already lane-aligned);
  # m shrunk from 2025 to 500 (not a multiple of the tile, exercises padding).
  B, D, N = 2, 256, 500

  # PyTorch-layout input: (B, feat_dims, 1)
  inp = jax.random.normal(k_in, (B, D, 1), dtype=jnp.float32)

  # Synthetic deterministic unit-sphere grid (stands in for sphere.npy)
  sph = jax.random.normal(k_sph, (N, 3), dtype=jnp.float32)
  sph = sph / jnp.linalg.norm(sph, axis=-1, keepdims=True)

  raw = make_params(k_par, D)
  kparams = kernel_params(raw, D)

  out = jax.block_until_ready(foldnet_decoder(inp, sph, kparams, tn=512))
  assert out.shape == (B, N, 3), out.shape

  ref = ref_forward(inp, sph, raw)
  # bf16 matmul inputs (f32 accumulation) -> loosened tolerance vs. f32 ref.
  if not jnp.allclose(out, ref, rtol=5e-2, atol=5e-2):
    err = float(jnp.max(jnp.abs(out - ref)))
    raise AssertionError(
        f"Pallas kernel output mismatches JAX reference (max abs err {err})")

  print("KERNEL_OK")
</pallas_src>

<mosaic_0001>
module attributes {stable_mosaic.version = 11 : i64} {
  func.func @foldnet_decoder_kernel(%arg0: i32, %arg1: i32, %arg2: memref<1x1x256xf32, #tpu.memory_space<vmem>>, %arg3: memref<1x1x256xf32, #tpu.memory_space<vmem>>, %arg4: memref<512x8xf32, #tpu.memory_space<vmem>>, %arg5: memref<8x256xf32, #tpu.memory_space<vmem>>, %arg6: memref<256x128xbf16, #tpu.memory_space<vmem>>, %arg7: memref<1x128xf32, #tpu.memory_space<vmem>>, %arg8: memref<128x256xbf16, #tpu.memory_space<vmem>>, %arg9: memref<256x128xbf16, #tpu.memory_space<vmem>>, %arg10: memref<1x128xf32, #tpu.memory_space<vmem>>, %arg11: memref<128x8xbf16, #tpu.memory_space<vmem>>, %arg12: memref<1x8xf32, #tpu.memory_space<vmem>>, %arg13: memref<1x512x8xf32, #tpu.memory_space<vmem>>) attributes {dimension_semantics = [#tpu.dimension_semantics<parallel>, #tpu.dimension_semantics<parallel>], iteration_bounds = array<i64: 2, 1>, scalar_prefetch = 0 : i64, scratch_operands = 0 : i64, tpu.core_type = #tpu.core_type<tc>, window_params = [{transform_indices = @transform_0, window_bounds = array<i64: 1, 1, 256>}, {transform_indices = @transform_1, window_bounds = array<i64: 1, 1, 256>}, {transform_indices = @transform_2, window_bounds = array<i64: 512, 8>}, {pipeline_mode = #tpu.pipeline_mode<synchronous>, transform_indices = @transform_3, window_bounds = array<i64: 8, 256>}, {pipeline_mode = #tpu.pipeline_mode<synchronous>, transform_indices = @transform_4, window_bounds = array<i64: 256, 128>}, {pipeline_mode = #tpu.pipeline_mode<synchronous>, transform_indices = @transform_5, window_bounds = array<i64: 1, 128>}, {pipeline_mode = #tpu.pipeline_mode<synchronous>, transform_indices = @transform_6, window_bounds = array<i64: 128, 256>}, {pipeline_mode = #tpu.pipeline_mode<synchronous>, transform_indices = @transform_7, window_bounds = array<i64: 256, 128>}, {pipeline_mode = #tpu.pipeline_mode<synchronous>, transform_indices = @transform_8, window_bounds = array<i64: 1, 128>}, {pipeline_mode = #tpu.pipeline_mode<synchronous>, transform_indices = @transform_9, window_bounds = array<i64: 128, 8>}, {pipeline_mode = #tpu.pipeline_mode<synchronous>, transform_indices = @transform_10, window_bounds = array<i64: 1, 8>}, {transform_indices = @transform_11, window_bounds = array<i64: 1, 512, 8>}]} {
    %c0 = arith.constant 0 : index
    %c0_0 = arith.constant 0 : index
    %0 = vector.load %arg4[%c0, %c0_0] : memref<512x8xf32, #tpu.memory_space<vmem>>, vector<512x8xf32>
    %c0_1 = arith.constant 0 : index
    %c0_2 = arith.constant 0 : index
    %c0_3 = arith.constant 0 : index
    %1 = vector.load %arg2[%c0_1, %c0_2, %c0_3] : memref<1x1x256xf32, #tpu.memory_space<vmem>>, vector<1x1x256xf32>
    %2 = vector.shape_cast %1 : vector<1x1x256xf32> to vector<1x256xf32>
    %c0_4 = arith.constant 0 : index
    %c0_5 = arith.constant 0 : index
    %c0_6 = arith.constant 0 : index
    %3 = vector.load %arg3[%c0_4, %c0_5, %c0_6] : memref<1x1x256xf32, #tpu.memory_space<vmem>>, vector<1x1x256xf32>
    %4 = vector.shape_cast %3 : vector<1x1x256xf32> to vector<1x256xf32>
    %c0_7 = arith.constant 0 : index
    %c0_8 = arith.constant 0 : index
    %5 = vector.load %arg5[%c0_7, %c0_8] : memref<8x256xf32, #tpu.memory_space<vmem>>, vector<8x256xf32>
    %cst = arith.constant dense<0.000000e+00> : vector<512x256xf32>
    %6 = tpu.matmul %0, %5, %cst {dimension_numbers = #tpu.dot_dimension_numbers<[1], [0], [0], [1], [0, 0, 1, 1], [], []>} : vector<512x8xf32>, vector<8x256xf32>, vector<512x256xf32> -> vector<512x256xf32>
    %7 = vector.broadcast %2 : vector<1x256xf32> to vector<512x256xf32>
    %8 = arith.addf %6, %7 : vector<512x256xf32>
    %cst_9 = arith.constant 0.000000e+00 : f32
    %9 = vector.broadcast %cst_9 : f32 to vector<512x256xf32>
    %10 = arith.maximumf %8, %9 : vector<512x256xf32>
    %11 = arith.truncf %10 : vector<512x256xf32> to vector<512x256xbf16>
    %c0_10 = arith.constant 0 : index
    %c0_11 = arith.constant 0 : index
    %12 = vector.load %arg6[%c0_10, %c0_11] : memref<256x128xbf16, #tpu.memory_space<vmem>>, vector<256x128xbf16>
    %cst_12 = arith.constant dense<0.000000e+00> : vector<512x128xf32>
    %13 = tpu.matmul %11, %12, %cst_12 {dimension_numbers = #tpu.dot_dimension_numbers<[1], [0], [0], [1], [0, 0, 1, 1], [], []>} : vector<512x256xbf16>, vector<256x128xbf16>, vector<512x128xf32> -> vector<512x128xf32>
    %c0_13 = arith.constant 0 : index
    %c0_14 = arith.constant 0 : index
    %14 = vector.load %arg7[%c0_13, %c0_14] : memref<1x128xf32, #tpu.memory_space<vmem>>, vector<1x128xf32>
    %15 = vector.broadcast %14 : vector<1x128xf32> to vector<512x128xf32>
    %16 = arith.addf %13, %15 : vector<512x128xf32>
    %cst_15 = arith.constant 0.000000e+00 : f32
    %17 = vector.broadcast %cst_15 : f32 to vector<512x128xf32>
    %18 = arith.maximumf %16, %17 : vector<512x128xf32>
    %19 = arith.truncf %18 : vector<512x128xf32> to vector<512x128xbf16>
    %c0_16 = arith.constant 0 : index
    %c0_17 = arith.constant 0 : index
    %20 = vector.load %arg8[%c0_16, %c0_17] : memref<128x256xbf16, #tpu.memory_space<vmem>>, vector<128x256xbf16>
    %cst_18 = arith.constant dense<0.000000e+00> : vector<512x256xf32>
    %21 = tpu.matmul %19, %20, %cst_18 {dimension_numbers = #tpu.dot_dimension_numbers<[1], [0], [0], [1], [0, 0, 1, 1], [], []>} : vector<512x128xbf16>, vector<128x256xbf16>, vector<512x256xf32> -> vector<512x256xf32>
    %22 = vector.broadcast %4 : vector<1x256xf32> to vector<512x256xf32>
    %23 = arith.addf %21, %22 : vector<512x256xf32>
    %cst_19 = arith.constant 0.000000e+00 : f32
    %24 = vector.broadcast %cst_19 : f32 to vector<512x256xf32>
    %25 = arith.maximumf %23, %24 : vector<512x256xf32>
    %26 = arith.truncf %25 : vector<512x256xf32> to vector<512x256xbf16>
    %c0_20 = arith.constant 0 : index
    %c0_21 = arith.constant 0 : index
    %27 = vector.load %arg9[%c0_20, %c0_21] : memref<256x128xbf16, #tpu.memory_space<vmem>>, vector<256x128xbf16>
    %cst_22 = arith.constant dense<0.000000e+00> : vector<512x128xf32>
    %28 = tpu.matmul %26, %27, %cst_22 {dimension_numbers = #tpu.dot_dimension_numbers<[1], [0], [0], [1], [0, 0, 1, 1], [], []>} : vector<512x256xbf16>, vector<256x128xbf16>, vector<512x128xf32> -> vector<512x128xf32>
    %c0_23 = arith.constant 0 : index
    %c0_24 = arith.constant 0 : index
    %29 = vector.load %arg10[%c0_23, %c0_24] : memref<1x128xf32, #tpu.memory_space<vmem>>, vector<1x128xf32>
    %30 = vector.broadcast %29 : vector<1x128xf32> to vector<512x128xf32>
    %31 = arith.addf %28, %30 : vector<512x128xf32>
    %cst_25 = arith.constant 0.000000e+00 : f32
    %32 = vector.broadcast %cst_25 : f32 to vector<512x128xf32>
    %33 = arith.maximumf %31, %32 : vector<512x128xf32>
    %34 = arith.truncf %33 : vector<512x128xf32> to vector<512x128xbf16>
    %c0_26 = arith.constant 0 : index
    %c0_27 = arith.constant 0 : index
    %35 = vector.load %arg11[%c0_26, %c0_27] : memref<128x8xbf16, #tpu.memory_space<vmem>>, vector<128x8xbf16>
    %cst_28 = arith.constant dense<0.000000e+00> : vector<512x8xf32>
    %36 = tpu.matmul %34, %35, %cst_28 {dimension_numbers = #tpu.dot_dimension_numbers<[1], [0], [0], [1], [0, 0, 1, 1], [], []>} : vector<512x128xbf16>, vector<128x8xbf16>, vector<512x8xf32> -> vector<512x8xf32>
    %c0_29 = arith.constant 0 : index
    %c0_30 = arith.constant 0 : index
    %37 = vector.load %arg12[%c0_29, %c0_30] : memref<1x8xf32, #tpu.memory_space<vmem>>, vector<1x8xf32>
    %38 = vector.broadcast %37 : vector<1x8xf32> to vector<512x8xf32>
    %39 = arith.addf %36, %38 : vector<512x8xf32>
    %c0_31 = arith.constant 0 : index
    %c0_32 = arith.constant 0 : index
    %c0_33 = arith.constant 0 : index
    %40 = vector.load %arg13[%c0_31, %c0_32, %c0_33] : memref<1x512x8xf32, #tpu.memory_space<vmem>>, vector<1x512x8xf32>
    %41 = vector.shape_cast %40 : vector<1x512x8xf32> to vector<512x8xf32>
    %42 = vector.shape_cast %39 : vector<512x8xf32> to vector<1x512x8xf32>
    tpu.vector_store %arg13[%c0_31, %c0_32, %c0_33], %42 {strides = array<i32>} : memref<1x512x8xf32, #tpu.memory_space<vmem>>, vector<1x512x8xf32>,
    return
  }
  func.func @transform_0(%arg0: i32, %arg1: i32) -> (i32, i32, i32) {
    %c0_i32 = arith.constant 0 : i32
    %c0_i32_0 = arith.constant 0 : i32
    %c0_i32_1 = arith.constant 0 : i32
    return %arg0, %c0_i32, %c0_i32_0 : i32, i32, i32
  }
  func.func @transform_1(%arg0: i32, %arg1: i32) -> (i32, i32, i32) {
    %c0_i32 = arith.constant 0 : i32
    %c0_i32_0 = arith.constant 0 : i32
    %c0_i32_1 = arith.constant 0 : i32
    return %arg0, %c0_i32, %c0_i32_0 : i32, i32, i32
  }
  func.func @transform_2(%arg0: i32, %arg1: i32) -> (i32, i32) {
    %c0_i32 = arith.constant 0 : i32
    %c0_i32_0 = arith.constant 0 : i32
    return %arg1, %c0_i32 : i32, i32
  }
  func.func @transform_3(%arg0: i32, %arg1: i32) -> (i32, i32) {
    %c0_i32 = arith.constant 0 : i32
    %c0_i32_0 = arith.constant 0 : i32
    %c0_i32_1 = arith.constant 0 : i32
    return %c0_i32, %c0_i32_0 : i32, i32
  }
  func.func @transform_4(%arg0: i32, %arg1: i32) -> (i32, i32) {
    %c0_i32 = arith.constant 0 : i32
    %c0_i32_0 = arith.constant 0 : i32
    %c0_i32_1 = arith.constant 0 : i32
    return %c0_i32, %c0_i32_0 : i32, i32
  }
  func.func @transform_5(%arg0: i32, %arg1: i32) -> (i32, i32) {
    %c0_i32 = arith.constant 0 : i32
    %c0_i32_0 = arith.constant 0 : i32
    %c0_i32_1 = arith.constant 0 : i32
    return %c0_i32, %c0_i32_0 : i32, i32
  }
  func.func @transform_6(%arg0: i32, %arg1: i32) -> (i32, i32) {
    %c0_i32 = arith.constant 0 : i32
    %c0_i32_0 = arith.constant 0 : i32
    %c0_i32_1 = arith.constant 0 : i32
    return %c0_i32, %c0_i32_0 : i32, i32
  }
  func.func @transform_7(%arg0: i32, %arg1: i32) -> (i32, i32) {
    %c0_i32 = arith.constant 0 : i32
    %c0_i32_0 = arith.constant 0 : i32
    %c0_i32_1 = arith.constant 0 : i32
    return %c0_i32, %c0_i32_0 : i32, i32
  }
  func.func @transform_8(%arg0: i32, %arg1: i32) -> (i32, i32) {
    %c0_i32 = arith.constant 0 : i32
    %c0_i32_0 = arith.constant 0 : i32
    %c0_i32_1 = arith.constant 0 : i32
    return %c0_i32, %c0_i32_0 : i32, i32
  }
  func.func @transform_9(%arg0: i32, %arg1: i32) -> (i32, i32) {
    %c0_i32 = arith.constant 0 : i32
    %c0_i32_0 = arith.constant 0 : i32
    %c0_i32_1 = arith.constant 0 : i32
    return %c0_i32, %c0_i32_0 : i32, i32
  }
  func.func @transform_10(%arg0: i32, %arg1: i32) -> (i32, i32) {
    %c0_i32 = arith.constant 0 : i32
    %c0_i32_0 = arith.constant 0 : i32
    %c0_i32_1 = arith.constant 0 : i32
    return %c0_i32, %c0_i32_0 : i32, i32
  }
  func.func @transform_11(%arg0: i32, %arg1: i32) -> (i32, i32, i32) {
    %c0_i32 = arith.constant 0 : i32
    %c0_i32_0 = arith.constant 0 : i32
    return %arg0, %arg1, %c0_i32 : i32, i32, i32
  }
}

</mosaic_0001>

<bundles_post_ra>
// kernel: tpu_custom_call.1
= control target key start
LH: loop header
LB: loop body
LE: loop exit
PB: predicated region body
PF: predicated region fallthrough
CT: control target
= control target key end

     0   :  { %s4070_s17 = smov 0   ;;  %s4072_s18 = smov 0   ;;  %s6201_s0 = inlined_call_operand.vmem [shape: f32[2,1,256], index: 0, kind: input, shape index: {}]   ;;  %s6202_s1 = inlined_call_operand.vmem [shape: f32[2,1,256], index: 1, kind: input, shape index: {}]   ;;  %s6203_s2 = inlined_call_operand.vmem [shape: f32[512,8], index: 2, kind: input, shape index: {}]   ;;  %s6204_s3 = inlined_call_operand.vmem [shape: f32[8,256], index: 3, kind: input, shape index: {}]   ;;  %s6205_s4 = inlined_call_operand.vmem [shape: bf16[256,128], index: 4, kind: input, shape index: {}]   ;;  %s6206_s5 = inlined_call_operand.vmem [shape: f32[1,128], index: 5, kind: input, shape index: {}]   ;;  %s6207_s6 = inlined_call_operand.vmem [shape: bf16[128,256], index: 6, kind: input, shape index: {}]   ;;  %s6208_s7 = inlined_call_operand.vmem [shape: bf16[256,128], index: 7, kind: input, shape index: {}]   ;;  %s6209_s8 = inlined_call_operand.vmem [shape: f32[1,128], index: 8, kind: input, shape index: {}]   ;;  %s6210_s9 = inlined_call_operand.vmem [shape: bf16[128,8], index: 9, kind: input, shape index: {}]   ;;  %s6211_s10 = inlined_call_operand.vmem [shape: f32[1,8], index: 10, kind: input, shape index: {}]   ;;  %s6212_s11 = inlined_call_operand.vmem [shape: f32[2,512,8], index: 11, kind: output, shape index: {}]  }
   0x1   :  { %s4074_s19 = smov 0  }
   0x2 LB: > { %s33_s20 = sadd.s32 1, %s4004_s18  ;;  %p3499_p0 = scmp.ge.s32.totalorder %s4008_s19, 1  ;;  %s4008_s19 = sphi %s4074_s19, %s21_s19   ;;  %s4004_s18 = sphi %s4072_s18, %s6217_s18   ;;  %s4000_s17 = sphi %s4070_s17, %s6216_s17  }
   0x3   : > { %p35_p1 = scmp.ge.s32.totalorder %s33_s20, 2  ;;  %p370_p2 = scmp.lt.s32.totalorder %s4008_s19, 3 }
   0x5   : > { %s6219_s20 = smov (%p35_p1, %s33_s20), 0  ;;  %p371_p3 = pnand %p3499_p0, %p370_p2 }
   0x7   : > { %374 = sbr.rel (%p371_p3) target bundleno = 1587 (0x633), region = 64 }
   0xc   : > { %v512_v0 = vld [vmem:[%s6204_s3] sm:$0xff]  ;;  %vm519_vm0 = vcmask 64512   ;;  %v4101_v2 = vld [vmem:[%s6203_s2 + $0x90] sm:$0xff]  ;;  %v513_v3 = vld [vmem:[%s6204_s3 + $0x8] sm:$0xff]  ;;  %p422_p4 = scmp.lt.s32.totalorder %s4000_s17, 1 }
   0xd   : > { %v4096_v1 = vld [vmem:[%s6203_s2] sm:$0xff]  ;;  %727 = vmatpush.msra.mxu0 %v512_v0  ;;  %3915 = vmatpush.msra.mxu1 %v512_v0  ;;  %v481_v4 = vld [vmem:[%s6203_s2 + $0x118] sm:$0xff]  ;;  %v4117_v5 = vld [vmem:[%s6203_s2 + $0x8] sm:$0xff] }
   0xe   : > { %3504 = vmatmul.msk.f32.vlgmr.msra.gmra.mxu0 %vm519_vm0, %v4096_v1  ;;  %3522 = vmatmul.msk.f32.vlgmr.msra.gmra.mxu1 %vm519_vm0, %v4101_v2  ;;  %v4122_v6 = vld [vmem:[%s6203_s2 + $0x98] sm:$0xff]  ;;  %v482_v7 = vld [vmem:[%s6203_s2 + $0x120] sm:$0xff]  ;;  %v4135_v8 = vld [vmem:[%s6203_s2 + $0x10] sm:$0xff]  ;;  %s6221_s17 = smov (!%p422_p4, %s4000_s17), 1 }
   0xf   : > { %936 = vmatpush.msrb.mxu1 %v513_v3  ;;  %3916 = vmatpush.msra.mxu2 %v512_v0  ;;  %v4140_v9 = vld [vmem:[%s6203_s2 + $0xa0] sm:$0xff]  ;;  %v483_v10 = vld [vmem:[%s6203_s2 + $0x128] sm:$0xff]  ;;  %v4153_v11 = vld [vmem:[%s6203_s2 + $0x18] sm:$0xff]  ;;  %s3500_s15 = sshll.u32 %s6221_s17, 1  ;;  %s3858_s22 = sshll.u32 %s6221_s17, 9 }
  0x10   : > { %3539 = vmatmul.msk.f32.vlgmr.msra.gmra.mxu2 %vm519_vm0, %v481_v4  ;;  %3917 = vmatpush.msra.mxu3 %v512_v0  ;;  %v4158_v12 = vld [vmem:[%s6203_s2 + $0xa8] sm:$0xff]  ;;  %v484_v13 = vld [vmem:[%s6203_s2 + $0x130] sm:$0xff]  ;;  %v4171_v14 = vld [vmem:[%s6203_s2 + $0x20] sm:$0xff]  ;;  %s425_s24 = scalar_lea.vmem %s6201_s0, %s3500_s15  ;;  %s429_s23 = scalar_lea.vmem %s6202_s1, %s3500_s15 }
  0x11   : > { %v4176_v15 = vld [vmem:[%s6203_s2 + $0xb0] sm:$0xff]  ;;  %v485_v16 = vld [vmem:[%s6203_s2 + $0x138] sm:$0xff]  ;;  %v4189_v17 = vld [vmem:[%s6203_s2 + $0x28] sm:$0xff]  ;;  %s5844_s26 = scalar_lea.vmem %s6212_s11, %s3858_s22 }
  0x12   : > { %v4194_v18 = vld [vmem:[%s6203_s2 + $0xb8] sm:$0xff]  ;;  %v486_v19 = vld [vmem:[%s6203_s2 + $0x140] sm:$0xff]  ;;  %v4207_v20 = vld [vmem:[%s6203_s2 + $0x30] sm:$0xff] }
  0x13   : > { %v4212_v21 = vld [vmem:[%s6203_s2 + $0xc0] sm:$0xff]  ;;  %v487_v22 = vld [vmem:[%s6203_s2 + $0x148] sm:$0xff]  ;;  %v4225_v23 = vld [vmem:[%s6203_s2 + $0x38] sm:$0xff] }
  0x14   : > { %v4230_v24 = vld [vmem:[%s6203_s2 + $0xc8] sm:$0xff]  ;;  %v488_v25 = vld [vmem:[%s6203_s2 + $0x150] sm:$0xff]  ;;  %v4243_v26 = vld [vmem:[%s6203_s2 + $0x40] sm:$0xff] }
  0x15   : > { %v4248_v27 = vld [vmem:[%s6203_s2 + $0xd0] sm:$0xff]  ;;  %v489_v28 = vld [vmem:[%s6203_s2 + $0x158] sm:$0xff]  ;;  %v4261_v29 = vld [vmem:[%s6203_s2 + $0x48] sm:$0xff] }
  0x16   : > { %3505 = vmatmul.msk.f32.gmra.mxu0 %vm519_vm0, %v4117_v5  ;;  %3523 = vmatmul.msk.f32.gmra.mxu1 %vm519_vm0, %v4122_v6  ;;  %v4266_v30 = vld [vmem:[%s6203_s2 + $0xd8] sm:$0xff]  ;;  %v490_v31 = vld [vmem:[%s6203_s2 + $0x160] sm:$0xff]  ;;  %v4282_v33 = vld [vmem:[%s6203_s2 + $0x50] sm:$0xff] }
  0x17   : > { %v3866_v32 = vld [vmem:[%s6205_s4 + $0x38] sm:$0xff]  ;;  %v4287_v34 = vld [vmem:[%s6203_s2 + $0xe0] sm:$0xff]  ;;  %v491_v35 = vld [vmem:[%s6203_s2 + $0x168] sm:$0xff] }
  0x18   : > { %3540 = vmatmul.msk.f32.gmra.mxu2 %vm519_vm0, %v482_v7  ;;  %v3865_v36 = vld [vmem:[%s6205_s4 + $0x30] sm:$0xff]  ;;  %v3864_v37 = vld [vmem:[%s6205_s4 + $0x28] sm:$0xff]  ;;  %v4306_v38 = vld [vmem:[%s6203_s2 + $0x58] sm:$0xff] }
  0x19   : > { %1454 = vmatpush.bf16.msrb.mxu2 %v3866_v32  ;;  %v4311_v39 = vld [vmem:[%s6203_s2 + $0xe8] sm:$0xff]  ;;  %v492_v40 = vld [vmem:[%s6203_s2 + $0x170] sm:$0xff]  ;;  %v3863_v41 = vld [vmem:[%s6205_s4 + $0x20] sm:$0xff] }
  0x1a   : > { %v3862_v42 = vld [vmem:[%s6205_s4 + $0x18] sm:$0xff]  ;;  %v4330_v43 = vld [vmem:[%s6203_s2 + $0x60] sm:$0xff]  ;;  %v4335_v44 = vld [vmem:[%s6203_s2 + $0xf0] sm:$0xff] }
  0x1b   : > { %v493_v45 = vld [vmem:[%s6203_s2 + $0x178] sm:$0xff]  ;;  %v3861_v46 = vld [vmem:[%s6205_s4 + $0x10] sm:$0xff]  ;;  %v3860_v47 = vld [vmem:[%s6205_s4 + $0x8] sm:$0xff] }
  0x1c   : > { %v4354_v48 = vld [vmem:[%s6203_s2 + $0x68] sm:$0xff]  ;;  %v4359_v49 = vld [vmem:[%s6203_s2 + $0xf8] sm:$0xff]  ;;  %v494_v50 = vld [vmem:[%s6203_s2 + $0x180] sm:$0xff] }
  0x1d   : > { %1455 = vmatpush.bf16.msrb.mxu2 %v3865_v36  ;;  %v3859_v51 = vld [vmem:[%s6205_s4] sm:$0xff]  ;;  %v3889_v52 = vld [vmem:[%s6207_s6 + $0x74] sm:$0xf]  ;;  %v3756_v53 = vld [vmem:[%s6207_s6 + $0x78] sm:$0xf0] }
  0x1e   : > { %3506 = vmatmul.msk.f32.gmra.mxu0 %vm519_vm0, %v4135_v8  ;;  %3524 = vmatmul.msk.f32.gmra.mxu1 %vm519_vm0, %v4140_v9  ;;  %v3759_v54 = vor.u32 %v3889_v52, %v3756_v53  ;;  %v4381_v55 = vld [vmem:[%s6203_s2 + $0x70] sm:$0xff]  ;;  %v4386_v56 = vld [vmem:[%s6203_s2 + $0x100] sm:$0xff]  ;;  %v495_v57 = vld [vmem:[%s6203_s2 + $0x188] sm:$0xff] }
  0x1f   : > { %v4403_v58 = vld [vmem:[%s6203_s2 + $0x78] sm:$0xff]  ;;  %v4408_v59 = vld [vmem:[%s6203_s2 + $0x108] sm:$0xff]  ;;  %v496_v60 = vld [vmem:[%s6203_s2 + $0x190] sm:$0xff] }
  0x20   : > { %3541 = vmatmul.msk.f32.gmra.mxu2 %vm519_vm0, %v483_v10  ;;  %2158 = vmatpush.bf16.msra.mxu1 %v3759_v54  ;;  %v4424_v61 = vld [vmem:[%s425_s24] sm:$0x3]  ;;  %v4436_v3 = vld [vmem:[%s6203_s2 + $0x110] sm:$0xff]  ;;  %v497_v7 = vld [vmem:[%s6203_s2 + $0x198] sm:$0xff] }
  0x21   : > { %1456 = vmatpush.bf16.msrb.mxu2 %v3864_v37  ;;  %v4431_v0 = vld [vmem:[%s6203_s2 + $0x80] sm:$0xff]  ;;  %v4439_v4 = vperm.slane %v4424_v61, 0  ;;  %3555 = vmatmul.msk.f32.vlgmr.msra.gmra.mxu3 %vm519_vm0, %v497_v7  ;;  %v3874_v36 = vld [vmem:[%s6205_s4 + $0x78] sm:$0xff] }
  0x22   : > { %v498_v32 = vld [vmem:[%s6203_s2 + $0x1a0] sm:$0xff]  ;;  %1623 = vmatpush.bf16.msrb.mxu3 %v3874_v36 }
  0x25   : > { %1457 = vmatpush.bf16.msrb.mxu2 %v3863_v41 }
  0x26   : > { %3507 = vmatmul.msk.f32.gmra.mxu0 %vm519_vm0, %v4153_v11  ;;  %3525 = vmatmul.msk.f32.gmra.mxu1 %vm519_vm0, %v4158_v12 }
  0x28   : > { %3542 = vmatmul.msk.f32.gmra.mxu2 %vm519_vm0, %v484_v13 }
  0x29   : > { %1458 = vmatpush.bf16.msrb.mxu2 %v3862_v42  ;;  %3556 = vmatmul.msk.f32.gmra.mxu3 %vm519_vm0, %v498_v32 }
  0x2d   : > { %1459 = vmatpush.bf16.msrb.mxu2 %v3861_v46 }
  0x2e   : > { %3508 = vmatmul.msk.f32.gmra.mxu0 %vm519_vm0, %v4171_v14  ;;  %3526 = vmatmul.msk.f32.gmra.mxu1 %vm519_vm0, %v4176_v15 }
  0x30   : > { %3543 = vmatmul.msk.f32.gmra.mxu2 %vm519_vm0, %v485_v16 }
  0x31   : > { %1460 = vmatpush.bf16.msrb.mxu2 %v3860_v47 }
  0x35   : > { %1461 = vmatpush.bf16.msrb.mxu2 %v3859_v51 }
  0x36   : > { %3509 = vmatmul.msk.f32.gmra.mxu0 %vm519_vm0, %v4189_v17  ;;  %3527 = vmatmul.msk.f32.gmra.mxu1 %vm519_vm0, %v4194_v18 }
  0x38   : > { %3544 = vmatmul.msk.f32.gmra.mxu2 %vm519_vm0, %v486_v19  ;;  %v4455_v19 = vld [vmem:[%s6203_s2 + $0x88] sm:$0xff] }
  0x3e   : > { %3510 = vmatmul.msk.f32.gmra.mxu0 %vm519_vm0, %v4207_v20  ;;  %3528 = vmatmul.msk.f32.gmra.mxu1 %vm519_vm0, %v4212_v21 }
  0x40   : > { %3545 = vmatmul.msk.f32.gmra.mxu2 %vm519_vm0, %v487_v22 }
  0x46   : > { %3511 = vmatmul.msk.f32.gmra.mxu0 %vm519_vm0, %v4225_v23  ;;  %3529 = vmatmul.msk.f32.gmra.mxu1 %vm519_vm0, %v4230_v24 }
  0x48   : > { %3546 = vmatmul.msk.f32.gmra.mxu2 %vm519_vm0, %v488_v25 }
  0x4e   : > { %3512 = vmatmul.msk.f32.gmra.mxu0 %vm519_vm0, %v4243_v26  ;;  %3530 = vmatmul.msk.f32.gmra.mxu1 %vm519_vm0, %v4248_v27 }
  0x50   : > { %3547 = vmatmul.msk.f32.gmra.mxu2 %vm519_vm0, %v489_v28 }
  0x56   : > { %3513 = vmatmul.msk.f32.gmra.mxu0 %vm519_vm0, %v4261_v29  ;;  %3531 = vmatmul.msk.f32.gmra.mxu1 %vm519_vm0, %v4266_v30 }
  0x58   : > { %3548 = vmatmul.msk.f32.gmra.mxu2 %vm519_vm0, %v490_v31 }
  0x5e   : > { %3514 = vmatmul.msk.f32.gmra.mxu0 %vm519_vm0, %v4282_v33  ;;  %3532 = vmatmul.msk.f32.gmra.mxu1 %vm519_vm0, %v4287_v34 }
  0x60   : > { %3549 = vmatmul.msk.f32.gmra.mxu2 %vm519_vm0, %v491_v35 }
  0x66   : > { %3515 = vmatmul.msk.f32.gmra.mxu0 %vm519_vm0, %v4306_v38  ;;  %3533 = vmatmul.msk.f32.gmra.mxu1 %vm519_vm0, %v4311_v39 }
  0x68   : > { %3550 = vmatmul.msk.f32.gmra.mxu2 %vm519_vm0, %v492_v40 }
  0x6e   : > { %3516 = vmatmul.msk.f32.gmra.mxu0 %vm519_vm0, %v4330_v43  ;;  %3534 = vmatmul.msk.f32.gmra.mxu1 %vm519_vm0, %v4335_v44 }
  0x70   : > { %3551 = vmatmul.msk.f32.gmra.mxu2 %vm519_vm0, %v493_v45 }
  0x76   : > { %3517 = vmatmul.msk.f32.gmra.mxu0 %vm519_vm0, %v4354_v48  ;;  %3535 = vmatmul.msk.f32.gmra.mxu1 %vm519_vm0, %v4359_v49 }
  0x78   : > { %3552 = vmatmul.msk.f32.gmra.mxu2 %vm519_vm0, %v494_v50 }
  0x7e   : > { %3518 = vmatmul.msk.f32.gmra.mxu0 %vm519_vm0, %v4381_v55  ;;  %3536 = vmatmul.msk.f32.gmra.mxu1 %vm519_vm0, %v4386_v56 }
  0x80   : > { %3553 = vmatmul.msk.f32.gmra.mxu2 %vm519_vm0, %v495_v57  ;;  %v3873_v57 = vld [vmem:[%s6205_s4 + $0x70] sm:$0xff] }
  0x81   : > { %1624 = vmatpush.bf16.msrb.mxu3 %v3873_v57 }
  0x86   : > { %3519 = vmatmul.msk.f32.gmra.mxu0 %vm519_vm0, %v4403_v58  ;;  %3537 = vmatmul.msk.f32.gmra.mxu1 %vm519_vm0, %v4408_v59 }
  0x88   : > { %3554 = vmatmul.msk.f32.gmra.mxu2 %vm519_vm0, %v496_v60  ;;  %v500_v60 = vld [vmem:[%s6203_s2 + $0x1b0] sm:$0xff] }
  0x8b   : > { %v729_v62 = vpop.f32.mrf.mxu0  ;;  %v4426_v63 = vpop.f32.mrf.mxu1 }
  0x8c   : > { %v730_v10 = vadd.f32 %v729_v62, %v4439_v4 }
  0x8e   : > { %3520 = vmatmul.msk.f32.gmra.mxu0 %vm519_vm0, %v4431_v0  ;;  %3538 = vmatmul.msk.f32.gmra.mxu1 %vm519_vm0, %v4436_v3  ;;  %v1130_v22 = vmax.f32 %v730_v10, 0.0 }
  0x93   : > { %v732_v13 = vpop.f32.mrf.mxu0  ;;  %v4450_v16 = vpop.f32.mrf.mxu1 }
  0x94   : > { %v733_v25 = vadd.f32 %v732_v13, %v4439_v4  ;;  %v4458_v28 = vpop.f32.mrf.mxu2 }
  0x96   : > { %v1132_v31 = vmax.f32 %v733_v25, 0.0  ;;  %3521 = vmatmul.msk.f32.gmra.mxu0 %vm519_vm0, %v4455_v19  ;;  %3568 = vmatmul.msk.f32.vlgmr.msrb.gmra.mxu1 %vm519_vm0, %v4096_v1  ;;  %v499_v1 = vld [vmem:[%s6203_s2 + $0x1a8] sm:$0xff]  ;;  %v501_v25 = vld [vmem:[%s6203_s2 + $0x1b8] sm:$0xff] }
  0x97   : > { %3557 = vmatmul.msk.f32.gmra.mxu3 %vm519_vm0, %v499_v1 }
  0x98   : > { %v1258_v35 = vpack.c.bf16 %v1132_v31, %v1130_v22 }
  0x9a   : > { %1462 = vmatmul.bf16.vlgmr.msrb.gmra.mxu2 %v1258_v35 }
  0x9b   : > { %v735_v37 = vpop.f32.mrf.mxu0  ;;  %v4471_v40 = vpop.f32.mrf.mxu1 }
  0x9c   : > { %v837_v41 = vpop.f32.mrf.mxu2  ;;  %v736_v42 = vadd.f32 %v735_v37, %v4439_v4 }
  0x9d   : > { %v838_v45 = vadd.f32 %v837_v41, %v4439_v4 }
  0x9e   : > { %3569 = vmatmul.msk.f32.gmra.mxu1 %vm519_vm0, %v4117_v5  ;;  %v1134_v50 = vmax.f32 %v736_v42, 0.0 }
  0x9f   : > { %v1202_v53 = vmax.f32 %v838_v45, 0.0  ;;  %3558 = vmatmul.msk.f32.gmra.mxu3 %vm519_vm0, %v500_v60 }
  0xa3   : > { %v738_v46 = vpop.f32.mrf.mxu0  ;;  %v4481_v47 = vpop.f32.mrf.mxu1 }
  0xa4   : > { %v739_v51 = vadd.f32 %v738_v46, %v4439_v4  ;;  %v840_v52 = vpop.f32.mrf.mxu2  ;;  %v3872_v46 = vld [vmem:[%s6205_s4 + $0x68] sm:$0xff] }
  0xa5   : > { %v841_v5 = vadd.f32 %v840_v52, %v4439_v4  ;;  %1625 = vmatpush.bf16.msrb.mxu3 %v3872_v46 }
  0xa6   : > { %v1136_v54 = vmax.f32 %v739_v51, 0.0  ;;  %3570 = vmatmul.msk.f32.gmra.mxu1 %vm519_vm0, %v4135_v8  ;;  %v502_v51 = vld [vmem:[%s6203_s2 + $0x1c0] sm:$0xff] }
  0xa7   : > { %v1204_v62 = vmax.f32 %v841_v5, 0.0  ;;  %3559 = vmatmul.msk.f32.gmra.mxu3 %vm519_vm0, %v501_v25 }
  0xa8   : > { %v1260_v7 = vpack.c.bf16 %v1136_v54, %v1134_v50  ;;  %v3887_v50 = vld [vmem:[%s6207_s6 + $0x64] sm:$0xf] }
  0xa9   : > { %v4494_v10 = vpack.c.bf16 %v1204_v62, %v1202_v53  ;;  %v3748_v53 = vld [vmem:[%s6207_s6 + $0x68] sm:$0xf0] }
  0xaa   : > { %1467 = vmatmul.bf16.gmra.mxu2 %v1260_v7  ;;  %v3751_v5 = vor.u32 %v3887_v50, %v3748_v53  ;;  %v3871_v7 = vld [vmem:[%s6205_s4 + $0x60] sm:$0xff] }
  0xab   : > { %v741_v13 = vpop.f32.mrf.mxu0  ;;  %v4496_v22 = vpop.f32.mrf.mxu1  ;;  %1626 = vmatpush.bf16.msrb.mxu3 %v3871_v7 }
  0xac   : > { %v843_v8 = vpop.f32.mrf.mxu2  ;;  %v742_v31 = vadd.f32 %v741_v13, %v4439_v4  ;;  %2159 = vmatpush.bf16.msra.mxu1 %v3751_v5  ;;  %v503_v13 = vld [vmem:[%s6203_s2 + $0x1c8] sm:$0xff] }
  0xad   : > { %v844_v32 = vadd.f32 %v843_v8, %v4439_v4 }
  0xae   : > { %3571 = vmatmul.msk.f32.gmra.mxu1 %vm519_vm0, %v4153_v11  ;;  %v1138_v37 = vmax.f32 %v742_v31, 0.0 }
  0xaf   : > { %v1206_v42 = vmax.f32 %v844_v32, 0.0  ;;  %3560 = vmatmul.msk.f32.gmra.mxu3 %vm519_vm0, %v502_v51 }
  0xb3   : > { %v744_v35 = vpop.f32.mrf.mxu0  ;;  %v4506_v36 = vpop.f32.mrf.mxu1 }
  0xb4   : > { %v745_v41 = vadd.f32 %v744_v35, %v4439_v4  ;;  %v846_v1 = vpop.f32.mrf.mxu2 }
  0xb5   : > { %v847_v11 = vadd.f32 %v846_v1, %v4439_v4 }
  0xb6   : > { %v1140_v45 = vmax.f32 %v745_v41, 0.0  ;;  %3572 = vmatmul.msk.f32.gmra.mxu1 %vm519_vm0, %v4171_v14 }
  0xb7   : > { %v1208_v52 = vmax.f32 %v847_v11, 0.0  ;;  %3561 = vmatmul.msk.f32.gmra.mxu3 %vm519_vm0, %v503_v13  ;;  %v504_v11 = vld [vmem:[%s6203_s2 + $0x1d0] sm:$0xff] }
  0xb8   : > { %v1262_v14 = vpack.c.bf16 %v1140_v45, %v1138_v37 }
  0xb9   : > { %v4525_v54 = vpack.c.bf16 %v1208_v52, %v1206_v42 }
  0xba   : > { %1472 = vmatmul.bf16.gmra.mxu2 %v1262_v14  ;;  %v505_v14 = vld [vmem:[%s6203_s2 + $0x1d8] sm:$0xff] }
  0xbb   : > { %v747_v57 = vpop.f32.mrf.mxu0  ;;  %v4527_v60 = vpop.f32.mrf.mxu1 }
  0xbc   : > { %v849_v62 = vpop.f32.mrf.mxu2  ;;  %v748_v8 = vadd.f32 %v747_v57, %v4439_v4 }
  0xbd   : > { %v850_v25 = vadd.f32 %v849_v62, %v4439_v4 }
  0xbe   : > { %3573 = vmatmul.msk.f32.gmra.mxu1 %vm519_vm0, %v4189_v17  ;;  %v1142_v35 = vmax.f32 %v748_v8, 0.0 }
  0xbf   : > { %v1210_v41 = vmax.f32 %v850_v25, 0.0  ;;  %3562 = vmatmul.msk.f32.gmra.mxu3 %vm519_vm0, %v504_v11 }
  0xc3   : > { %v750_v31 = vpop.f32.mrf.mxu0  ;;  %v4540_v32 = vpop.f32.mrf.mxu1 }
  0xc4   : > { %v751_v17 = vadd.f32 %v750_v31, %v4439_v4  ;;  %v852_v37 = vpop.f32.mrf.mxu2 }
  0xc5   : > { %v853_v1 = vadd.f32 %v852_v37, %v4439_v4 }
  0xc6   : > { %v1144_v42 = vmax.f32 %v751_v17, 0.0  ;;  %3574 = vmatmul.msk.f32.gmra.mxu1 %vm519_vm0, %v4207_v20  ;;  %v3870_v20 = vld [vmem:[%s6205_s4 + $0x58] sm:$0xff]  ;;  %v506_v17 = vld [vmem:[%s6203_s2 + $0x1e0] sm:$0xff] }
  0xc7   : > { %v1212_v45 = vmax.f32 %v853_v1, 0.0  ;;  %3563 = vmatmul.msk.f32.gmra.mxu3 %vm519_vm0, %v505_v14 }
  0xc8   : > { %v1264_v46 = vpack.c.bf16 %v1144_v42, %v1142_v35  ;;  %1627 = vmatpush.bf16.msrb.mxu3 %v3870_v20 }
  0xc9   : > { %v4550_v50 = vpack.c.bf16 %v1212_v45, %v1210_v41 }
  0xca   : > { %1477 = vmatmul.bf16.gmra.mxu2 %v1264_v46  ;;  %v507_v46 = vld [vmem:[%s6203_s2 + $0x1e8] sm:$0xff] }
  0xcb   : > { %v753_v51 = vpop.f32.mrf.mxu0  ;;  %v4552_v52 = vpop.f32.mrf.mxu1 }
  0xcc   : > { %v855_v53 = vpop.f32.mrf.mxu2  ;;  %v754_v5 = vadd.f32 %v753_v51, %v4439_v4 }
  0xcd   : > { %v856_v57 = vadd.f32 %v855_v53, %v4439_v4 }
  0xce   : > { %3575 = vmatmul.msk.f32.gmra.mxu1 %vm519_vm0, %v4225_v23  ;;  %v1146_v13 = vmax.f32 %v754_v5, 0.0 }
  0xcf   : > { %v1214_v25 = vmax.f32 %v856_v57, 0.0  ;;  %3564 = vmatmul.msk.f32.gmra.mxu3 %vm519_vm0, %v506_v17 }
  0xd3   : > { %v756_v62 = vpop.f32.mrf.mxu0  ;;  %v4565_v7 = vpop.f32.mrf.mxu1 }
  0xd4   : > { %v757_v23 = vadd.f32 %v756_v62, %v4439_v4  ;;  %v858_v8 = vpop.f32.mrf.mxu2 }
  0xd5   : > { %v859_v31 = vadd.f32 %v858_v8, %v4439_v4  ;;  %v3868_v8 = vld [vmem:[%s6205_s4 + $0x48] sm:$0xff] }
  0xd6   : > { %v1148_v35 = vmax.f32 %v757_v23, 0.0  ;;  %3576 = vmatmul.msk.f32.gmra.mxu1 %vm519_vm0, %v4243_v26  ;;  %v3869_v26 = vld [vmem:[%s6205_s4 + $0x50] sm:$0xff] }
  0xd7   : > { %v1216_v37 = vmax.f32 %v859_v31, 0.0  ;;  %3565 = vmatmul.msk.f32.gmra.mxu3 %vm519_vm0, %v507_v46 }
  0xd8   : > { %v1266_v41 = vpack.c.bf16 %v1148_v35, %v1146_v13  ;;  %1628 = vmatpush.bf16.msrb.mxu3 %v3869_v26 }
  0xd9   : > { %v4575_v1 = vpack.c.bf16 %v1216_v37, %v1214_v25  ;;  %v508_v25 = vld [vmem:[%s6203_s2 + $0x1f0] sm:$0xff] }
  0xda   : > { %1482 = vmatmul.bf16.gmra.mxu2 %v1266_v41 }
  0xdb   : > { %v759_v42 = vpop.f32.mrf.mxu0  ;;  %v4577_v11 = vpop.f32.mrf.mxu1 }
  0xdc   : > { %v861_v45 = vpop.f32.mrf.mxu2  ;;  %v760_v51 = vadd.f32 %v759_v42, %v4439_v4  ;;  %1629 = vmatpush.bf16.msrb.mxu3 %v3868_v8  ;;  %v509_v42 = vld [vmem:[%s6203_s2 + $0x1f8] sm:$0xff] }
  0xdd   : > { %v862_v53 = vadd.f32 %v861_v45, %v4439_v4  ;;  %v3740_v8 = vld [vmem:[%s6207_s6 + $0x58] sm:$0xf0] }
  0xde   : > { %3577 = vmatmul.msk.f32.gmra.mxu1 %vm519_vm0, %v4261_v29  ;;  %v1150_v5 = vmax.f32 %v760_v51, 0.0 }
  0xdf   : > { %v1218_v62 = vmax.f32 %v862_v53, 0.0  ;;  %3566 = vmatmul.msk.f32.gmra.mxu3 %vm519_vm0, %v508_v25 }
  0xe3   : > { %v762_v20 = vpop.f32.mrf.mxu0  ;;  %v4590_v14 = vpop.f32.mrf.mxu1 }
  0xe4   : > { %v763_v29 = vadd.f32 %v762_v20, %v4439_v4  ;;  %v864_v57 = vpop.f32.mrf.mxu2 }
  0xe5   : > { %v865_v13 = vadd.f32 %v864_v57, %v4439_v4 }
  0xe6   : > { %v1152_v23 = vmax.f32 %v763_v29, 0.0  ;;  %3578 = vmatmul.msk.f32.gmra.mxu1 %vm519_vm0, %v4282_v33 }
  0xe7   : > { %v1220_v31 = vmax.f32 %v865_v13, 0.0  ;;  %3567 = vmatmul.msk.f32.gmra.mxu3 %vm519_vm0, %v509_v42  ;;  %v3885_v13 = vld [vmem:[%s6207_s6 + $0x54] sm:$0xf]  ;;  %v3898_v42 = vld [vmem:[%s6208_s7 + $0x38] sm:$0xff] }
  0xe8   : > { %v1268_v35 = vpack.c.bf16 %v1152_v23, %v1150_v5  ;;  %2651 = vmatpush.bf16.msra.mxu2 %v3898_v42 }
  0xe9   : > { %v4603_v17 = vpack.c.bf16 %v1220_v31, %v1218_v62  ;;  %v3867_v62 = vld [vmem:[%s6205_s4 + $0x40] sm:$0xff]  ;;  %v3743_v31 = vor.u32 %v3885_v13, %v3740_v8 }
  0xea   : > { %1487 = vmatmul.bf16.gmra.mxu2 %v1268_v35  ;;  %1630 = vmatpush.bf16.msrb.mxu3 %v3867_v62 }
  0xeb   : > { %v765_v37 = vpop.f32.mrf.mxu0  ;;  %v4605_v41 = vpop.f32.mrf.mxu1  ;;  %2160 = vmatpush.bf16.msra.mxu1 %v3743_v31 }
  0xec   : > { %v867_v33 = vpop.f32.mrf.mxu2  ;;  %v766_v45 = vadd.f32 %v765_v37, %v4439_v4 }
  0xed   : > { %v868_v26 = vadd.f32 %v867_v33, %v4439_v4 }
  0xee   : > { %3579 = vmatmul.msk.f32.gmra.mxu1 %vm519_vm0, %v4306_v38  ;;  %v1154_v53 = vmax.f32 %v766_v45, 0.0 }
  0xef   : > { %v1222_v29 = vmax.f32 %v868_v26, 0.0 }
  0xf3   : > { %v768_v46 = vpop.f32.mrf.mxu0  ;;  %v4615_v51 = vpop.f32.mrf.mxu1 }
  0xf4   : > { %v769_v20 = vadd.f32 %v768_v46, %v4439_v4  ;;  %v870_v5 = vpop.f32.mrf.mxu2  ;;  %v3906_v46 = vld [vmem:[%s6208_s7 + $0x78] sm:$0xff] }
  0xf5   : > { %v871_v38 = vadd.f32 %v870_v5, %v4439_v4  ;;  %2820 = vmatpush.bf16.msra.mxu3 %v3906_v46 }
  0xf6   : > { %v1156_v57 = vmax.f32 %v769_v20, 0.0  ;;  %3580 = vmatmul.msk.f32.gmra.mxu1 %vm519_vm0, %v4330_v43 }
  0xf7   : > { %v1224_v23 = vmax.f32 %v871_v38, 0.0 }
  0xf8   : > { %v1270_v25 = vpack.c.bf16 %v1156_v57, %v1154_v53 }
  0xf9   : > { %v4630_v35 = vpack.c.bf16 %v1224_v23, %v1222_v29 }
  0xfa   : > { %1492 = vmatmul.bf16.gmra.mxu2 %v1270_v25 }
  0xfb   : > { %v771_v43 = vpop.f32.mrf.mxu0  ;;  %v4632_v37 = vpop.f32.mrf.mxu1 }
  0xfc   : > { %v873_v33 = vpop.f32.mrf.mxu2  ;;  %v772_v45 = vadd.f32 %v771_v43, %v4439_v4 }
  0xfd   : > { %v874_v26 = vadd.f32 %v873_v33, %v4439_v4 }
  0xfe   : > { %3581 = vmatmul.msk.f32.gmra.mxu1 %vm519_vm0, %v4354_v48  ;;  %v1158_v5 = vmax.f32 %v772_v45, 0.0 }
  0xff   : > { %v1226_v38 = vmax.f32 %v874_v26, 0.0 }
 0x103   : > { %v774_v53 = vpop.f32.mrf.mxu0  ;;  %v4644_v20 = vpop.f32.mrf.mxu1 }
 0x104   : > { %v775_v29 = vadd.f32 %v774_v53, %v4439_v4  ;;  %v876_v48 = vpop.f32.mrf.mxu2  ;;  %v4661_v53 = vperm.slane %v4424_v61, 1 }
 0x105   : > { %v877_v57 = vadd.f32 %v876_v48, %v4439_v4  ;;  %v3890_v48 = vld [vmem:[%s6207_s6 + $0x74] sm:$0xf0] }
 0x106   : > { %v1160_v62 = vmax.f32 %v775_v29, 0.0  ;;  %3582 = vmatmul.msk.f32.gmra.mxu1 %vm519_vm0, %v4381_v55 }
 0x107   : > { %v1228_v13 = vmax.f32 %v877_v57, 0.0 }
 0x108   : > { %v1272_v23 = vpack.c.bf16 %v1160_v62, %v1158_v5 }
 0x109   : > { %v4650_v8 = vpack.c.bf16 %v1228_v13, %v1226_v38 }
 0x10a   : > { %1497 = vmatmul.bf16.gmra.mxu2 %v1272_v23  ;;  %v787_v23 = vadd.f32 %v4450_v16, %v4439_v4 }
 0x10b   : > { %v777_v25 = vpop.f32.mrf.mxu0  ;;  %v4652_v31 = vpop.f32.mrf.mxu1 }
 0x10c   : > { %v778_v43 = vadd.f32 %v777_v25, %v4439_v4  ;;  %v4657_v33 = vpop.f32.mrf.mxu2 }
 0x10e   : > { %3583 = vmatmul.msk.f32.gmra.mxu1 %vm519_vm0, %v4403_v58  ;;  %v1162_v26 = vmax.f32 %v778_v43, 0.0  ;;  %v3754_v58 = vld [vmem:[%s6207_s6 + $0x70] sm:$0xf]  ;;  %v784_v43 = vadd.f32 %v4426_v63, %v4439_v4 }
 0x10f   : > { %v3755_v57 = vor.u32 %v3890_v48, %v3754_v58 }
 0x111   : > { %1989 = vmatpush.bf16.msrb.mxu0 %v3755_v57 }
 0x113   : > { %v780_v42 = vpop.f32.mrf.mxu0  ;;  %v938_v45 = vpop.f32.mrf.mxu1 }
 0x114   : > { %v781_v55 = vadd.f32 %v780_v42, %v4439_v4  ;;  %v939_v29 = vadd.f32 %v938_v45, %v4661_v53  ;;  %v1168_v45 = vmax.f32 %v787_v23, 0.0  ;;  %v790_v23 = vadd.f32 %v4471_v40, %v4439_v4 }
 0x116   : > { %v1164_v46 = vmax.f32 %v781_v55, 0.0  ;;  %3584 = vmatmul.msk.f32.gmra.mxu1 %vm519_vm0, %v4431_v0  ;;  %v1131_v0 = vmax.f32 %v939_v29, 0.0  ;;  %v4683_v55 = vpop.f32.mrf.mxu3 }
 0x118   : > { %v1274_v5 = vpack.c.bf16 %v1164_v46, %v1162_v26  ;;  %v1166_v46 = vmax.f32 %v784_v43, 0.0 }
 0x11a   : > { %1502 = vmatmul.bf16.gmra.mxu2 %v1274_v5  ;;  %v1276_v5 = vpack.c.bf16 %v1168_v45, %v1166_v46  ;;  %v3883_v45 = vld [vmem:[%s6207_s6 + $0x44] sm:$0xf] }
 0x11b   : > { %v941_v38 = vpop.f32.mrf.mxu1 }
 0x11c   : > { %v942_v61 = vadd.f32 %v941_v38, %v4661_v53  ;;  %v3746_v38 = vld [vmem:[%s6207_s6 + $0x60] sm:$0xf] }
 0x11d   : > { %v4673_v62 = vpop.f32.mrf.mxu2 }
 0x11e   : > { %v1133_v13 = vmax.f32 %v942_v61, 0.0  ;;  %3585 = vmatmul.msk.f32.gmra.mxu1 %vm519_vm0, %v4455_v19  ;;  %v4699_v57 = vpop.f32.mrf.mxu3 }
 0x120   : > { %v1259_v25 = vpack.c.bf16 %v1133_v13, %v1131_v0  ;;  %v793_v0 = vadd.f32 %v4481_v47, %v4439_v4  ;;  %v3732_v47 = vld [vmem:[%s6207_s6 + $0x48] sm:$0xf0] }
 0x121   : > { %v3735_v46 = vor.u32 %v3883_v45, %v3732_v47 }
 0x122   : > { %1631 = vmatmul.bf16.vlgmr.msrb.gmra.mxu3 %v1259_v25  ;;  %v1172_v25 = vmax.f32 %v793_v0, 0.0 }
 0x123   : > { %v944_v42 = vpop.f32.mrf.mxu1  ;;  %2161 = vmatpush.bf16.msra.mxu1 %v3735_v46 }
 0x124   : > { %v945_v19 = vadd.f32 %v944_v42, %v4661_v53  ;;  %v1170_v42 = vmax.f32 %v790_v23, 0.0 }
 0x125   : > { %v4681_v26 = vpop.f32.mrf.mxu2 }
 0x126   : > { %3586 = vmatmul.msk.f32.gmra.mxu1 %vm519_vm0, %v4101_v2  ;;  %v1135_v63 = vmax.f32 %v945_v19, 0.0  ;;  %v3888_v2 = vld [vmem:[%s6207_s6 + $0x64] sm:$0xf0]  ;;  %v4716_v19 = vpop.f32.mrf.mxu3 }
 0x127   : > { %v3747_v61 = vor.u32 %v3888_v2, %v3746_v38  ;;  %v3738_v38 = vld [vmem:[%s6207_s6 + $0x50] sm:$0xf]  ;;  %v3886_v2 = vld [vmem:[%s6207_s6 + $0x54] sm:$0xf0] }
 0x128   : > { %v3739_v0 = vor.u32 %v3886_v2, %v3738_v38  ;;  %v3884_v38 = vld [vmem:[%s6207_s6 + $0x44] sm:$0xf0] }
 0x129   : > { %1990 = vmatpush.bf16.msrb.mxu0 %v3747_v61  ;;  %v3897_v61 = vld [vmem:[%s6208_s7 + $0x30] sm:$0xff] }
 0x12a   : > { %1507 = vmatmul.bf16.gmra.mxu2 %v1276_v5  ;;  %v1278_v5 = vpack.c.bf16 %v1172_v25, %v1170_v42 }
 0x12b   : > { %v947_v16 = vpop.f32.mrf.mxu1  ;;  %2652 = vmatpush.bf16.msra.mxu2 %v3897_v61  ;;  %v805_v61 = vadd.f32 %v4540_v32, %v4439_v4 }
 0x12c   : > { %v948_v29 = vadd.f32 %v947_v16, %v4661_v53 }
 0x12d   : > { %v4689_v58 = vpop.f32.mrf.mxu2  ;;  %1991 = vmatpush.bf16.msrb.mxu0 %v3739_v0 }
 0x12e   : > { %v1137_v48 = vmax.f32 %v948_v29, 0.0  ;;  %3587 = vmatmul.msk.f32.gmra.mxu1 %vm519_vm0, %v4122_v6  ;;  %v4739_v42 = vpop.f32.mrf.mxu3 }
 0x130   : > { %v1261_v13 = vpack.c.bf16 %v1137_v48, %v1135_v63 }
 0x132   : > { %1636 = vmatmul.bf16.gmra.mxu3 %v1261_v13  ;;  %v799_v13 = vadd.f32 %v4506_v36, %v4439_v4 }
 0x133   : > { %v950_v6 = vpop.f32.mrf.mxu1 }
 0x134   : > { %v951_v40 = vadd.f32 %v950_v6, %v4661_v53  ;;  %v3905_v6 = vld [vmem:[%s6208_s7 + $0x70] sm:$0xff]  ;;  %v1176_v45 = vmax.f32 %v799_v13, 0.0  ;;  %v802_v13 = vadd.f32 %v4527_v60, %v4439_v4 }
 0x135   : > { %v4705_v43 = vpop.f32.mrf.mxu2  ;;  %2821 = vmatpush.bf16.msra.mxu3 %v3905_v6 }
 0x136   : > { %3588 = vmatmul.msk.f32.gmra.mxu1 %vm519_vm0, %v4140_v9  ;;  %v1139_v9 = vmax.f32 %v951_v40, 0.0  ;;  %v1178_v6 = vmax.f32 %v802_v13, 0.0 }
 0x13a   : > { %1512 = vmatmul.bf16.gmra.mxu2 %v1278_v5 }
 0x13b   : > { %v953_v16 = vpop.f32.mrf.mxu1 }
 0x13c   : > { %v954_v29 = vadd.f32 %v953_v16, %v4661_v53 }
 0x13d   : > { %v4719_v63 = vpop.f32.mrf.mxu2 }
 0x13e   : > { %v1141_v48 = vmax.f32 %v954_v29, 0.0  ;;  %3589 = vmatmul.msk.f32.gmra.mxu1 %vm519_vm0, %v4158_v12  ;;  %v796_v12 = vadd.f32 %v4496_v22, %v4439_v4  ;;  %v4749_v29 = vpop.f32.mrf.mxu3 }
 0x140   : > { %v1263_v23 = vpack.c.bf16 %v1141_v48, %v1139_v9  ;;  %v1174_v46 = vmax.f32 %v796_v12, 0.0 }
 0x142   : > { %1641 = vmatmul.bf16.gmra.mxu3 %v1263_v23  ;;  %v1280_v36 = vpack.c.bf16 %v1176_v45, %v1174_v46 }
 0x143   : > { %v956_v25 = vpop.f32.mrf.mxu1 }
 0x144   : > { %v957_v5 = vadd.f32 %v956_v25, %v4661_v53 }
 0x145   : > { %v4741_v47 = vpop.f32.mrf.mxu2 }
 0x146   : > { %3590 = vmatmul.msk.f32.gmra.mxu1 %vm519_vm0, %v4176_v15  ;;  %v1143_v9 = vmax.f32 %v957_v5, 0.0  ;;  %v3730_v15 = vld [vmem:[%s6207_s6 + $0x40] sm:$0xf]  ;;  %v4767_v25 = vpop.f32.mrf.mxu3 }
 0x147   : > { %v3731_v2 = vor.u32 %v3884_v38, %v3730_v15  ;;  %v3722_v15 = vld [vmem:[%s6207_s6 + $0x30] sm:$0xf]  ;;  %v3882_v38 = vld [vmem:[%s6207_s6 + $0x34] sm:$0xf0] }
 0x149   : > { %1992 = vmatpush.bf16.msrb.mxu0 %v3731_v2 }
 0x14a   : > { %1517 = vmatmul.bf16.gmra.mxu2 %v1280_v36 }
 0x14b   : > { %v959_v22 = vpop.f32.mrf.mxu1 }
 0x14c   : > { %v960_v40 = vadd.f32 %v959_v22, %v4661_v53 }
 0x14d   : > { %v4747_v16 = vpop.f32.mrf.mxu2 }
 0x14e   : > { %v1145_v48 = vmax.f32 %v960_v40, 0.0  ;;  %3591 = vmatmul.msk.f32.gmra.mxu1 %vm519_vm0, %v4194_v18  ;;  %v1180_v18 = vmax.f32 %v805_v61, 0.0  ;;  %v811_v40 = vadd.f32 %v4565_v7, %v4439_v4 }
 0x150   : > { %v1265_v0 = vpack.c.bf16 %v1145_v48, %v1143_v9  ;;  %v1282_v45 = vpack.c.bf16 %v1180_v18, %v1178_v6  ;;  %v4777_v9 = vpop.f32.mrf.mxu3  ;;  %v808_v48 = vadd.f32 %v4552_v52, %v4439_v4  ;;  %v1184_v61 = vmax.f32 %v811_v40, 0.0 }
 0x152   : > { %1646 = vmatmul.bf16.gmra.mxu3 %v1265_v0  ;;  %v1182_v7 = vmax.f32 %v808_v48, 0.0 }
 0x153   : > { %v962_v23 = vpop.f32.mrf.mxu1 }
 0x154   : > { %v963_v46 = vadd.f32 %v962_v23, %v4661_v53  ;;  %v1284_v52 = vpack.c.bf16 %v1184_v61, %v1182_v7 }
 0x155   : > { %v4763_v12 = vpop.f32.mrf.mxu2 }
 0x156   : > { %3592 = vmatmul.msk.f32.gmra.mxu1 %vm519_vm0, %v4212_v21  ;;  %v1147_v60 = vmax.f32 %v963_v46, 0.0 }
 0x158   : > { %v4792_v18 = vpop.f32.mrf.mxu3 }
 0x15a   : > { %1522 = vmatmul.bf16.gmra.mxu2 %v1282_v45 }
 0x15b   : > { %v965_v32 = vpop.f32.mrf.mxu1 }
 0x15c   : > { %v966_v36 = vadd.f32 %v965_v32, %v4661_v53 }
 0x15d   : > { %v4771_v5 = vpop.f32.mrf.mxu2 }
 0x15e   : > { %v1149_v22 = vmax.f32 %v966_v36, 0.0  ;;  %3593 = vmatmul.msk.f32.gmra.mxu1 %vm519_vm0, %v4230_v24  ;;  %v3723_v24 = vor.u32 %v3882_v38, %v3722_v15  ;;  %v817_v36 = vadd.f32 %v4590_v14, %v4439_v4  ;;  %v3880_v14 = vld [vmem:[%s6207_s6 + $0x24] sm:$0xf0]  ;;  %v3881_v38 = vld [vmem:[%s6207_s6 + $0x34] sm:$0xf] }
 0x160   : > { %v1267_v21 = vpack.c.bf16 %v1149_v22, %v1147_v60  ;;  %1993 = vmatpush.bf16.msrb.mxu0 %v3723_v24  ;;  %v814_v60 = vadd.f32 %v4577_v11, %v4439_v4  ;;  %v1188_v40 = vmax.f32 %v817_v36, 0.0  ;;  %v823_v36 = vadd.f32 %v4615_v51, %v4439_v4 }
 0x162   : > { %1651 = vmatmul.bf16.gmra.mxu3 %v1267_v21  ;;  %v4803_v21 = vpop.f32.mrf.mxu3  ;;  %v1186_v15 = vmax.f32 %v814_v60, 0.0  ;;  %v820_v60 = vadd.f32 %v4605_v41, %v4439_v4  ;;  %v3878_v41 = vld [vmem:[%s6207_s6 + $0x14] sm:$0xf0] }
 0x163   : > { %v968_v2 = vpop.f32.mrf.mxu1 }
 0x164   : > { %v969_v13 = vadd.f32 %v968_v2, %v4661_v53  ;;  %v3724_v2 = vld [vmem:[%s6207_s6 + $0x38] sm:$0xf0]  ;;  %v1286_v24 = vpack.c.bf16 %v1188_v40, %v1186_v15  ;;  %v1192_v40 = vmax.f32 %v823_v36, 0.0 }
 0x165   : > { %v4787_v0 = vpop.f32.mrf.mxu2  ;;  %v3727_v61 = vor.u32 %v3881_v38, %v3724_v2 }
 0x166   : > { %3594 = vmatmul.msk.f32.gmra.mxu1 %vm519_vm0, %v4248_v27  ;;  %v1151_v46 = vmax.f32 %v969_v13, 0.0 }
 0x167   : > { %2162 = vmatpush.bf16.msra.mxu1 %v3727_v61 }
 0x16a   : > { %1527 = vmatmul.bf16.gmra.mxu2 %v1284_v52 }
 0x16b   : > { %v971_v23 = vpop.f32.mrf.mxu1 }
 0x16c   : > { %v972_v6 = vadd.f32 %v971_v23, %v4661_v53 }
 0x16d   : > { %v4795_v45 = vpop.f32.mrf.mxu2 }
 0x16e   : > { %v1153_v32 = vmax.f32 %v972_v6, 0.0  ;;  %3595 = vmatmul.msk.f32.gmra.mxu1 %vm519_vm0, %v4266_v30  ;;  %v3714_v30 = vld [vmem:[%s6207_s6 + $0x20] sm:$0xf] }
 0x16f   : > { %v3715_v11 = vor.u32 %v3880_v14, %v3714_v30  ;;  %v1190_v30 = vmax.f32 %v820_v60, 0.0  ;;  %v3706_v14 = vld [vmem:[%s6207_s6 + $0x10] sm:$0xf] }
 0x170   : > { %v1269_v27 = vpack.c.bf16 %v1153_v32, %v1151_v46  ;;  %v3896_v46 = vld [vmem:[%s6208_s7 + $0x28] sm:$0xff]  ;;  %v4830_v32 = vpop.f32.mrf.mxu3  ;;  %v3707_v38 = vor.u32 %v3878_v41, %v3706_v14 }
 0x171   : > { %1994 = vmatpush.bf16.msrb.mxu0 %v3715_v11  ;;  %2653 = vmatpush.bf16.msra.mxu2 %v3896_v46  ;;  %v1288_v51 = vpack.c.bf16 %v1192_v40, %v1190_v30  ;;  %v829_v46 = vadd.f32 %v4644_v20, %v4439_v4 }
 0x172   : > { %1656 = vmatmul.bf16.gmra.mxu3 %v1269_v27 }
 0x173   : > { %v974_v22 = vpop.f32.mrf.mxu1 }
 0x175   : > { %v4805_v48 = vpop.f32.mrf.mxu2  ;;  %1995 = vmatpush.bf16.msrb.mxu0 %v3707_v38 }
 0x176   : > { %3596 = vmatmul.msk.f32.gmra.mxu1 %vm519_vm0, %v4287_v34  ;;  %v975_v34 = vadd.f32 %v974_v22, %v4661_v53  ;;  %v3904_v22 = vld [vmem:[%s6208_s7 + $0x68] sm:$0xff] }
 0x177   : > { %2822 = vmatpush.bf16.msra.mxu3 %v3904_v22  ;;  %v1196_v22 = vmax.f32 %v829_v46, 0.0  ;;  %v4890_v46 = vld [vmem:[%s6206_s5] ss:$0 sm:$0xff] }
 0x178   : > { %v1155_v23 = vmax.f32 %v975_v34, 0.0  ;;  %v4849_v11 = vpop.f32.mrf.mxu3 }
 0x17a   : > { %1532 = vmatmul.bf16.gmra.mxu2 %v1286_v24 }
 0x17b   : > { %v977_v7 = vpop.f32.mrf.mxu1 }
 0x17c   : > { %v978_v52 = vadd.f32 %v977_v7, %v4661_v53 }
 0x17d   : > { %v4823_v13 = vpop.f32.mrf.mxu2 }
 0x17e   : > { %v1157_v6 = vmax.f32 %v978_v52, 0.0  ;;  %3597 = vmatmul.msk.f32.gmra.mxu1 %vm519_vm0, %v4311_v39  ;;  %v3698_v52 = vld [vmem:[%s6207_s6] sm:$0xf] }
 0x180   : > { %v1271_v27 = vpack.c.bf16 %v1157_v6, %v1155_v23  ;;  %v3876_v23 = vld [vmem:[%s6207_s6 + $0x4] sm:$0xf0]  ;;  %v4867_v60 = vpop.f32.mrf.mxu3 }
 0x181   : > { %v3699_v6 = vor.u32 %v3876_v23, %v3698_v52 }
 0x182   : > { %1661 = vmatmul.bf16.gmra.mxu3 %v1271_v27  ;;  %v826_v27 = vadd.f32 %v4632_v37, %v4439_v4 }
 0x183   : > { %v980_v39 = vpop.f32.mrf.mxu1  ;;  %1996 = vmatpush.bf16.msrb.mxu0 %v3699_v6 }
 0x184   : > { %v981_v2 = vadd.f32 %v980_v39, %v4661_v53  ;;  %v1194_v40 = vmax.f32 %v826_v27, 0.0 }
 0x185   : > { %v4839_v15 = vpop.f32.mrf.mxu2 }
 0x186   : > { %3598 = vmatmul.msk.f32.gmra.mxu1 %vm519_vm0, %v4335_v44  ;;  %v1159_v34 = vmax.f32 %v981_v2, 0.0  ;;  %v1290_v30 = vpack.c.bf16 %v1196_v22, %v1194_v40 }
 0x188   : > { %v4875_v41 = vpop.f32.mrf.mxu3 }
 0x18a   : > { %1537 = vmatmul.bf16.gmra.mxu2 %v1288_v51 }
 0x18b   : > { %v983_v24 = vpop.f32.mrf.mxu1 }
 0x18c   : > { %v984_v61 = vadd.f32 %v983_v24, %v4661_v53  ;;  %v835_v24 = vadd.f32 %v4458_v28, %v4439_v4  ;;  %v1464_v28 = vadd.f32 %v4890_v46, %v4673_v62 }
 0x18d   : > { %v4853_v44 = vpop.f32.mrf.mxu2 }
 0x18e   : > { %v1161_v7 = vmax.f32 %v984_v61, 0.0  ;;  %3599 = vmatmul.msk.f32.gmra.mxu1 %vm519_vm0, %v4359_v49 }
 0x190   : > { %v1273_v36 = vpack.c.bf16 %v1161_v7, %v1159_v34  ;;  %v1200_v7 = vmax.f32 %v835_v24, 0.0 }
 0x192   : > { %1666 = vmatmul.bf16.gmra.mxu3 %v1273_v36  ;;  %v3914_v36 = vld [vmem:[%s6210_s9 + $0x38] sm:$0xff] }
 0x193   : > { %v986_v49 = vpop.f32.mrf.mxu1  ;;  %3153 = vmatpush.bf16.msra.mxu0 %v3914_v36 }
 0x194   : > { %v987_v51 = vadd.f32 %v986_v49, %v4661_v53  ;;  %v1466_v49 = vadd.f32 %v4890_v46, %v4681_v26 }
 0x195   : > { %v4869_v39 = vpop.f32.mrf.mxu2 }
 0x196   : > { %3600 = vmatmul.msk.f32.gmra.mxu1 %vm519_vm0, %v4386_v56  ;;  %v1163_v38 = vmax.f32 %v987_v51, 0.0  ;;  %v832_v56 = vadd.f32 %v4652_v31, %v4439_v4 }
 0x198   : > { %v1198_v52 = vmax.f32 %v832_v56, 0.0 }
 0x19a   : > { %1542 = vmatmul.bf16.gmra.mxu2 %v1290_v30 }
 0x19b   : > { %v989_v20 = vpop.f32.mrf.mxu1 }
 0x19c   : > { %v990_v14 = vadd.f32 %v989_v20, %v4661_v53 }
 0x19d   : > { %v4877_v37 = vpop.f32.mrf.mxu2 }
 0x19e   : > { %v1165_v2 = vmax.f32 %v990_v14, 0.0  ;;  %3601 = vmatmul.msk.f32.gmra.mxu1 %vm519_vm0, %v4408_v59  ;;  %v1292_v59 = vpack.c.bf16 %v1200_v7, %v1198_v52  ;;  %v3953_v14 = vld [vmem:[%s6203_s2 + $0x118] sm:$0xff]  ;;  %v3954_v7 = vld [vmem:[%s6203_s2 + $0x120] sm:$0xff] }
 0x19f   : > { %v3879_v52 = vld [vmem:[%s6207_s6 + $0x24] sm:$0xf] }
 0x1a0   : > { %v1275_v61 = vpack.c.bf16 %v1165_v2, %v1163_v38 }
 0x1a2   : > { %1671 = vmatmul.bf16.gmra.mxu3 %v1275_v61 }
 0x1a3   : > { %v992_v34 = vpop.f32.mrf.mxu1 }
 0x1a4   : > { %v993_v31 = vadd.f32 %v992_v34, %v4661_v53 }
 0x1a5   : > { %v4885_v23 = vpop.f32.mrf.mxu2  ;;  %v1632_v6 = vpop.f32.mrf.mxu3 }
 0x1a6   : > { %3602 = vmatmul.msk.f32.gmra.mxu1 %vm519_vm0, %v4436_v3  ;;  %v1633_v22 = vadd.f32 %v1632_v6, %v1464_v28  ;;  %v1167_v51 = vmax.f32 %v993_v31, 0.0  ;;  %v3716_v6 = vld [vmem:[%s6207_s6 + $0x28] sm:$0xf0]  ;;  %v1469_v28 = vadd.f32 %v4890_v46, %v4689_v58 }
 0x1a7   : > { %v3955_v58 = vld [vmem:[%s6203_s2 + $0x128] sm:$0xff] }
 0x1a8   : > { %v1792_v38 = vmax.f32 %v1633_v22, 0.0 }
 0x1aa   : > { %1547 = vmatmul.bf16.gmra.mxu2 %v1292_v59  ;;  %v3719_v59 = vor.u32 %v3879_v52, %v3716_v6  ;;  %v3956_v52 = vld [vmem:[%s6203_s2 + $0x130] sm:$0xff]  ;;  %v1474_v6 = vadd.f32 %v4890_v46, %v4719_v63  ;;  %v3957_v63 = vld [vmem:[%s6203_s2 + $0x138] sm:$0xff] }
 0x1ab   : > { %v995_v27 = vpop.f32.mrf.mxu1 }
 0x1ac   : > { %v996_v40 = vadd.f32 %v995_v27, %v4661_v53  ;;  %2163 = vmatpush.bf16.msra.mxu1 %v3719_v59  ;;  %v1471_v27 = vadd.f32 %v4890_v46, %v4705_v43  ;;  %v3895_v43 = vld [vmem:[%s6208_s7 + $0x20] sm:$0xff] }
 0x1ad   : > { %v4903_v3 = vpop.f32.mrf.mxu2  ;;  %v1634_v30 = vpop.f32.mrf.mxu3  ;;  %2654 = vmatpush.bf16.msra.mxu2 %v3895_v43  ;;  %v3958_v43 = vld [vmem:[%s6203_s2 + $0x140] sm:$0xff] }
 0x1ae   : > { %v1169_v62 = vmax.f32 %v996_v40, 0.0  ;;  %v1635_v20 = vadd.f32 %v1634_v30, %v1466_v49  ;;  %3603 = vmatmul.msk.f32.gmra.mxu1 %vm519_vm0, %v3953_v14 }
 0x1b0   : > { %v1793_v2 = vmax.f32 %v1635_v20, 0.0  ;;  %v1277_v24 = vpack.c.bf16 %v1169_v62, %v1167_v51 }
 0x1b2   : > { %1676 = vmatmul.bf16.gmra.mxu3 %v1277_v24  ;;  %v4909_v26 = vpack.c.bf16 %v1793_v2, %v1792_v38  ;;  %v3903_v24 = vld [vmem:[%s6208_s7 + $0x60] sm:$0xff] }
 0x1b3   : > { %v998_v56 = vpop.f32.mrf.mxu1  ;;  %2823 = vmatpush.bf16.msra.mxu3 %v3903_v24  ;;  %v1479_v24 = vadd.f32 %v4890_v46, %v4747_v16  ;;  %v3959_v16 = vld [vmem:[%s6203_s2 + $0x148] sm:$0xff] }
 0x1b4   : > { %1997 = vmatmul.bf16.vlgmr.msrb.gmra.mxu0 %v4909_v26  ;;  %v999_v31 = vadd.f32 %v998_v56, %v4661_v53 }
 0x1b5   : > { %v4912_v61 = vpop.f32.mrf.mxu2  ;;  %v1637_v34 = vpop.f32.mrf.mxu3 }
 0x1b6   : > { %3604 = vmatmul.msk.f32.gmra.mxu1 %vm519_vm0, %v3954_v7  ;;  %v1638_v49 = vadd.f32 %v1637_v34, %v1469_v28  ;;  %v1171_v51 = vmax.f32 %v999_v31, 0.0  ;;  %v1476_v31 = vadd.f32 %v4890_v46, %v4741_v47 }
 0x1ba   : > { %1552 = vmatmul.bf16.gmra.mxu2 %v4494_v10  ;;  %v1794_v10 = vmax.f32 %v1638_v49, 0.0 }
 0x1bb   : > { %v1001_v36 = vpop.f32.mrf.mxu1 }
 0x1bc   : > { %v1002_v22 = vadd.f32 %v1001_v36, %v4661_v53 }
 0x1bd   : > { %v4931_v40 = vpop.f32.mrf.mxu2  ;;  %v1639_v30 = vpop.f32.mrf.mxu3 }
 0x1be   : > { %v1173_v62 = vmax.f32 %v1002_v22, 0.0  ;;  %v1640_v20 = vadd.f32 %v1639_v30, %v1471_v27  ;;  %3605 = vmatmul.msk.f32.gmra.mxu1 %vm519_vm0, %v3955_v58 }
 0x1c0   : > { %v1795_v14 = vmax.f32 %v1640_v20, 0.0  ;;  %v1279_v38 = vpack.c.bf16 %v1173_v62, %v1171_v51 }
 0x1c2   : > { %1681 = vmatmul.bf16.gmra.mxu3 %v1279_v38  ;;  %v4940_v2 = vpack.c.bf16 %v1795_v14, %v1794_v10 }
 0x1c3   : > { %v1004_v56 = vpop.f32.mrf.mxu1 }
 0x1c4   : > { %2002 = vmatmul.bf16.gmra.mxu0 %v4940_v2  ;;  %v1005_v59 = vadd.f32 %v1004_v56, %v4661_v53 }
 0x1c5   : > { %v4946_v34 = vpop.f32.mrf.mxu2  ;;  %v1642_v7 = vpop.f32.mrf.mxu3 }
 0x1c6   : > { %3606 = vmatmul.msk.f32.gmra.mxu1 %vm519_vm0, %v3956_v52  ;;  %v1643_v36 = vadd.f32 %v1642_v7, %v1474_v6  ;;  %v1175_v30 = vmax.f32 %v1005_v59, 0.0  ;;  %v1481_v52 = vadd.f32 %v4890_v46, %v4763_v12 }
 0x1ca   : > { %1557 = vmatmul.bf16.gmra.mxu2 %v4525_v54  ;;  %v1796_v54 = vmax.f32 %v1643_v36, 0.0 }
 0x1cb   : > { %v1007_v28 = vpop.f32.mrf.mxu1 }
 0x1cc   : > { %v1008_v27 = vadd.f32 %v1007_v28, %v4661_v53 }
 0x1cd   : > { %v4959_v49 = vpop.f32.mrf.mxu2  ;;  %v1644_v22 = vpop.f32.mrf.mxu3 }
 0x1ce   : > { %v1177_v51 = vmax.f32 %v1008_v27, 0.0  ;;  %v1645_v62 = vadd.f32 %v1644_v22, %v1476_v31  ;;  %3607 = vmatmul.msk.f32.gmra.mxu1 %vm519_vm0, %v3957_v63 }
 0x1d0   : > { %v1797_v20 = vmax.f32 %v1645_v62, 0.0  ;;  %v1281_v58 = vpack.c.bf16 %v1177_v51, %v1175_v30 }
 0x1d2   : > { %1686 = vmatmul.bf16.gmra.mxu3 %v1281_v58  ;;  %v4965_v47 = vpack.c.bf16 %v1797_v20, %v1796_v54  ;;  %v3960_v20 = vld [vmem:[%s6203_s2 + $0x150] sm:$0xff]  ;;  %v1484_v58 = vadd.f32 %v4890_v46, %v4771_v5 }
 0x1d3   : > { %v1010_v10 = vpop.f32.mrf.mxu1 }
 0x1d4   : > { %2007 = vmatmul.bf16.gmra.mxu0 %v4965_v47  ;;  %v1011_v56 = vadd.f32 %v1010_v10, %v4661_v53 }
 0x1d5   : > { %v4968_v14 = vpop.f32.mrf.mxu2  ;;  %v1647_v38 = vpop.f32.mrf.mxu3 }
 0x1d6   : > { %3608 = vmatmul.msk.f32.gmra.mxu1 %vm519_vm0, %v3958_v43  ;;  %v1648_v6 = vadd.f32 %v1647_v38, %v1479_v24  ;;  %v1179_v36 = vmax.f32 %v1011_v56, 0.0  ;;  %v5003_v38 = vld [vmem:[%s6210_s9 + $0x30] sm:$0xff]  ;;  %v1486_v24 = vadd.f32 %v4890_v46, %v4787_v0 }
 0x1d7   : > { %3154 = vmatpush.bf16.msra.mxu0 %v5003_v38 }
 0x1da   : > { %1562 = vmatmul.bf16.gmra.mxu2 %v4550_v50  ;;  %v1798_v50 = vmax.f32 %v1648_v6, 0.0 }
 0x1db   : > { %v1013_v7 = vpop.f32.mrf.mxu1 }
 0x1dc   : > { %v1014_v59 = vadd.f32 %v1013_v7, %v4661_v53 }
 0x1dd   : > { %v4981_v28 = vpop.f32.mrf.mxu2  ;;  %v1649_v31 = vpop.f32.mrf.mxu3 }
 0x1de   : > { %v1181_v27 = vmax.f32 %v1014_v59, 0.0  ;;  %v1650_v22 = vadd.f32 %v1649_v31, %v1481_v52  ;;  %3609 = vmatmul.msk.f32.gmra.mxu1 %vm519_vm0, %v3959_v16  ;;  %v3961_v31 = vld [vmem:[%s6203_s2 + $0x158] sm:$0xff] }
 0x1e0   : > { %v1799_v30 = vmax.f32 %v1650_v22, 0.0  ;;  %v1283_v51 = vpack.c.bf16 %v1181_v27, %v1179_v36 }
 0x1e2   : > { %1691 = vmatmul.bf16.gmra.mxu3 %v1283_v51  ;;  %v4987_v12 = vpack.c.bf16 %v1799_v30, %v1798_v50  ;;  %v3962_v51 = vld [vmem:[%s6203_s2 + $0x160] sm:$0xff] }
 0x1e3   : > { %v1016_v62 = vpop.f32.mrf.mxu1 }
 0x1e4   : > { %2012 = vmatmul.bf16.gmra.mxu0 %v4987_v12  ;;  %v1017_v10 = vadd.f32 %v1016_v62, %v4661_v53  ;;  %v3877_v62 = vld [vmem:[%s6207_s6 + $0x14] sm:$0xf] }
 0x1e5   : > { %v4990_v63 = vpop.f32.mrf.mxu2  ;;  %v1652_v54 = vpop.f32.mrf.mxu3 }
 0x1e6   : > { %3610 = vmatmul.msk.f32.gmra.mxu1 %vm519_vm0, %v3960_v20  ;;  %v1653_v56 = vadd.f32 %v1652_v54, %v1484_v58  ;;  %v1183_v6 = vmax.f32 %v1017_v10, 0.0  ;;  %v3708_v54 = vld [vmem:[%s6207_s6 + $0x18] sm:$0xf0]  ;;  %v1489_v58 = vadd.f32 %v4890_v46, %v4795_v45  ;;  %v3963_v45 = vld [vmem:[%s6203_s2 + $0x168] sm:$0xff] }
 0x1e7   : > { %v3711_v20 = vor.u32 %v3877_v62, %v3708_v54  ;;  %v3964_v54 = vld [vmem:[%s6203_s2 + $0x170] sm:$0xff] }
 0x1e8   : > { %v1800_v36 = vmax.f32 %v1653_v56, 0.0 }
 0x1e9   : > { %2164 = vmatpush.bf16.msra.mxu1 %v3711_v20  ;;  %v1494_v20 = vadd.f32 %v4890_v46, %v4823_v13  ;;  %v3965_v13 = vld [vmem:[%s6203_s2 + $0x178] sm:$0xff] }
 0x1ea   : > { %1567 = vmatmul.bf16.gmra.mxu2 %v4575_v1 }
 0x1eb   : > { %v1019_v43 = vpop.f32.mrf.mxu1 }
 0x1ec   : > { %v1020_v7 = vadd.f32 %v1019_v43, %v4661_v53 }
 0x1ed   : > { %v5009_v52 = vpop.f32.mrf.mxu2  ;;  %v1654_v5 = vpop.f32.mrf.mxu3 }
 0x1ee   : > { %v1185_v59 = vmax.f32 %v1020_v7, 0.0  ;;  %v1655_v1 = vadd.f32 %v1654_v5, %v1486_v24  ;;  %3611 = vmatmul.msk.f32.gmra.mxu1 %vm519_vm0, %v3961_v31  ;;  %v1491_v24 = vadd.f32 %v4890_v46, %v4805_v48  ;;  %v3894_v48 = vld [vmem:[%s6208_s7 + $0x18] sm:$0xff] }
 0x1ef   : > { %2655 = vmatpush.bf16.msra.mxu2 %v3894_v48 }
 0x1f0   : > { %v1801_v27 = vmax.f32 %v1655_v1, 0.0  ;;  %v1285_v0 = vpack.c.bf16 %v1185_v59, %v1183_v6 }
 0x1f2   : > { %1696 = vmatmul.bf16.gmra.mxu3 %v1285_v0  ;;  %v5015_v22 = vpack.c.bf16 %v1801_v27, %v1800_v36 }
 0x1f3   : > { %v1022_v16 = vpop.f32.mrf.mxu1 }
 0x1f4   : > { %2017 = vmatmul.bf16.gmra.mxu0 %v5015_v22  ;;  %v1023_v10 = vadd.f32 %v1022_v16, %v4661_v53  ;;  %v3902_v16 = vld [vmem:[%s6208_s7 + $0x58] sm:$0xff] }
 0x1f5   : > { %v5018_v50 = vpop.f32.mrf.mxu2  ;;  %v1657_v30 = vpop.f32.mrf.mxu3  ;;  %2824 = vmatpush.bf16.msra.mxu3 %v3902_v16  ;;  %v3966_v16 = vld [vmem:[%s6203_s2 + $0x180] sm:$0xff] }
 0x1f6   : > { %3612 = vmatmul.msk.f32.gmra.mxu1 %vm519_vm0, %v3962_v51  ;;  %v1658_v56 = vadd.f32 %v1657_v30, %v1489_v58  ;;  %v1187_v59 = vmax.f32 %v1023_v10, 0.0 }
 0x1fa   : > { %1572 = vmatmul.bf16.gmra.mxu2 %v4603_v17  ;;  %v1802_v17 = vmax.f32 %v1658_v56, 0.0 }
 0x1fb   : > { %v1025_v43 = vpop.f32.mrf.mxu1 }
 0x1fc   : > { %v1026_v7 = vadd.f32 %v1025_v43, %v4661_v53  ;;  %v1496_v43 = vadd.f32 %v4890_v46, %v4839_v15 }
 0x1fd   : > { %v5037_v5 = vpop.f32.mrf.mxu2  ;;  %v1659_v6 = vpop.f32.mrf.mxu3 }
 0x1fe   : > { %v1189_v1 = vmax.f32 %v1026_v7, 0.0  ;;  %v1660_v31 = vadd.f32 %v1659_v6, %v1491_v24  ;;  %3613 = vmatmul.msk.f32.gmra.mxu1 %vm519_vm0, %v3963_v45 }
 0x200   : > { %v1803_v36 = vmax.f32 %v1660_v31, 0.0  ;;  %v1287_v27 = vpack.c.bf16 %v1189_v1, %v1187_v59 }
 0x202   : > { %1701 = vmatmul.bf16.gmra.mxu3 %v1287_v27  ;;  %v5046_v0 = vpack.c.bf16 %v1803_v36, %v1802_v17 }
 0x203   : > { %v1028_v30 = vpop.f32.mrf.mxu1 }
 0x204   : > { %2022 = vmatmul.bf16.gmra.mxu0 %v5046_v0  ;;  %v1029_v58 = vadd.f32 %v1028_v30, %v4661_v53  ;;  %v1499_v30 = vadd.f32 %v4890_v46, %v4853_v44  ;;  %v3967_v44 = vld [vmem:[%s6203_s2 + $0x188] sm:$0xff] }
 0x205   : > { %v5052_v51 = vpop.f32.mrf.mxu2  ;;  %v1662_v62 = vpop.f32.mrf.mxu3 }
 0x206   : > { %3614 = vmatmul.msk.f32.gmra.mxu1 %vm519_vm0, %v3964_v54  ;;  %v1663_v24 = vadd.f32 %v1662_v62, %v1494_v20  ;;  %v1191_v59 = vmax.f32 %v1029_v58, 0.0  ;;  %v1501_v20 = vadd.f32 %v4890_v46, %v4869_v39  ;;  %v883_v39 = vadd.f32 %v4683_v55, %v4439_v4 }
 0x20a   : > { %1577 = vmatmul.bf16.gmra.mxu2 %v4630_v35  ;;  %v1804_v35 = vmax.f32 %v1663_v24, 0.0 }
 0x20b   : > { %v1031_v10 = vpop.f32.mrf.mxu1 }
 0x20c   : > { %v1032_v56 = vadd.f32 %v1031_v10, %v4661_v53 }
 0x20d   : > { %v5065_v7 = vpop.f32.mrf.mxu2  ;;  %v1664_v6 = vpop.f32.mrf.mxu3 }
 0x20e   : > { %v1193_v1 = vmax.f32 %v1032_v56, 0.0  ;;  %v1665_v31 = vadd.f32 %v1664_v6, %v1496_v43  ;;  %3615 = vmatmul.msk.f32.gmra.mxu1 %vm519_vm0, %v3965_v13 }
 0x210   : > { %v1805_v45 = vmax.f32 %v1665_v31, 0.0  ;;  %v1289_v17 = vpack.c.bf16 %v1193_v1, %v1191_v59 }
 0x212   : > { %1706 = vmatmul.bf16.gmra.mxu3 %v1289_v17  ;;  %v5071_v15 = vpack.c.bf16 %v1805_v45, %v1804_v35 }
 0x213   : > { %v1034_v36 = vpop.f32.mrf.mxu1 }
 0x214   : > { %2027 = vmatmul.bf16.gmra.mxu0 %v5071_v15  ;;  %v1035_v62 = vadd.f32 %v1034_v36, %v4661_v53  ;;  %v1232_v36 = vmax.f32 %v883_v39, 0.0  ;;  %v889_v39 = vadd.f32 %v4716_v19, %v4439_v4 }
 0x215   : > { %v5074_v27 = vpop.f32.mrf.mxu2  ;;  %v1667_v48 = vpop.f32.mrf.mxu3 }
 0x216   : > { %3616 = vmatmul.msk.f32.gmra.mxu1 %vm519_vm0, %v3966_v16  ;;  %v1668_v58 = vadd.f32 %v1667_v48, %v1499_v30  ;;  %v1195_v56 = vmax.f32 %v1035_v62, 0.0  ;;  %v1504_v30 = vadd.f32 %v4890_v46, %v4877_v37 }
 0x218   : > { %v1806_v1 = vmax.f32 %v1668_v58, 0.0 }
 0x21a   : > { %1582 = vmatmul.bf16.gmra.mxu2 %v4650_v8  ;;  %v880_v8 = vadd.f32 %v4657_v33, %v4439_v4  ;;  %v3968_v33 = vld [vmem:[%s6203_s2 + $0x190] sm:$0xff] }
 0x21b   : > { %v1037_v54 = vpop.f32.mrf.mxu1 }
 0x21c   : > { %v1038_v10 = vadd.f32 %v1037_v54, %v4661_v53  ;;  %v1230_v17 = vmax.f32 %v880_v8, 0.0  ;;  %v886_v8 = vadd.f32 %v4699_v57, %v4439_v4 }
 0x21d   : > { %v5087_v43 = vpop.f32.mrf.mxu2  ;;  %v1669_v24 = vpop.f32.mrf.mxu3 }
 0x21e   : > { %v1197_v6 = vmax.f32 %v1038_v10, 0.0  ;;  %v1670_v59 = vadd.f32 %v1669_v24, %v1501_v20  ;;  %3617 = vmatmul.msk.f32.gmra.mxu1 %vm519_vm0, %v3967_v44  ;;  %v1308_v55 = vpack.c.bf16 %v1232_v36, %v1230_v17  ;;  %v1506_v20 = vadd.f32 %v4890_v46, %v4885_v23  ;;  %v5115_v24 = vld [vmem:[%s6210_s9 + $0x28] sm:$0xff]  ;;  %v3969_v23 = vld [vmem:[%s6203_s2 + $0x198] sm:$0xff] }
 0x21f   : > { %3155 = vmatpush.bf16.msra.mxu0 %v5115_v24 }
 0x220   : > { %v1807_v31 = vmax.f32 %v1670_v59, 0.0  ;;  %v1291_v13 = vpack.c.bf16 %v1197_v6, %v1195_v56 }
 0x222   : > { %1711 = vmatmul.bf16.gmra.mxu3 %v1291_v13  ;;  %v5097_v35 = vpack.c.bf16 %v1807_v31, %v1806_v1 }
 0x223   : > { %v1040_v45 = vpop.f32.mrf.mxu1 }
 0x224   : > { %2032 = vmatmul.bf16.gmra.mxu0 %v5097_v35  ;;  %v1041_v62 = vadd.f32 %v1040_v45, %v4661_v53  ;;  %v5133_v45 = vld [vmem:[%s429_s23] sm:$0x3] }
 0x225   : > { %v5100_v48 = vpop.f32.mrf.mxu2  ;;  %v1672_v16 = vpop.f32.mrf.mxu3 }
 0x226   : > { %3618 = vmatmul.msk.f32.gmra.mxu1 %vm519_vm0, %v3968_v33  ;;  %v1673_v58 = vadd.f32 %v1672_v16, %v1504_v30  ;;  %v1199_v37 = vmax.f32 %v1041_v62, 0.0  ;;  %v1234_v33 = vmax.f32 %v886_v8, 0.0  ;;  %v5138_v30 = vperm.slane %v5133_v45, 0  ;;  %v3970_v62 = vld [vmem:[%s6203_s2 + $0x1a0] sm:$0xff] }
 0x227   : > { %v1511_v8 = vadd.f32 %v4890_v46, %v4912_v61  ;;  %v892_v61 = vadd.f32 %v4739_v42, %v4439_v4  ;;  %v3901_v42 = vld [vmem:[%s6208_s7 + $0x50] sm:$0xff] }
 0x228   : > { %v1808_v1 = vmax.f32 %v1673_v58, 0.0  ;;  %v3875_v58 = vld [vmem:[%s6207_s6 + $0x4] sm:$0xf]  ;;  %2825 = vmatpush.bf16.msra.mxu3 %v3901_v42 }
 0x22a   : > { %1587 = vmatmul.bf16.gmra.mxu2 %v1308_v55  ;;  %v1236_v55 = vmax.f32 %v889_v39, 0.0 }
 0x22b   : > { %v1043_v54 = vpop.f32.mrf.mxu1 }
 0x22c   : > { %v1044_v10 = vadd.f32 %v1043_v54, %v4661_v53 }
 0x22d   : > { %v5117_v56 = vpop.f32.mrf.mxu2  ;;  %v1674_v6 = vpop.f32.mrf.mxu3 }
 0x22e   : > { %v1201_v59 = vmax.f32 %v1044_v10, 0.0  ;;  %v1675_v44 = vadd.f32 %v1674_v6, %v1506_v20  ;;  %3619 = vmatmul.msk.f32.gmra.mxu1 %vm519_vm0, %v3969_v23  ;;  %v1310_v20 = vpack.c.bf16 %v1236_v55, %v1234_v33  ;;  %v3700_v10 = vld [vmem:[%s6207_s6 + $0x8] sm:$0xf0] }
 0x230   : > { %v1809_v31 = vmax.f32 %v1675_v44, 0.0  ;;  %v1293_v13 = vpack.c.bf16 %v1201_v59, %v1199_v37  ;;  %v3703_v37 = vor.u32 %v3875_v58, %v3700_v10  ;;  %v1509_v59 = vadd.f32 %v4890_v46, %v4903_v3 }
 0x231   : > { %v1998_v17 = vpop.f32.mrf.mxu0 }
 0x232   : > { %1716 = vmatmul.bf16.gmra.mxu3 %v1293_v13  ;;  %v5135_v36 = vpack.c.bf16 %v1809_v31, %v1808_v1  ;;  %v1999_v54 = vadd.f32 %v1998_v17, %v5138_v30  ;;  %2165 = vmatpush.bf16.msra.mxu1 %v3703_v37  ;;  %v3893_v37 = vld [vmem:[%s6208_s7 + $0x10] sm:$0xff] }
 0x233   : > { %v1046_v16 = vpop.f32.mrf.mxu1  ;;  %2656 = vmatpush.bf16.msra.mxu2 %v3893_v37 }
 0x234   : > { %2037 = vmatmul.bf16.gmra.mxu0 %v5135_v36  ;;  %v1047_v44 = vadd.f32 %v1046_v16, %v4661_v53  ;;  %v2327_v1 = vmax.f32 %v1999_v54, 0.0 }
 0x235   : > { %v5141_v57 = vpop.f32.mrf.mxu2  ;;  %v1677_v19 = vpop.f32.mrf.mxu3 }
 0x236   : > { %3620 = vmatmul.msk.f32.gmra.mxu1 %vm519_vm0, %v3970_v62  ;;  %v1678_v31 = vadd.f32 %v1677_v19, %v1509_v59  ;;  %v1203_v62 = vmax.f32 %v1047_v44, 0.0  ;;  %v895_v19 = vadd.f32 %v4749_v29, %v4439_v4 }
 0x238   : > { %v1810_v54 = vmax.f32 %v1678_v31, 0.0  ;;  %v3972_v31 = vld [vmem:[%s6203_s2 + $0x1b0] sm:$0xff] }
 0x239   : > { %v2000_v6 = vpop.f32.mrf.mxu0 }
 0x23a   : > { %v2001_v23 = vadd.f32 %v2000_v6, %v5138_v30  ;;  %1592 = vmatmul.bf16.gmra.mxu2 %v1310_v20  ;;  %v3971_v20 = vld [vmem:[%s6203_s2 + $0x1a8] sm:$0xff] }
 0x23b   : > { %v1049_v39 = vpop.f32.mrf.mxu1 }
 0x23c   : > { %v2329_v13 = vmax.f32 %v2001_v23, 0.0  ;;  %v1050_v17 = vadd.f32 %v1049_v39, %v4661_v53  ;;  %v1240_v39 = vmax.f32 %v895_v19, 0.0 }
 0x23d   : > { %v5161_v33 = vpop.f32.mrf.mxu2  ;;  %v1679_v55 = vpop.f32.mrf.mxu3 }
 0x23e   : > { %v5163_v3 = vpack.c.bf16 %v2329_v13, %v2327_v1  ;;  %v1205_v16 = vmax.f32 %v1050_v17, 0.0  ;;  %v1680_v58 = vadd.f32 %v1679_v55, %v1511_v8  ;;  %3621 = vmatmul.msk.f32.gmra.mxu1 %vm519_vm0, %v3971_v20  ;;  %v1238_v8 = vmax.f32 %v892_v61, 0.0 }
 0x23f   : > { %v1516_v20 = vadd.f32 %v4890_v46, %v4946_v34  ;;  %v898_v34 = vadd.f32 %v4767_v25, %v4439_v4  ;;  %v3974_v25 = vld [vmem:[%s6203_s2 + $0x1c0] sm:$0xff] }
 0x240   : > { %v1811_v10 = vmax.f32 %v1680_v58, 0.0  ;;  %v1295_v6 = vpack.c.bf16 %v1205_v16, %v1203_v62  ;;  %v1312_v17 = vpack.c.bf16 %v1240_v39, %v1238_v8  ;;  %v1514_v62 = vadd.f32 %v4890_v46, %v4931_v40 }
 0x241   : > { %v2003_v59 = vpop.f32.mrf.mxu0 }
 0x242   : > { %1721 = vmatmul.bf16.gmra.mxu3 %v1295_v6  ;;  %v5176_v44 = vpack.c.bf16 %v1811_v10, %v1810_v54  ;;  %v2004_v13 = vadd.f32 %v2003_v59, %v5138_v30 }
 0x243   : > { %v1052_v23 = vpop.f32.mrf.mxu1 }
 0x244   : > { %2042 = vmatmul.bf16.gmra.mxu0 %v5176_v44  ;;  %v1053_v16 = vadd.f32 %v1052_v23, %v4661_v53  ;;  %v2331_v19 = vmax.f32 %v2004_v13, 0.0  ;;  %v3973_v23 = vld [vmem:[%s6203_s2 + $0x1b8] sm:$0xff] }
 0x245   : > { %v5182_v29 = vpop.f32.mrf.mxu2  ;;  %v1682_v1 = vpop.f32.mrf.mxu3 }
 0x246   : > { %3622 = vmatmul.msk.f32.gmra.mxu1 %vm519_vm0, %v3972_v31  ;;  %v1683_v54 = vadd.f32 %v1682_v1, %v1514_v62  ;;  %v1207_v8 = vmax.f32 %v1053_v16, 0.0  ;;  %v901_v1 = vadd.f32 %v4777_v9, %v4439_v4 }
 0x248   : > { %v1812_v31 = vmax.f32 %v1683_v54, 0.0 }
 0x249   : > { %v2005_v55 = vpop.f32.mrf.mxu0 }
 0x24a   : > { %v2006_v58 = vadd.f32 %v2005_v55, %v5138_v30  ;;  %1597 = vmatmul.bf16.gmra.mxu2 %v1312_v17 }
 0x24b   : > { %v1055_v61 = vpop.f32.mrf.mxu1 }
 0x24c   : > { %v2333_v10 = vmax.f32 %v2006_v58, 0.0  ;;  %v1056_v6 = vadd.f32 %v1055_v61, %v4661_v53  ;;  %v1242_v58 = vmax.f32 %v898_v34, 0.0 }
 0x24d   : > { %v5196_v37 = vpop.f32.mrf.mxu2  ;;  %v1684_v59 = vpop.f32.mrf.mxu3 }
 0x24e   : > { %v1209_v39 = vmax.f32 %v1056_v6, 0.0  ;;  %v1685_v40 = vadd.f32 %v1684_v59, %v1516_v20  ;;  %3623 = vmatmul.msk.f32.gmra.mxu1 %vm519_vm0, %v3973_v23  ;;  %v5202_v42 = vpack.c.bf16 %v2333_v10, %v2331_v19  ;;  %v1244_v20 = vmax.f32 %v901_v1, 0.0 }
 0x24f   : > { %v1519_v6 = vadd.f32 %v4890_v46, %v4959_v49 }
 0x250   : > { %v1813_v13 = vmax.f32 %v1685_v40, 0.0  ;;  %v1297_v17 = vpack.c.bf16 %v1209_v39, %v1207_v8  ;;  %v1314_v54 = vpack.c.bf16 %v1244_v20, %v1242_v58  ;;  %v1521_v39 = vadd.f32 %v4890_v46, %v4968_v14 }
 0x251   : > { %v2008_v55 = vpop.f32.mrf.mxu0  ;;  %v904_v14 = vadd.f32 %v4792_v18, %v4439_v4  ;;  %v3976_v18 = vld [vmem:[%s6203_s2 + $0x1d0] sm:$0xff] }
 0x252   : > { %1726 = vmatmul.bf16.gmra.mxu3 %v1297_v17  ;;  %v5208_v62 = vpack.c.bf16 %v1813_v13, %v1812_v31  ;;  %v2009_v9 = vadd.f32 %v2008_v55, %v5138_v30 }
 0x253   : > { %v1058_v16 = vpop.f32.mrf.mxu1 }
 0x254   : > { %2047 = vmatmul.bf16.gmra.mxu0 %v5208_v62  ;;  %v1059_v59 = vadd.f32 %v1058_v16, %v4661_v53  ;;  %v2335_v23 = vmax.f32 %v2009_v9, 0.0  ;;  %v3975_v16 = vld [vmem:[%s6203_s2 + $0x1c8] sm:$0xff] }
 0x255   : > { %v5211_v61 = vpop.f32.mrf.mxu2  ;;  %v1687_v19 = vpop.f32.mrf.mxu3 }
 0x256   : > { %3624 = vmatmul.msk.f32.gmra.mxu1 %vm519_vm0, %v3974_v25  ;;  %v1688_v34 = vadd.f32 %v1687_v19, %v1519_v6  ;;  %v1211_v55 = vmax.f32 %v1059_v59, 0.0  ;;  %v907_v19 = vadd.f32 %v4803_v21, %v4439_v4 }
 0x258   : > { %v1814_v25 = vmax.f32 %v1688_v34, 0.0 }
 0x259   : > { %v2010_v10 = vpop.f32.mrf.mxu0 }
 0x25a   : > { %v2011_v8 = vadd.f32 %v2010_v10, %v5138_v30  ;;  %1602 = vmatmul.bf16.gmra.mxu2 %v1314_v54 }
 0x25b   : > { %v1061_v40 = vpop.f32.mrf.mxu1 }
 0x25c   : > { %v2337_v1 = vmax.f32 %v2011_v8, 0.0  ;;  %v1062_v31 = vadd.f32 %v1061_v40, %v4661_v53  ;;  %v1246_v8 = vmax.f32 %v904_v14, 0.0 }
 0x25d   : > { %v5225_v13 = vpop.f32.mrf.mxu2  ;;  %v1689_v17 = vpop.f32.mrf.mxu3 }
 0x25e   : > { %v1213_v58 = vmax.f32 %v1062_v31, 0.0  ;;  %v1690_v49 = vadd.f32 %v1689_v17, %v1521_v39  ;;  %3625 = vmatmul.msk.f32.gmra.mxu1 %vm519_vm0, %v3975_v16  ;;  %v5231_v20 = vpack.c.bf16 %v2337_v1, %v2335_v23  ;;  %v1248_v39 = vmax.f32 %v907_v19, 0.0 }
 0x25f   : > { %v1524_v31 = vadd.f32 %v4890_v46, %v4981_v28 }
 0x260   : > { %v1815_v9 = vmax.f32 %v1690_v49, 0.0  ;;  %v1299_v54 = vpack.c.bf16 %v1213_v58, %v1211_v55  ;;  %v1316_v34 = vpack.c.bf16 %v1248_v39, %v1246_v8  ;;  %v1526_v58 = vadd.f32 %v4890_v46, %v4990_v63  ;;  %v3977_v63 = vld [vmem:[%s6203_s2 + $0x1d8] sm:$0xff] }
 0x261   : > { %v2013_v10 = vpop.f32.mrf.mxu0 }
 0x262   : > { %1731 = vmatmul.bf16.gmra.mxu3 %v1299_v54  ;;  %v5237_v6 = vpack.c.bf16 %v1815_v9, %v1814_v25  ;;  %v2014_v21 = vadd.f32 %v2013_v10, %v5138_v30  ;;  %v5257_v9 = vld [vmem:[%s6210_s9 + $0x20] sm:$0xff] }
 0x263   : > { %v1064_v59 = vpop.f32.mrf.mxu1  ;;  %3156 = vmatpush.bf16.msra.mxu0 %v5257_v9 }
 0x264   : > { %2052 = vmatmul.bf16.gmra.mxu0 %v5237_v6  ;;  %v1065_v17 = vadd.f32 %v1064_v59, %v4661_v53  ;;  %v2339_v16 = vmax.f32 %v2014_v21, 0.0 }
 0x265   : > { %v5240_v40 = vpop.f32.mrf.mxu2  ;;  %v1692_v23 = vpop.f32.mrf.mxu3 }
 0x266   : > { %3626 = vmatmul.msk.f32.gmra.mxu1 %vm519_vm0, %v3976_v18  ;;  %v1693_v14 = vadd.f32 %v1692_v23, %v1524_v31  ;;  %v1215_v10 = vmax.f32 %v1065_v17, 0.0  ;;  %v910_v23 = vadd.f32 %v4830_v32, %v4439_v4  ;;  %v913_v18 = vadd.f32 %v4849_v11, %v4439_v4  ;;  %v3892_v17 = vld [vmem:[%s6208_s7 + $0x8] sm:$0xff] }
 0x267   : > { %2657 = vmatpush.bf16.msra.mxu2 %v3892_v17 }
 0x268   : > { %v1816_v21 = vmax.f32 %v1693_v14, 0.0  ;;  %v3891_v14 = vld [vmem:[%s6208_s7] sm:$0xff] }
 0x269   : > { %v2015_v1 = vpop.f32.mrf.mxu0 }
 0x26a   : > { %v2016_v55 = vadd.f32 %v2015_v1, %v5138_v30  ;;  %1607 = vmatmul.bf16.gmra.mxu2 %v1316_v34 }
 0x26b   : > { %v1067_v49 = vpop.f32.mrf.mxu1  ;;  %2658 = vmatpush.bf16.msra.mxu2 %v3891_v14 }
 0x26c   : > { %v2341_v19 = vmax.f32 %v2016_v55, 0.0  ;;  %v1068_v25 = vadd.f32 %v1067_v49, %v4661_v53  ;;  %v1250_v49 = vmax.f32 %v910_v23, 0.0  ;;  %v1531_v23 = vadd.f32 %v4890_v46, %v5018_v50 }
 0x26d   : > { %v5259_v28 = vpop.f32.mrf.mxu2  ;;  %v1694_v54 = vpop.f32.mrf.mxu3  ;;  %v916_v50 = vadd.f32 %v4867_v60, %v4439_v4 }
 0x26e   : > { %v1217_v59 = vmax.f32 %v1068_v25, 0.0  ;;  %v1695_v8 = vadd.f32 %v1694_v54, %v1526_v58  ;;  %3627 = vmatmul.msk.f32.gmra.mxu1 %vm519_vm0, %v3977_v63  ;;  %v5266_v39 = vpack.c.bf16 %v2341_v19, %v2339_v16  ;;  %v1252_v16 = vmax.f32 %v913_v18, 0.0  ;;  %v3978_v19 = vld [vmem:[%s6203_s2 + $0x1e0] sm:$0xff] }
 0x270   : > { %v1817_v34 = vmax.f32 %v1695_v8, 0.0  ;;  %v1301_v1 = vpack.c.bf16 %v1217_v59, %v1215_v10  ;;  %v1318_v54 = vpack.c.bf16 %v1252_v16, %v1250_v49  ;;  %v1529_v59 = vadd.f32 %v4890_v46, %v5009_v52 }
 0x271   : > { %v2018_v31 = vpop.f32.mrf.mxu0 }
 0x272   : > { %1736 = vmatmul.bf16.gmra.mxu3 %v1301_v1  ;;  %v5275_v55 = vpack.c.bf16 %v1817_v34, %v1816_v21  ;;  %v2019_v25 = vadd.f32 %v2018_v31, %v5138_v30 }
 0x273   : > { %v1070_v58 = vpop.f32.mrf.mxu1 }
 0x274   : > { %2057 = vmatmul.bf16.gmra.mxu0 %v5275_v55  ;;  %v1071_v8 = vadd.f32 %v1070_v58, %v4661_v53  ;;  %v2343_v21 = vmax.f32 %v2019_v25, 0.0  ;;  %v3979_v58 = vld [vmem:[%s6203_s2 + $0x1e8] sm:$0xff] }
 0x275   : > { %v5278_v32 = vpop.f32.mrf.mxu2  ;;  %v1697_v11 = vpop.f32.mrf.mxu3 }
 0x276   : > { %3628 = vmatmul.msk.f32.gmra.mxu1 %vm519_vm0, %v3978_v19  ;;  %v1698_v34 = vadd.f32 %v1697_v11, %v1529_v59  ;;  %v1219_v16 = vmax.f32 %v1071_v8, 0.0  ;;  %v919_v11 = vadd.f32 %v4875_v41, %v4439_v4  ;;  %v3980_v4 = vld [vmem:[%s6203_s2 + $0x1f0] sm:$0xff] }
 0x278   : > { %v1818_v25 = vmax.f32 %v1698_v34, 0.0 }
 0x279   : > { %v2020_v10 = vpop.f32.mrf.mxu0 }
 0x27a   : > { %v2021_v63 = vadd.f32 %v2020_v10, %v5138_v30  ;;  %1612 = vmatmul.bf16.gmra.mxu2 %v1318_v54 }
 0x27b   : > { %v1073_v18 = vpop.f32.mrf.mxu1 }
 0x27c   : > { %v2345_v1 = vmax.f32 %v2021_v63, 0.0  ;;  %v1074_v17 = vadd.f32 %v1073_v18, %v4661_v53  ;;  %v1256_v18 = vmax.f32 %v919_v11, 0.0 }
 0x27d   : > { %v5295_v31 = vpop.f32.mrf.mxu2  ;;  %v1699_v49 = vpop.f32.mrf.mxu3 }
 0x27e   : > { %v1221_v14 = vmax.f32 %v1074_v17, 0.0  ;;  %v1700_v52 = vadd.f32 %v1699_v49, %v1531_v23  ;;  %3629 = vmatmul.msk.f32.gmra.mxu1 %vm519_vm0, %v3979_v58  ;;  %v5301_v19 = vpack.c.bf16 %v2345_v1, %v2343_v21  ;;  %v1254_v23 = vmax.f32 %v916_v50, 0.0  ;;  %v3900_v21 = vld [vmem:[%s6208_s7 + $0x48] sm:$0xff] }
 0x27f   : > { %2826 = vmatpush.bf16.msra.mxu3 %v3900_v21  ;;  %v1534_v49 = vadd.f32 %v4890_v46, %v5037_v5 }
 0x280   : > { %v1819_v54 = vmax.f32 %v1700_v52, 0.0  ;;  %v1303_v10 = vpack.c.bf16 %v1221_v14, %v1219_v16  ;;  %v1320_v34 = vpack.c.bf16 %v1256_v18, %v1254_v23  ;;  %v1536_v52 = vadd.f32 %v4890_v46, %v5052_v51 }
 0x281   : > { %v2023_v59 = vpop.f32.mrf.mxu0 }
 0x282   : > { %1741 = vmatmul.bf16.gmra.mxu3 %v1303_v10  ;;  %v5307_v8 = vpack.c.bf16 %v1819_v54, %v1818_v25  ;;  %v2024_v41 = vadd.f32 %v2023_v59, %v5138_v30 }
 0x283   : > { %v1076_v63 = vpop.f32.mrf.mxu1 }
 0x284   : > { %2062 = vmatmul.bf16.gmra.mxu0 %v5307_v8  ;;  %v1077_v16 = vadd.f32 %v1076_v63, %v4661_v53  ;;  %v2347_v50 = vmax.f32 %v2024_v41, 0.0  ;;  %v3981_v63 = vld [vmem:[%s6203_s2 + $0x1f8] sm:$0xff] }
 0x285   : > { %v5313_v60 = vpop.f32.mrf.mxu2  ;;  %v1702_v1 = vpop.f32.mrf.mxu3 }
 0x286   : > { %3630 = vmatmul.msk.f32.gmra.mxu1 %vm519_vm0, %v3980_v4  ;;  %v1703_v11 = vadd.f32 %v1702_v1, %v1534_v49  ;;  %v1223_v23 = vmax.f32 %v1077_v16, 0.0 }
 0x288   : > { %v1820_v51 = vmax.f32 %v1703_v11, 0.0 }
 0x289   : > { %v2025_v17 = vpop.f32.mrf.mxu0 }
 0x28a   : > { %v2026_v14 = vadd.f32 %v2025_v17, %v5138_v30  ;;  %1617 = vmatmul.bf16.gmra.mxu2 %v1320_v34 }
 0x28b   : > { %v1079_v58 = vpop.f32.mrf.mxu1 }
 0x28c   : > { %v2349_v25 = vmax.f32 %v2026_v14, 0.0  ;;  %v1080_v54 = vadd.f32 %v1079_v58, %v4661_v53  ;;  %v1539_v58 = vadd.f32 %v4890_v46, %v5065_v7 }
 0x28d   : > { %v5327_v10 = vpop.f32.mrf.mxu2  ;;  %v1704_v59 = vpop.f32.mrf.mxu3 }
 0x28e   : > { %v1225_v18 = vmax.f32 %v1080_v54, 0.0  ;;  %v1705_v5 = vadd.f32 %v1704_v59, %v1536_v52  ;;  %3631 = vmatmul.msk.f32.gmra.mxu1 %vm519_vm0, %v3981_v63  ;;  %v5333_v21 = vpack.c.bf16 %v2349_v25, %v2347_v50  ;;  %v1541_v25 = vadd.f32 %v4890_v46, %v5074_v27 }
 0x290   : > { %v1821_v4 = vmax.f32 %v1705_v5, 0.0  ;;  %v1305_v1 = vpack.c.bf16 %v1225_v18, %v1223_v23 }
 0x291   : > { %v2028_v41 = vpop.f32.mrf.mxu0 }
 0x292   : > { %1746 = vmatmul.bf16.gmra.mxu3 %v1305_v1  ;;  %v5335_v34 = vpack.c.bf16 %v1821_v4, %v1820_v51  ;;  %v2029_v14 = vadd.f32 %v2028_v41, %v5138_v30 }
 0x293   : > { %v1082_v17 = vpop.f32.mrf.mxu1 }
 0x294   : > { %2067 = vmatmul.bf16.gmra.mxu0 %v5335_v34  ;;  %v1083_v50 = vadd.f32 %v1082_v17, %v4661_v53  ;;  %v2351_v59 = vmax.f32 %v2029_v14, 0.0 }
 0x295   : > { %v5338_v49 = vpop.f32.mrf.mxu2  ;;  %v1707_v16 = vpop.f32.mrf.mxu3 }
 0x296   : > { %2166 = vmatmul.bf16.vlgmr.msra.gmra.mxu1 %v4909_v26  ;;  %v1708_v23 = vadd.f32 %v1707_v16, %v1539_v58  ;;  %v1227_v51 = vmax.f32 %v1083_v50, 0.0 }
 0x298   : > { %v1822_v41 = vmax.f32 %v1708_v23, 0.0  ;;  %v1546_v23 = vadd.f32 %v4890_v46, %v5100_v48 }
 0x299   : > { %v2030_v52 = vpop.f32.mrf.mxu0 }
 0x29a   : > { %v2031_v11 = vadd.f32 %v2030_v52, %v5138_v30  ;;  %2659 = vmatmul.bf16.vlgmr.msra.gmra.mxu2 %v5163_v3 }
 0x29b   : > { %v1085_v54 = vpop.f32.mrf.mxu1 }
 0x29c   : > { %v2353_v18 = vmax.f32 %v2031_v11, 0.0  ;;  %v1086_v26 = vadd.f32 %v1085_v54, %v4661_v53 }
 0x29d   : > { %v5350_v5 = vpop.f32.mrf.mxu2  ;;  %v1709_v63 = vpop.f32.mrf.mxu3 }
 0x29e   : > { %v1229_v7 = vmax.f32 %v1086_v26, 0.0  ;;  %v1710_v4 = vadd.f32 %v1709_v63, %v1541_v25  ;;  %v5352_v1 = vpack.c.bf16 %v2353_v18, %v2351_v59  ;;  %v1544_v25 = vadd.f32 %v4890_v46, %v5087_v43 }
 0x2a0   : > { %v1823_v17 = vmax.f32 %v1710_v4, 0.0  ;;  %v1307_v3 = vpack.c.bf16 %v1229_v7, %v1227_v51  ;;  %v5372_v7 = vld [vmem:[%s6210_s9 + $0x18] sm:$0xff] }
 0x2a1   : > { %v2033_v52 = vpop.f32.mrf.mxu0  ;;  %3157 = vmatpush.bf16.msra.mxu0 %v5372_v7 }
 0x2a2   : > { %1751 = vmatmul.bf16.gmra.mxu3 %v1307_v3  ;;  %v5354_v27 = vpack.c.bf16 %v1823_v17, %v1822_v41  ;;  %v2034_v50 = vadd.f32 %v2033_v52, %v5138_v30 }
 0x2a3   : > { %v1088_v14 = vpop.f32.mrf.mxu1 }
 0x2a4   : > { %2072 = vmatmul.bf16.gmra.mxu0 %v5354_v27  ;;  %v1089_v54 = vadd.f32 %v1088_v14, %v4661_v53  ;;  %v2355_v26 = vmax.f32 %v2034_v50, 0.0 }
 0x2a5   : > { %v5357_v16 = vpop.f32.mrf.mxu2  ;;  %v1712_v58 = vpop.f32.mrf.mxu3 }
 0x2a6   : > { %2171 = vmatmul.bf16.gmra.mxu1 %v4940_v2  ;;  %v1713_v63 = vadd.f32 %v1712_v58, %v1544_v25  ;;  %v1231_v41 = vmax.f32 %v1089_v54, 0.0 }
 0x2a8   : > { %v1824_v48 = vmax.f32 %v1713_v63, 0.0 }
 0x2a9   : > { %v2035_v11 = vpop.f32.mrf.mxu0 }
 0x2aa   : > { %v2036_v59 = vadd.f32 %v2035_v11, %v5138_v30  ;;  %2664 = vmatmul.bf16.gmra.mxu2 %v5202_v42 }
 0x2ab   : > { %v1091_v18 = vpop.f32.mrf.mxu1 }
 0x2ac   : > { %v2357_v51 = vmax.f32 %v2036_v59, 0.0  ;;  %v1092_v2 = vadd.f32 %v1091_v18, %v4661_v53 }
 0x2ad   : > { %v5374_v43 = vpop.f32.mrf.mxu2  ;;  %v1714_v4 = vpop.f32.mrf.mxu3 }
 0x2ae   : > { %v1233_v17 = vmax.f32 %v1092_v2, 0.0  ;;  %v1715_v42 = vadd.f32 %v1714_v4, %v1546_v23  ;;  %v5377_v46 = vpack.c.bf16 %v2357_v51, %v2355_v26  ;;  %v5389_v23 = vld [vmem:[%s6206_s5] ss:$0 sm:$0xff] }
 0x2af   : > { %v1549_v18 = vadd.f32 %v5389_v23, %v5117_v56 }
 0x2b0   : > { %v1825_v3 = vmax.f32 %v1715_v42, 0.0  ;;  %v1309_v52 = vpack.c.bf16 %v1233_v17, %v1231_v41 }
 0x2b1   : > { %v2038_v14 = vpop.f32.mrf.mxu0 }
 0x2b2   : > { %1756 = vmatmul.bf16.gmra.mxu3 %v1309_v52  ;;  %v5379_v58 = vpack.c.bf16 %v1825_v3, %v1824_v48  ;;  %v2039_v54 = vadd.f32 %v2038_v14, %v5138_v30 }
 0x2b3   : > { %v1094_v50 = vpop.f32.mrf.mxu1 }
 0x2b4   : > { %6214 = vst [vmem:[#allocation2_spill] sm:$0xff] %v5379_v58  ;;  %2077 = vmatmul.bf16.gmra.mxu0 %v5379_v58  ;;  %v1095_v26 = vadd.f32 %v1094_v50, %v4661_v53  ;;  %v2359_v2 = vmax.f32 %v2039_v54, 0.0 }
 0x2b5   : > { %v5382_v11 = vpop.f32.mrf.mxu2  ;;  %v1717_v25 = vpop.f32.mrf.mxu3 }
 0x2b6   : > { %2176 = vmatmul.bf16.gmra.mxu1 %v4965_v47  ;;  %v1551_v47 = vadd.f32 %v5389_v23, %v5141_v57  ;;  %v1718_v4 = vadd.f32 %v1717_v25, %v1549_v18  ;;  %v1235_v3 = vmax.f32 %v1095_v26, 0.0  ;;  %v3899_v25 = vld [vmem:[%s6208_s7 + $0x40] sm:$0xff] }
 0x2b7   : > { %2827 = vmatpush.bf16.msra.mxu3 %v3899_v25 }
 0x2b8   : > { %v1826_v50 = vmax.f32 %v1718_v4, 0.0 }
 0x2b9   : > { %v2040_v59 = vpop.f32.mrf.mxu0 }
 0x2ba   : > { %v2041_v63 = vadd.f32 %v2040_v59, %v5138_v30  ;;  %2669 = vmatmul.bf16.gmra.mxu2 %v5231_v20 }
 0x2bb   : > { %v1097_v51 = vpop.f32.mrf.mxu1 }
 0x2bc   : > { %v2361_v41 = vmax.f32 %v2041_v63, 0.0  ;;  %v1098_v17 = vadd.f32 %v1097_v51, %v4661_v53  ;;  %v3983_v63 = vld [vmem:[%s6210_s9 + $0x38] sm:$0xff] }
 0x2bd   : > { %v5399_v42 = vpop.f32.mrf.mxu2  ;;  %v1719_v48 = vpop.f32.mrf.mxu3  ;;  %3918 = vmatpush.bf16.msrb.mxu3 %v3983_v63 }
 0x2be   : > { %v1237_v56 = vmax.f32 %v1098_v17, 0.0  ;;  %v1720_v52 = vadd.f32 %v1719_v48, %v1551_v47  ;;  %v5401_v14 = vpack.c.bf16 %v2361_v41, %v2359_v2  ;;  %v1554_v2 = vadd.f32 %v5389_v23, %v5161_v33 }
 0x2c0   : > { %v1827_v59 = vmax.f32 %v1720_v52, 0.0  ;;  %v1311_v20 = vpack.c.bf16 %v1237_v56, %v1235_v3 }
 0x2c1   : > { %v2043_v58 = vpop.f32.mrf.mxu0  ;;  %3919 = vmatpush.bf16.msrb.mxu3 %v5003_v38 }
 0x2c2   : > { %1761 = vmatmul.bf16.gmra.mxu3 %v1311_v20  ;;  %v5403_v57 = vpack.c.bf16 %v1827_v59, %v1826_v50  ;;  %v2044_v47 = vadd.f32 %v2043_v58, %v5138_v30 }
 0x2c3   : > { %v1100_v54 = vpop.f32.mrf.mxu1 }
 0x2c4   : > { %2082 = vmatmul.bf16.gmra.mxu0 %v5403_v57  ;;  %v1101_v4 = vadd.f32 %v1100_v54, %v4661_v53  ;;  %v2363_v48 = vmax.f32 %v2044_v47, 0.0 }
 0x2c5   : > { %v5409_v18 = vpop.f32.mrf.mxu2  ;;  %v1722_v26 = vpop.f32.mrf.mxu3  ;;  %3920 = vmatpush.bf16.msrb.mxu3 %v5115_v24 }
 0x2c6   : > { %2181 = vmatmul.bf16.gmra.mxu1 %v4987_v12  ;;  %v1556_v12 = vadd.f32 %v5389_v23, %v5182_v29  ;;  %v1723_v3 = vadd.f32 %v1722_v26, %v1554_v2  ;;  %v1239_v50 = vmax.f32 %v1101_v4, 0.0  ;;  %v1559_v4 = vadd.f32 %v5389_v23, %v5196_v37 }
 0x2c9   : > { %v2045_v51 = vpop.f32.mrf.mxu0  ;;  %3921 = vmatpush.bf16.msrb.mxu3 %v5257_v9  ;;  %v1561_v9 = vadd.f32 %v5389_v23, %v5211_v61 }
 0x2ca   : > { %v2046_v41 = vadd.f32 %v2045_v51, %v5138_v30  ;;  %2674 = vmatmul.bf16.gmra.mxu2 %v5266_v39  ;;  %v1828_v39 = vmax.f32 %v1723_v3, 0.0 }
 0x2cb   : > { %v1103_v17 = vpop.f32.mrf.mxu1 }
 0x2cc   : > { %v2365_v56 = vmax.f32 %v2046_v41, 0.0  ;;  %v1104_v58 = vadd.f32 %v1103_v17, %v4661_v53 }
 0x2cd   : > { %v5425_v52 = vpop.f32.mrf.mxu2  ;;  %v1724_v33 = vpop.f32.mrf.mxu3  ;;  %3922 = vmatpush.bf16.msrb.mxu3 %v5372_v7 }
 0x2ce   : > { %v1241_v59 = vmax.f32 %v1104_v58, 0.0  ;;  %v1725_v20 = vadd.f32 %v1724_v33, %v1556_v12  ;;  %v5427_v54 = vpack.c.bf16 %v2365_v56, %v2363_v48 }
 0x2d0   : > { %v1829_v29 = vmax.f32 %v1725_v20, 0.0  ;;  %v1313_v25 = vpack.c.bf16 %v1241_v59, %v1239_v50 }
 0x2d1   : > { %v2048_v63 = vpop.f32.mrf.mxu0 }
 0x2d2   : > { %1766 = vmatmul.bf16.gmra.mxu3 %v1313_v25  ;;  %v5430_v38 = vpack.c.bf16 %v1829_v29, %v1828_v39  ;;  %v2049_v24 = vadd.f32 %v2048_v63, %v5138_v30 }
 0x2d3   : > { %v1106_v26 = vpop.f32.mrf.mxu1 }
 0x2d4   : > { %2087 = vmatmul.bf16.gmra.mxu0 %v5430_v38  ;;  %v1107_v41 = vadd.f32 %v1106_v26, %v4661_v53  ;;  %v2367_v48 = vmax.f32 %v2049_v24, 0.0 }
 0x2d5   : > { %v5434_v47 = vpop.f32.mrf.mxu2  ;;  %v1727_v51 = vpop.f32.mrf.mxu3 }
 0x2d6   : > { %2186 = vmatmul.bf16.gmra.mxu1 %v5015_v22  ;;  %v1728_v22 = vadd.f32 %v1727_v51, %v1559_v4  ;;  %v1243_v33 = vmax.f32 %v1107_v41, 0.0 }
 0x2d8   : > { %v1830_v20 = vmax.f32 %v1728_v22, 0.0 }
 0x2d9   : > { %v2050_v2 = vpop.f32.mrf.mxu0 }
 0x2da   : > { %v2051_v12 = vadd.f32 %v2050_v2, %v5138_v30  ;;  %2679 = vmatmul.bf16.gmra.mxu2 %v5301_v19  ;;  %v1564_v2 = vadd.f32 %v5389_v23, %v5225_v13 }
 0x2db   : > { %v1109_v17 = vpop.f32.mrf.mxu1 }
 0x2dc   : > { %v2369_v3 = vmax.f32 %v2051_v12, 0.0  ;;  %v1110_v7 = vadd.f32 %v1109_v17, %v4661_v53  ;;  %v1566_v12 = vadd.f32 %v5389_v23, %v5240_v40 }
 0x2dd   : > { %v5447_v56 = vpop.f32.mrf.mxu2  ;;  %v1729_v58 = vpop.f32.mrf.mxu3 }
 0x2de   : > { %v1245_v37 = vmax.f32 %v1110_v7, 0.0  ;;  %v1730_v50 = vadd.f32 %v1729_v58, %v1561_v9  ;;  %v5449_v59 = vpack.c.bf16 %v2369_v3, %v2367_v48  ;;  %v3909_v3 = vld [vmem:[%s6210_s9 + $0x10] sm:$0xff] }
 0x2df   : > { %3158 = vmatpush.bf16.msra.mxu0 %v3909_v3  ;;  %3923 = vmatpush.bf16.msrb.mxu3 %v3909_v3 }
 0x2e0   : > { %v1831_v39 = vmax.f32 %v1730_v50, 0.0  ;;  %v1315_v19 = vpack.c.bf16 %v1245_v37, %v1243_v33 }
 0x2e1   : > { %v2053_v29 = vpop.f32.mrf.mxu0 }
 0x2e2   : > { %1771 = vmatmul.bf16.gmra.mxu3 %v1315_v19  ;;  %v5451_v61 = vpack.c.bf16 %v1831_v39, %v1830_v20  ;;  %v2054_v51 = vadd.f32 %v2053_v29, %v5138_v30 }
 0x2e3   : > { %v1112_v25 = vpop.f32.mrf.mxu1 }
 0x2e4   : > { %2092 = vmatmul.bf16.gmra.mxu0 %v5451_v61  ;;  %v1113_v4 = vadd.f32 %v1112_v25, %v4661_v53  ;;  %v2371_v17 = vmax.f32 %v2054_v51, 0.0 }
 0x2e5   : > { %v5454_v63 = vpop.f32.mrf.mxu2  ;;  %v1732_v26 = vpop.f32.mrf.mxu3 }
 0x2e6   : > { %2191 = vmatmul.bf16.gmra.mxu1 %v5046_v0  ;;  %v1733_v48 = vadd.f32 %v1732_v26, %v1564_v2  ;;  %v1247_v58 = vmax.f32 %v1113_v4, 0.0  ;;  %v1569_v2 = vadd.f32 %v5389_v23, %v5259_v28 }
 0x2e8   : > { %v1832_v40 = vmax.f32 %v1733_v48, 0.0 }
 0x2e9   : > { %v2055_v24 = vpop.f32.mrf.mxu0 }
 0x2ea   : > { %v2056_v41 = vadd.f32 %v2055_v24, %v5138_v30  ;;  %2684 = vmatmul.bf16.gmra.mxu2 %v5333_v21 }
 0x2eb   : > { %v1115_v9 = vpop.f32.mrf.mxu1 }
 0x2ec   : > { %v2373_v22 = vmax.f32 %v2056_v41, 0.0  ;;  %v1116_v0 = vadd.f32 %v1115_v9, %v4661_v53 }
 0x2ed   : > { %v5469_v13 = vpop.f32.mrf.mxu2  ;;  %v1734_v7 = vpop.f32.mrf.mxu3 }
 0x2ee   : > { %v1249_v33 = vmax.f32 %v1116_v0, 0.0  ;;  %v1735_v37 = vadd.f32 %v1734_v7, %v1566_v12  ;;  %v5471_v21 = vpack.c.bf16 %v2373_v22, %v2371_v17  ;;  %v1571_v12 = vadd.f32 %v5389_v23, %v5278_v32 }
 0x2f0   : > { %v1833_v50 = vmax.f32 %v1735_v37, 0.0  ;;  %v1317_v20 = vpack.c.bf16 %v1249_v33, %v1247_v58 }
 0x2f1   : > { %v2058_v39 = vpop.f32.mrf.mxu0 }
 0x2f2   : > { %1776 = vmatmul.bf16.gmra.mxu3 %v1317_v20  ;;  %v5473_v19 = vpack.c.bf16 %v1833_v50, %v1832_v40  ;;  %v2059_v51 = vadd.f32 %v2058_v39, %v5138_v30 }
 0x2f3   : > { %v1118_v29 = vpop.f32.mrf.mxu1 }
 0x2f4   : > { %2097 = vmatmul.bf16.gmra.mxu0 %v5473_v19  ;;  %v1119_v4 = vadd.f32 %v1118_v29, %v4661_v53  ;;  %v2375_v17 = vmax.f32 %v2059_v51, 0.0 }
 0x2f5   : > { %v5476_v25 = vpop.f32.mrf.mxu2  ;;  %v1737_v26 = vpop.f32.mrf.mxu3 }
 0x2f6   : > { %2196 = vmatmul.bf16.gmra.mxu1 %v5071_v15  ;;  %v1738_v48 = vadd.f32 %v1737_v26, %v1569_v2  ;;  %v1251_v7 = vmax.f32 %v1119_v4, 0.0 }
 0x2f8   : > { %v1834_v37 = vmax.f32 %v1738_v48, 0.0 }
 0x2f9   : > { %v2060_v24 = vpop.f32.mrf.mxu0 }
 0x2fa   : > { %v2061_v41 = vadd.f32 %v2060_v24, %v5138_v30  ;;  %2689 = vmatmul.bf16.gmra.mxu2 %v5352_v1  ;;  %v1574_v24 = vadd.f32 %v5389_v23, %v5295_v31 }
 0x2fb   : > { %v1121_v9 = vpop.f32.mrf.mxu1 }
 0x2fc   : > { %v2377_v22 = vmax.f32 %v2061_v41, 0.0  ;;  %v1122_v15 = vadd.f32 %v1121_v9, %v4661_v53  ;;  %v1576_v41 = vadd.f32 %v5389_v23, %v5313_v60 }
 0x2fd   : > { %v5488_v0 = vpop.f32.mrf.mxu2  ;;  %v1739_v3 = vpop.f32.mrf.mxu3 }
 0x2fe   : > { %v1253_v28 = vmax.f32 %v1122_v15, 0.0  ;;  %v1740_v58 = vadd.f32 %v1739_v3, %v1571_v12  ;;  %v5490_v33 = vpack.c.bf16 %v2377_v22, %v2375_v17 }
 0x300   : > { %v1835_v40 = vmax.f32 %v1740_v58, 0.0  ;;  %v1319_v1 = vpack.c.bf16 %v1253_v28, %v1251_v7 }
 0x301   : > { %v2063_v50 = vpop.f32.mrf.mxu0 }
 0x302   : > { %1781 = vmatmul.bf16.gmra.mxu3 %v1319_v1  ;;  %v5492_v32 = vpack.c.bf16 %v1835_v40, %v1834_v37  ;;  %v2064_v26 = vadd.f32 %v2063_v50, %v5138_v30 }
 0x303   : > { %v1124_v20 = vpop.f32.mrf.mxu1 }
 0x304   : > { %2102 = vmatmul.bf16.gmra.mxu0 %v5492_v32  ;;  %v1125_v2 = vadd.f32 %v1124_v20, %v4661_v53  ;;  %v2379_v9 = vmax.f32 %v2064_v26, 0.0  ;;  %v5517_v20 = vperm.slane %v5133_v45, 1 }
 0x305   : > { %v5495_v39 = vpop.f32.mrf.mxu2  ;;  %v1742_v29 = vpop.f32.mrf.mxu3 }
 0x306   : > { %2201 = vmatmul.bf16.gmra.mxu1 %v5097_v35  ;;  %v1743_v17 = vadd.f32 %v1742_v29, %v1574_v24  ;;  %v1255_v3 = vmax.f32 %v1125_v2, 0.0 }
 0x308   : > { %v1836_v58 = vmax.f32 %v1743_v17, 0.0 }
 0x309   : > { %v2065_v51 = vpop.f32.mrf.mxu0 }
 0x30a   : > { %v2066_v4 = vadd.f32 %v2065_v51, %v5138_v30  ;;  %2694 = vmatmul.bf16.gmra.mxu2 %v5377_v46  ;;  %v1579_v51 = vadd.f32 %v5389_v23, %v5327_v10 }
 0x30b   : > { %v1127_v12 = vpop.f32.mrf.mxu1 }
 0x30c   : > { %v2381_v48 = vmax.f32 %v2066_v4, 0.0  ;;  %v1128_v35 = vadd.f32 %v1127_v12, %v4661_v53  ;;  %v1581_v4 = vadd.f32 %v5389_v23, %v5338_v49 }
 0x30d   : > { %v5507_v22 = vpop.f32.mrf.mxu2  ;;  %v1744_v15 = vpop.f32.mrf.mxu3 }
 0x30e   : > { %v1257_v31 = vmax.f32 %v1128_v35, 0.0  ;;  %v1745_v7 = vadd.f32 %v1744_v15, %v1576_v41  ;;  %v5509_v28 = vpack.c.bf16 %v2381_v48, %v2379_v9 }
 0x310   : > { %v1837_v37 = vmax.f32 %v1745_v7, 0.0  ;;  %v1321_v46 = vpack.c.bf16 %v1257_v31, %v1255_v3 }
 0x311   : > { %v2068_v40 = vpop.f32.mrf.mxu0 }
 0x312   : > { %1786 = vmatmul.bf16.gmra.mxu3 %v1321_v46  ;;  %v5511_v60 = vpack.c.bf16 %v1837_v37, %v1836_v58  ;;  %v2069_v29 = vadd.f32 %v2068_v40, %v5138_v30 }
 0x313   : > { %v2167_v1 = vpop.f32.mrf.mxu1 }
 0x314   : > { %2107 = vmatmul.bf16.gmra.mxu0 %v5511_v60  ;;  %v2168_v24 = vadd.f32 %v2167_v1, %v5517_v20  ;;  %v2383_v45 = vmax.f32 %v2069_v29, 0.0  ;;  %v1584_v29 = vadd.f32 %v5389_v23, %v5350_v5 }
 0x315   : > { %v5514_v50 = vpop.f32.mrf.mxu2  ;;  %v1747_v53 = vpop.f32.mrf.mxu3 }
 0x316   : > { %2206 = vmatmul.bf16.gmra.mxu1 %v5135_v36  ;;  %v1748_v12 = vadd.f32 %v1747_v53, %v1579_v51  ;;  %v2328_v35 = vmax.f32 %v2168_v24, 0.0  ;;  %v1586_v24 = vadd.f32 %v5389_v23, %v5357_v16 }
 0x318   : > { %v1838_v31 = vmax.f32 %v1748_v12, 0.0  ;;  %v3908_v12 = vld [vmem:[%s6210_s9 + $0x8] sm:$0xff] }
 0x319   : > { %v2070_v26 = vpop.f32.mrf.mxu0  ;;  %3159 = vmatpush.bf16.msra.mxu0 %v3908_v12  ;;  %3924 = vmatpush.bf16.msrb.mxu3 %v3908_v12 }
 0x31a   : > { %v2071_v2 = vadd.f32 %v2070_v26, %v5138_v30  ;;  %2699 = vmatmul.bf16.gmra.mxu2 %v5401_v14 }
 0x31b   : > { %v2169_v41 = vpop.f32.mrf.mxu1 }
 0x31c   : > { %v2385_v9 = vmax.f32 %v2071_v2, 0.0  ;;  %v2170_v36 = vadd.f32 %v2169_v41, %v5517_v20 }
 0x31d   : > { %v1749_v17 = vpop.f32.mrf.mxu3  ;;  %v5529_v48 = vpop.f32.mrf.mxu2 }
 0x31e   : > { %v2330_v10 = vmax.f32 %v2170_v36, 0.0  ;;  %v1750_v15 = vadd.f32 %v1749_v17, %v1581_v4  ;;  %v5531_v3 = vpack.c.bf16 %v2385_v9, %v2383_v45 }
 0x320   : > { %v2456_v7 = vpack.c.bf16 %v2330_v10, %v2328_v35  ;;  %v1839_v14 = vmax.f32 %v1750_v15, 0.0 }
 0x321   : > { %v2073_v58 = vpop.f32.mrf.mxu0 }
 0x322   : > { %2828 = vmatmul.bf16.vlgmr.msra.gmra.mxu3 %v2456_v7  ;;  %v5533_v49 = vpack.c.bf16 %v1839_v14, %v1838_v31  ;;  %v2074_v1 = vadd.f32 %v2073_v58, %v5138_v30 }
 0x323   : > { %v2172_v37 = vpop.f32.mrf.mxu1 }
 0x324   : > { %2112 = vmatmul.bf16.gmra.mxu0 %v5533_v49  ;;  %v2173_v26 = vadd.f32 %v2172_v37, %v5517_v20  ;;  %v2387_v4 = vmax.f32 %v2074_v1, 0.0 }
 0x325   : > { %v1752_v46 = vpop.f32.mrf.mxu3  ;;  %v5536_v40 = vpop.f32.mrf.mxu2 }
 0x326   : > { %2211 = vmatmul.bf16.gmra.mxu1 %v5176_v44  ;;  %v1753_v41 = vadd.f32 %v1752_v46, %v1584_v29  ;;  %v2332_v36 = vmax.f32 %v2173_v26, 0.0 }
 0x328   : > { %v1840_v16 = vmax.f32 %v1753_v41, 0.0 }
 0x329   : > { %v2075_v53 = vpop.f32.mrf.mxu0 }
 0x32a   : > { %v2076_v51 = vadd.f32 %v2075_v53, %v5138_v30  ;;  %2704 = vmatmul.bf16.gmra.mxu2 %v5427_v54  ;;  %v1589_v53 = vadd.f32 %v5389_v23, %v5374_v43 }
 0x32b   : > { %v2174_v2 = vpop.f32.mrf.mxu1 }
 0x32c   : > { %v2389_v45 = vmax.f32 %v2076_v51, 0.0  ;;  %v2175_v44 = vadd.f32 %v2174_v2, %v5517_v20  ;;  %v1591_v51 = vadd.f32 %v5389_v23, %v5382_v11 }
 0x32d   : > { %v1754_v5 = vpop.f32.mrf.mxu3  ;;  %v5551_v9 = vpop.f32.mrf.mxu2 }
 0x32e   : > { %v2334_v17 = vmax.f32 %v2175_v44, 0.0  ;;  %v1755_v35 = vadd.f32 %v1754_v5, %v1586_v24  ;;  %v5553_v54 = vpack.c.bf16 %v2389_v45, %v2387_v4 }
 0x330   : > { %v1841_v10 = vmax.f32 %v1755_v35, 0.0  ;;  %v2458_v15 = vpack.c.bf16 %v2334_v17, %v2332_v36 }
 0x331   : > { %v2078_v31 = vpop.f32.mrf.mxu0 }
 0x332   : > { %2833 = vmatmul.bf16.gmra.mxu3 %v2458_v15  ;;  %v5555_v7 = vpack.c.bf16 %v1841_v10, %v1840_v16  ;;  %v2079_v46 = vadd.f32 %v2078_v31, %v5138_v30 }
 0x333   : > { %v2177_v14 = vpop.f32.mrf.mxu1 }
 0x334   : > { %2117 = vmatmul.bf16.gmra.mxu0 %v5555_v7  ;;  %v2178_v29 = vadd.f32 %v2177_v14, %v5517_v20  ;;  %v2391_v2 = vmax.f32 %v2079_v46, 0.0  ;;  %v1594_v46 = vadd.f32 %v5389_v23, %v5399_v42 }
 0x335   : > { %v1757_v58 = vpop.f32.mrf.mxu3  ;;  %v5558_v37 = vpop.f32.mrf.mxu2 }
 0x336   : > { %2216 = vmatmul.bf16.gmra.mxu1 %v5208_v62  ;;  %v1758_v4 = vadd.f32 %v1757_v58, %v1589_v53  ;;  %v2336_v12 = vmax.f32 %v2178_v29, 0.0  ;;  %v1596_v29 = vadd.f32 %v5389_v23, %v5409_v18 }
 0x338   : > { %v1842_v17 = vmax.f32 %v1758_v4, 0.0 }
 0x339   : > { %v2080_v1 = vpop.f32.mrf.mxu0 }
 0x33a   : > { %v2081_v26 = vadd.f32 %v2080_v1, %v5138_v30  ;;  %2709 = vmatmul.bf16.gmra.mxu2 %v5449_v59 }
 0x33b   : > { %v2179_v24 = vpop.f32.mrf.mxu1 }
 0x33c   : > { %v2393_v41 = vmax.f32 %v2081_v26, 0.0  ;;  %v2180_v62 = vadd.f32 %v2179_v24, %v5517_v20 }
 0x33d   : > { %v1759_v45 = vpop.f32.mrf.mxu3  ;;  %v5570_v44 = vpop.f32.mrf.mxu2 }
 0x33e   : > { %v2338_v43 = vmax.f32 %v2180_v62, 0.0  ;;  %v1760_v5 = vadd.f32 %v1759_v45, %v1591_v51  ;;  %v5572_v36 = vpack.c.bf16 %v2393_v41, %v2391_v2 }
 0x340   : > { %v1843_v35 = vmax.f32 %v1760_v5, 0.0  ;;  %v2460_v59 = vpack.c.bf16 %v2338_v43, %v2336_v12 }
 0x341   : > { %v2083_v16 = vpop.f32.mrf.mxu0 }
 0x342   : > { %2838 = vmatmul.bf16.gmra.mxu3 %v2460_v59  ;;  %v5574_v11 = vpack.c.bf16 %v1843_v35, %v1842_v17  ;;  %v2084_v14 = vadd.f32 %v2083_v16, %v5138_v30 }
 0x343   : > { %v2182_v10 = vpop.f32.mrf.mxu1 }
 0x344   : > { %2122 = vmatmul.bf16.gmra.mxu0 %v5574_v11  ;;  %v2183_v1 = vadd.f32 %v2182_v10, %v5517_v20  ;;  %v2395_v51 = vmax.f32 %v2084_v14, 0.0  ;;  %v1599_v14 = vadd.f32 %v5389_v23, %v5425_v52 }
 0x345   : > { %v1762_v15 = vpop.f32.mrf.mxu3  ;;  %v5577_v31 = vpop.f32.mrf.mxu2 }
 0x346   : > { %2221 = vmatmul.bf16.gmra.mxu1 %v5237_v6  ;;  %v1763_v24 = vadd.f32 %v1762_v15, %v1594_v46  ;;  %v2340_v62 = vmax.f32 %v2183_v1, 0.0  ;;  %v1601_v1 = vadd.f32 %v5389_v23, %v5434_v47 }
 0x348   : > { %v1844_v43 = vmax.f32 %v1763_v24, 0.0 }
 0x349   : > { %v2085_v58 = vpop.f32.mrf.mxu0 }
 0x34a   : > { %v2086_v53 = vadd.f32 %v2085_v58, %v5138_v30  ;;  %2714 = vmatmul.bf16.gmra.mxu2 %v5471_v21 }
 0x34b   : > { %v2184_v26 = vpop.f32.mrf.mxu1 }
 0x34c   : > { %v2397_v2 = vmax.f32 %v2086_v53, 0.0  ;;  %v2185_v6 = vadd.f32 %v2184_v26, %v5517_v20 }
 0x34d   : > { %v1764_v4 = vpop.f32.mrf.mxu3  ;;  %v5589_v41 = vpop.f32.mrf.mxu2 }
 0x34e   : > { %v2342_v42 = vmax.f32 %v2185_v6, 0.0  ;;  %v1765_v45 = vadd.f32 %v1764_v4, %v1596_v29  ;;  %v5591_v12 = vpack.c.bf16 %v2397_v2, %v2395_v51 }
 0x350   : > { %v1845_v5 = vmax.f32 %v1765_v45, 0.0  ;;  %v2462_v21 = vpack.c.bf16 %v2342_v42, %v2340_v62 }
 0x351   : > { %v2088_v17 = vpop.f32.mrf.mxu0 }
 0x352   : > { %2843 = vmatmul.bf16.gmra.mxu3 %v2462_v21  ;;  %v5593_v18 = vpack.c.bf16 %v1845_v5, %v1844_v43  ;;  %v2089_v10 = vadd.f32 %v2088_v17, %v5138_v30 }
 0x353   : > { %v2187_v35 = vpop.f32.mrf.mxu1 }
 0x354   : > { %2127 = vmatmul.bf16.gmra.mxu0 %v5593_v18  ;;  %v2188_v58 = vadd.f32 %v2187_v35, %v5517_v20  ;;  %v2399_v29 = vmax.f32 %v2089_v10, 0.0  ;;  %v1604_v10 = vadd.f32 %v5389_v23, %v5447_v56 }
 0x355   : > { %v1767_v59 = vpop.f32.mrf.mxu3  ;;  %v5596_v16 = vpop.f32.mrf.mxu2 }
 0x356   : > { %2226 = vmatmul.bf16.gmra.mxu1 %v5275_v55  ;;  %v1768_v26 = vadd.f32 %v1767_v59, %v1599_v14  ;;  %v2344_v6 = vmax.f32 %v2188_v58, 0.0  ;;  %v1606_v58 = vadd.f32 %v5389_v23, %v5454_v63 }
 0x358   : > { %v1846_v42 = vmax.f32 %v1768_v26, 0.0  ;;  %v3907_v26 = vld [vmem:[%s6210_s9] sm:$0xff] }
 0x359   : > { %v2090_v15 = vpop.f32.mrf.mxu0  ;;  %3160 = vmatpush.bf16.msra.mxu0 %v3907_v26  ;;  %3925 = vmatpush.bf16.msrb.mxu3 %v3907_v26 }
 0x35a   : > { %v2091_v46 = vadd.f32 %v2090_v15, %v5138_v30  ;;  %2719 = vmatmul.bf16.gmra.mxu2 %v5490_v33 }
 0x35b   : > { %v2189_v53 = vpop.f32.mrf.mxu1 }
 0x35c   : > { %v2401_v51 = vmax.f32 %v2091_v46, 0.0  ;;  %v2190_v55 = vadd.f32 %v2189_v53, %v5517_v20 }
 0x35d   : > { %v1769_v24 = vpop.f32.mrf.mxu3  ;;  %v5608_v2 = vpop.f32.mrf.mxu2 }
 0x35e   : > { %v2346_v52 = vmax.f32 %v2190_v55, 0.0  ;;  %v1770_v4 = vadd.f32 %v1769_v24, %v1601_v1  ;;  %v5610_v62 = vpack.c.bf16 %v2401_v51, %v2399_v29 }
 0x360   : > { %v1847_v45 = vmax.f32 %v1770_v4, 0.0  ;;  %v2464_v33 = vpack.c.bf16 %v2346_v52, %v2344_v6 }
 0x361   : > { %v2093_v43 = vpop.f32.mrf.mxu0 }
 0x362   : > { %2848 = vmatmul.bf16.gmra.mxu3 %v2464_v33  ;;  %v5612_v47 = vpack.c.bf16 %v1847_v45, %v1846_v42  ;;  %v2094_v35 = vadd.f32 %v2093_v43, %v5138_v30 }
 0x363   : > { %v2192_v5 = vpop.f32.mrf.mxu1 }
 0x364   : > { %2132 = vmatmul.bf16.gmra.mxu0 %v5612_v47  ;;  %v2193_v15 = vadd.f32 %v2192_v5, %v5517_v20  ;;  %v2403_v1 = vmax.f32 %v2094_v35, 0.0 }
 0x365   : > { %v1772_v21 = vpop.f32.mrf.mxu3  ;;  %v5615_v17 = vpop.f32.mrf.mxu2 }
 0x366   : > { %2231 = vmatmul.bf16.gmra.mxu1 %v5307_v8  ;;  %v1773_v53 = vadd.f32 %v1772_v21, %v1604_v10  ;;  %v2348_v55 = vmax.f32 %v2193_v15, 0.0 }
 0x368   : > { %v1848_v63 = vmax.f32 %v1773_v53, 0.0 }
 0x369   : > { %v2095_v59 = vpop.f32.mrf.mxu0 }
 0x36a   : > { %v2096_v14 = vadd.f32 %v2095_v59, %v5138_v30  ;;  %2724 = vmatmul.bf16.gmra.mxu2 %v5509_v28  ;;  %v1609_v59 = vadd.f32 %v5389_v23, %v5469_v13 }
 0x36b   : > { %v2194_v46 = vpop.f32.mrf.mxu1 }
 0x36c   : > { %v2405_v29 = vmax.f32 %v2096_v14, 0.0  ;;  %v2195_v8 = vadd.f32 %v2194_v46, %v5517_v20  ;;  %v1611_v14 = vadd.f32 %v5389_v23, %v5476_v25 }
 0x36d   : > { %v1774_v56 = vpop.f32.mrf.mxu3  ;;  %v5630_v51 = vpop.f32.mrf.mxu2 }
 0x36e   : > { %v2350_v24 = vmax.f32 %v2195_v8, 0.0  ;;  %v1775_v6 = vadd.f32 %v1774_v56, %v1606_v58  ;;  %v5632_v28 = vpack.c.bf16 %v2405_v29, %v2403_v1 }
 0x370   : > { %v1849_v52 = vmax.f32 %v1775_v6, 0.0  ;;  %v2466_v4 = vpack.c.bf16 %v2350_v24, %v2348_v55 }
 0x371   : > { %v2098_v42 = vpop.f32.mrf.mxu0 }
 0x372   : > { %2853 = vmatmul.bf16.gmra.mxu3 %v2466_v4  ;;  %v5634_v45 = vpack.c.bf16 %v1849_v52, %v1848_v63  ;;  %v2099_v21 = vadd.f32 %v2098_v42, %v5138_v30 }
 0x373   : > { %v2197_v33 = vpop.f32.mrf.mxu1 }
 0x374   : > { %2137 = vmatmul.bf16.gmra.mxu0 %v5634_v45  ;;  %v2198_v10 = vadd.f32 %v2197_v33, %v5517_v20  ;;  %v2407_v46 = vmax.f32 %v2099_v21, 0.0  ;;  %v1614_v21 = vadd.f32 %v5389_v23, %v5488_v0 }
 0x375   : > { %v1777_v43 = vpop.f32.mrf.mxu3  ;;  %v5637_v5 = vpop.f32.mrf.mxu2 }
 0x376   : > { %2236 = vmatmul.bf16.gmra.mxu1 %v5335_v34  ;;  %v1778_v1 = vadd.f32 %v1777_v43, %v1609_v59  ;;  %v2352_v26 = vmax.f32 %v2198_v10, 0.0  ;;  %v1616_v10 = vadd.f32 %v5389_v23, %v5495_v39 }
 0x378   : > { %v1850_v24 = vmax.f32 %v1778_v1, 0.0 }
 0x379   : > { %v2100_v35 = vpop.f32.mrf.mxu0 }
 0x37a   : > { %v2101_v15 = vadd.f32 %v2100_v35, %v5138_v30  ;;  %2729 = vmatmul.bf16.gmra.mxu2 %v5531_v3 }
 0x37b   : > { %v2199_v58 = vpop.f32.mrf.mxu1 }
 0x37c   : > { %v2409_v53 = vmax.f32 %v2101_v15, 0.0  ;;  %v2200_v34 = vadd.f32 %v2199_v58, %v5517_v20 }
 0x37d   : > { %v1779_v29 = vpop.f32.mrf.mxu3  ;;  %v5649_v8 = vpop.f32.mrf.mxu2 }
 0x37e   : > { %v2354_v13 = vmax.f32 %v2200_v34, 0.0  ;;  %v1780_v56 = vadd.f32 %v1779_v29, %v1611_v14  ;;  %v5651_v55 = vpack.c.bf16 %v2409_v53, %v2407_v46 }
 0x380   : > { %v1851_v6 = vmax.f32 %v1780_v56, 0.0  ;;  %v2468_v3 = vpack.c.bf16 %v2354_v13, %v2352_v26 }
 0x381   : > { %v2103_v63 = vpop.f32.mrf.mxu0 }
 0x382   : > { %2858 = vmatmul.bf16.gmra.mxu3 %v2468_v3  ;;  %v5653_v25 = vpack.c.bf16 %v1851_v6, %v1850_v24  ;;  %v2104_v33 = vadd.f32 %v2103_v63, %v5138_v30  ;;  %v6215_v63 = vld [vmem:[#allocation2_spill] sm:$0xff] }
 0x383   : > { %v2202_v52 = vpop.f32.mrf.mxu1 }
 0x384   : > { %2142 = vmatmul.bf16.gmra.mxu0 %v5653_v25  ;;  %v2203_v35 = vadd.f32 %v2202_v52, %v5517_v20  ;;  %v2411_v14 = vmax.f32 %v2104_v33, 0.0  ;;  %v1619_v33 = vadd.f32 %v5389_v23, %v5507_v22 }
 0x385   : > { %v1782_v4 = vpop.f32.mrf.mxu3  ;;  %v5656_v42 = vpop.f32.mrf.mxu2 }
 0x386   : > { %2241 = vmatmul.bf16.gmra.mxu1 %v5354_v27  ;;  %v1783_v58 = vadd.f32 %v1782_v4, %v1614_v21  ;;  %v2356_v53 = vmax.f32 %v2203_v35, 0.0 }
 0x388   : > { %v1852_v26 = vmax.f32 %v1783_v58, 0.0 }
 0x389   : > { %v2105_v43 = vpop.f32.mrf.mxu0 }
 0x38a   : > { %v2106_v59 = vadd.f32 %v2105_v43, %v5138_v30  ;;  %2734 = vmatmul.bf16.gmra.mxu2 %v5553_v54 }
 0x38b   : > { %v2204_v15 = vpop.f32.mrf.mxu1 }
 0x38c   : > { %v2413_v46 = vmax.f32 %v2106_v59, 0.0  ;;  %v2205_v27 = vadd.f32 %v2204_v15, %v5517_v20  ;;  %v1621_v59 = vadd.f32 %v5389_v23, %v5514_v50 }
 0x38d   : > { %v1784_v1 = vpop.f32.mrf.mxu3  ;;  %v5670_v56 = vpop.f32.mrf.mxu2 }
 0x38e   : > { %v2358_v34 = vmax.f32 %v2205_v27, 0.0  ;;  %v1785_v29 = vadd.f32 %v1784_v1, %v1616_v10  ;;  %v5668_v0 = vpack.c.bf16 %v2413_v46, %v2411_v14 }
 0x390   : > { %v1853_v13 = vmax.f32 %v1785_v29, 0.0  ;;  %v2470_v54 = vpack.c.bf16 %v2358_v34, %v2356_v53 }
 0x391   : > { %v2108_v24 = vpop.f32.mrf.mxu0 }
 0x392   : > { %2863 = vmatmul.bf16.gmra.mxu3 %v2470_v54  ;;  %v5672_v39 = vpack.c.bf16 %v1853_v13, %v1852_v26  ;;  %v2109_v52 = vadd.f32 %v2108_v24, %v5138_v30 }
 0x393   : > { %v2207_v6 = vpop.f32.mrf.mxu1 }
 0x394   : > { %2147 = vmatmul.bf16.gmra.mxu0 %v5672_v39  ;;  %v2208_v43 = vadd.f32 %v2207_v6, %v5517_v20  ;;  %v2415_v15 = vmax.f32 %v2109_v52, 0.0  ;;  %v5697_v6 = vld [vmem:[%s6209_s8] ss:$0 sm:$0xff] }
 0x395   : > { %v1787_v3 = vpop.f32.mrf.mxu3  ;;  %v5680_v21 = vpop.f32.mrf.mxu2  ;;  %v2661_v52 = vadd.f32 %v5697_v6, %v5529_v48 }
 0x396   : > { %2246 = vmatmul.bf16.gmra.mxu1 %v6215_v63  ;;  %v1788_v14 = vadd.f32 %v1787_v3, %v1619_v33  ;;  %v2360_v1 = vmax.f32 %v2208_v43, 0.0  ;;  %v2663_v43 = vadd.f32 %v5697_v6, %v5536_v40 }
 0x398   : > { %v1854_v29 = vmax.f32 %v1788_v14, 0.0 }
 0x399   : > { %v2110_v4 = vpop.f32.mrf.mxu0 }
 0x39a   : > { %v2111_v35 = vadd.f32 %v2110_v4, %v5138_v30  ;;  %2739 = vmatmul.bf16.gmra.mxu2 %v5572_v36 }
 0x39b   : > { %v2209_v10 = vpop.f32.mrf.mxu1 }
 0x39c   : > { %v2417_v58 = vmax.f32 %v2111_v35, 0.0  ;;  %v2210_v46 = vadd.f32 %v2209_v10, %v5517_v20 }
 0x39d   : > { %v1789_v27 = vpop.f32.mrf.mxu3  ;;  %v5691_v50 = vpop.f32.mrf.mxu2 }
 0x39e   : > { %v2362_v22 = vmax.f32 %v2210_v46, 0.0  ;;  %v1790_v53 = vadd.f32 %v1789_v27, %v1621_v59  ;;  %v5687_v34 = vpack.c.bf16 %v2417_v58, %v2415_v15 }
 0x3a0   : > { %v1855_v26 = vmax.f32 %v1790_v53, 0.0  ;;  %v2472_v13 = vpack.c.bf16 %v2362_v22, %v2360_v1 }
 0x3a1   : > { %v2113_v54 = vpop.f32.mrf.mxu0 }
 0x3a2   : > { %2868 = vmatmul.bf16.gmra.mxu3 %v2472_v13  ;;  %v5689_v36 = vpack.c.bf16 %v1855_v26, %v1854_v29  ;;  %v2114_v3 = vadd.f32 %v2113_v54, %v5138_v30 }
 0x3a3   : > { %v2212_v23 = vpop.f32.mrf.mxu1 }
 0x3a4   : > { %2152 = vmatmul.bf16.gmra.mxu0 %v5689_v36  ;;  %v2213_v4 = vadd.f32 %v2212_v23, %v5517_v20  ;;  %v2419_v59 = vmax.f32 %v2114_v3, 0.0  ;;  %v2666_v3 = vadd.f32 %v5697_v6, %v5551_v9 }
 0x3a5   : > { %v2829_v24 = vpop.f32.mrf.mxu3  ;;  %v5709_v46 = vpop.f32.mrf.mxu2 }
 0x3a6   : > { %2251 = vmatmul.bf16.gmra.mxu1 %v5403_v57  ;;  %v2830_v10 = vadd.f32 %v2829_v24, %v2661_v52  ;;  %v2364_v58 = vmax.f32 %v2213_v4, 0.0  ;;  %v2668_v4 = vadd.f32 %v5697_v6, %v5558_v37 }
 0x3a8   : > { %v2989_v22 = vmax.f32 %v2830_v10, 0.0 }
 0x3a9   : > { %v2115_v63 = vpop.f32.mrf.mxu0 }
 0x3aa   : > { %v2116_v33 = vadd.f32 %v2115_v63, %v5138_v30  ;;  %2744 = vmatmul.bf16.gmra.mxu2 %v5591_v12 }
 0x3ab   : > { %v2214_v35 = vpop.f32.mrf.mxu1 }
 0x3ac   : > { %v2421_v15 = vmax.f32 %v2116_v33, 0.0  ;;  %v2215_v57 = vadd.f32 %v2214_v35, %v5517_v20 }
 0x3ad   : > { %v2831_v14 = vpop.f32.mrf.mxu3  ;;  %v5714_v54 = vpop.f32.mrf.mxu2 }
 0x3ae   : > { %v2366_v48 = vmax.f32 %v2215_v57, 0.0  ;;  %v2832_v27 = vadd.f32 %v2831_v14, %v2663_v43  ;;  %v5711_v1 = vpack.c.bf16 %v2421_v15, %v2419_v59 }
 0x3b0   : > { %v2990_v53 = vmax.f32 %v2832_v27, 0.0  ;;  %v2474_v12 = vpack.c.bf16 %v2366_v48, %v2364_v58 }
 0x3b1   : > { %v2118_v29 = vpop.f32.mrf.mxu0 }
 0x3b2   : > { %v3053_v26 = vpack.c.bf16 %v2990_v53, %v2989_v22  ;;  %2873 = vmatmul.bf16.gmra.mxu3 %v2474_v12  ;;  %v2119_v23 = vadd.f32 %v2118_v29, %v5138_v30 }
 0x3b3   : > { %v2217_v40 = vpop.f32.mrf.mxu1 }
 0x3b4   : > { %3161 = vmatmul.bf16.vlgmr.msra.gmra.mxu0 %v3053_v26  ;;  %v2218_v63 = vadd.f32 %v2217_v40, %v5517_v20  ;;  %v2423_v43 = vmax.f32 %v2119_v23, 0.0  ;;  %v2671_v40 = vadd.f32 %v5697_v6, %v5570_v44 }
 0x3b5   : > { %v2834_v13 = vpop.f32.mrf.mxu3 }
 0x3b6   : > { %2256 = vmatmul.bf16.gmra.mxu1 %v5430_v38  ;;  %v2835_v38 = vadd.f32 %v2834_v13, %v2666_v3  ;;  %v2368_v15 = vmax.f32 %v2218_v63, 0.0 }
 0x3b8   : > { %v2991_v58 = vmax.f32 %v2835_v38, 0.0 }
 0x3b9   : > { %v2120_v24 = vpop.f32.mrf.mxu0 }
 0x3ba   : > { %v2121_v52 = vadd.f32 %v2120_v24, %v5138_v30  ;;  %2749 = vmatmul.bf16.gmra.mxu2 %v5610_v62  ;;  %v5727_v62 = vpop.f32.mrf.mxu2  ;;  %v2673_v24 = vadd.f32 %v5697_v6, %v5577_v31 }
 0x3bb   : > { %v2219_v33 = vpop.f32.mrf.mxu1 }
 0x3bc   : > { %v2425_v35 = vmax.f32 %v2121_v52, 0.0  ;;  %v2220_v59 = vadd.f32 %v2219_v33, %v5517_v20 }
 0x3bd   : > { %v2836_v10 = vpop.f32.mrf.mxu3 }
 0x3be   : > { %v2370_v57 = vmax.f32 %v2220_v59, 0.0  ;;  %v2837_v14 = vadd.f32 %v2836_v10, %v2668_v4  ;;  %v5725_v9 = vpack.c.bf16 %v2425_v35, %v2423_v43 }
 0x3c0   : > { %v2992_v48 = vmax.f32 %v2837_v14, 0.0  ;;  %v2476_v27 = vpack.c.bf16 %v2370_v57, %v2368_v15 }
 0x3c1   : > { %v2123_v22 = vpop.f32.mrf.mxu0 }
 0x3c2   : > { %2878 = vmatmul.bf16.gmra.mxu3 %v2476_v27  ;;  %v3054_v37 = vpack.c.bf16 %v2992_v48, %v2991_v58  ;;  %v2124_v29 = vadd.f32 %v2123_v22, %v5138_v30  ;;  %v5738_v63 = vpop.f32.mrf.mxu2 }
 0x3c3   : > { %v2222_v53 = vpop.f32.mrf.mxu1 }
 0x3c4   : > { %3166 = vmatmul.bf16.gmra.mxu0 %v3054_v37  ;;  %v2223_v13 = vadd.f32 %v2222_v53, %v5517_v20  ;;  %v2427_v52 = vmax.f32 %v2124_v29, 0.0  ;;  %v2676_v37 = vadd.f32 %v5697_v6, %v5589_v41  ;;  %v2678_v29 = vadd.f32 %v5697_v6, %v5596_v16 }
 0x3c5   : > { %v2839_v12 = vpop.f32.mrf.mxu3 }
 0x3c6   : > { %2261 = vmatmul.bf16.gmra.mxu1 %v5451_v61  ;;  %v2840_v61 = vadd.f32 %v2839_v12, %v2671_v40  ;;  %v2372_v38 = vmax.f32 %v2223_v13, 0.0 }
 0x3c8   : > { %v2993_v10 = vmax.f32 %v2840_v61, 0.0 }
 0x3c9   : > { %v2125_v26 = vpop.f32.mrf.mxu0 }
 0x3ca   : > { %v2126_v23 = vadd.f32 %v2125_v26, %v5138_v30  ;;  %2754 = vmatmul.bf16.gmra.mxu2 %v5632_v28  ;;  %v5743_v48 = vpop.f32.mrf.mxu2 }
 0x3cb   : > { %v2224_v3 = vpop.f32.mrf.mxu1 }
 0x3cc   : > { %v2429_v4 = vmax.f32 %v2126_v23, 0.0  ;;  %v2225_v33 = vadd.f32 %v2224_v3, %v5517_v20 }
 0x3cd   : > { %v2841_v43 = vpop.f32.mrf.mxu3 }
 0x3ce   : > { %v2374_v44 = vmax.f32 %v2225_v33, 0.0  ;;  %v2842_v35 = vadd.f32 %v2841_v43, %v2673_v24  ;;  %v5741_v59 = vpack.c.bf16 %v2429_v4, %v2427_v52 }
 0x3d0   : > { %v2994_v15 = vmax.f32 %v2842_v35, 0.0  ;;  %v2478_v28 = vpack.c.bf16 %v2374_v44, %v2372_v38 }
 0x3d1   : > { %v2128_v57 = vpop.f32.mrf.mxu0 }
 0x3d2   : > { %2883 = vmatmul.bf16.gmra.mxu3 %v2478_v28  ;;  %v3055_v31 = vpack.c.bf16 %v2994_v15, %v2993_v10  ;;  %v2129_v27 = vadd.f32 %v2128_v57, %v5138_v30  ;;  %v5757_v4 = vpop.f32.mrf.mxu2  ;;  %v2681_v28 = vadd.f32 %v5697_v6, %v5608_v2 }
 0x3d3   : > { %v2227_v14 = vpop.f32.mrf.mxu1 }
 0x3d4   : > { %3171 = vmatmul.bf16.gmra.mxu0 %v3055_v31  ;;  %v2228_v53 = vadd.f32 %v2227_v14, %v5517_v20  ;;  %v2431_v40 = vmax.f32 %v2129_v27, 0.0 }
 0x3d5   : > { %v2844_v58 = vpop.f32.mrf.mxu3 }
 0x3d6   : > { %2266 = vmatmul.bf16.gmra.mxu1 %v5473_v19  ;;  %v2845_v13 = vadd.f32 %v2844_v58, %v2676_v37  ;;  %v2376_v3 = vmax.f32 %v2228_v53, 0.0  ;;  %v2683_v58 = vadd.f32 %v5697_v6, %v5615_v17 }
 0x3d8   : > { %v2995_v33 = vmax.f32 %v2845_v13, 0.0 }
 0x3d9   : > { %v2130_v22 = vpop.f32.mrf.mxu0 }
 0x3da   : > { %v2131_v12 = vadd.f32 %v2130_v22, %v5138_v30  ;;  %2759 = vmatmul.bf16.gmra.mxu2 %v5651_v55  ;;  %v5763_v57 = vpop.f32.mrf.mxu2 }
 0x3db   : > { %v2229_v26 = vpop.f32.mrf.mxu1 }
 0x3dc   : > { %v2433_v23 = vmax.f32 %v2131_v12, 0.0  ;;  %v2230_v19 = vadd.f32 %v2229_v26, %v5517_v20 }
 0x3dd   : > { %v2846_v24 = vpop.f32.mrf.mxu3 }
 0x3de   : > { %v2378_v52 = vmax.f32 %v2230_v19, 0.0  ;;  %v2847_v61 = vadd.f32 %v2846_v24, %v2678_v29  ;;  %v5755_v41 = vpack.c.bf16 %v2433_v23, %v2431_v40 }
 0x3e0   : > { %v2996_v43 = vmax.f32 %v2847_v61, 0.0  ;;  %v2480_v55 = vpack.c.bf16 %v2378_v52, %v2376_v3 }
 0x3e1   : > { %v2133_v38 = vpop.f32.mrf.mxu0 }
 0x3e2   : > { %2888 = vmatmul.bf16.gmra.mxu3 %v2480_v55  ;;  %v3056_v16 = vpack.c.bf16 %v2996_v43, %v2995_v33  ;;  %v2134_v10 = vadd.f32 %v2133_v38, %v5138_v30  ;;  %v5773_v17 = vpop.f32.mrf.mxu2  ;;  %v2686_v43 = vadd.f32 %v5697_v6, %v5630_v51 }
 0x3e3   : > { %v2232_v44 = vpop.f32.mrf.mxu1 }
 0x3e4   : > { %3176 = vmatmul.bf16.gmra.mxu0 %v3056_v16  ;;  %v2233_v31 = vadd.f32 %v2232_v44, %v5517_v20  ;;  %v2435_v22 = vmax.f32 %v2134_v10, 0.0  ;;  %v2688_v16 = vadd.f32 %v5697_v6, %v5637_v5 }
 0x3e5   : > { %v2849_v35 = vpop.f32.mrf.mxu3 }
 0x3e6   : > { %2271 = vmatmul.bf16.gmra.mxu1 %v5492_v32  ;;  %v2850_v32 = vadd.f32 %v2849_v35, %v2681_v28  ;;  %v2380_v29 = vmax.f32 %v2233_v31, 0.0 }
 0x3e8   : > { %v2997_v13 = vmax.f32 %v2850_v32, 0.0 }
 0x3e9   : > { %v2135_v15 = vpop.f32.mrf.mxu0 }
 0x3ea   : > { %v2136_v14 = vadd.f32 %v2135_v15, %v5138_v30  ;;  %2764 = vmatmul.bf16.gmra.mxu2 %v5668_v0  ;;  %v5785_v31 = vpop.f32.mrf.mxu2 }
 0x3eb   : > { %v2234_v27 = vpop.f32.mrf.mxu1 }
 0x3ec   : > { %v2437_v37 = vmax.f32 %v2136_v14, 0.0  ;;  %v2235_v53 = vadd.f32 %v2234_v27, %v5517_v20 }
 0x3ed   : > { %v2851_v12 = vpop.f32.mrf.mxu3 }
 0x3ee   : > { %v2382_v2 = vmax.f32 %v2235_v53, 0.0  ;;  %v2852_v26 = vadd.f32 %v2851_v12, %v2683_v58  ;;  %v5771_v40 = vpack.c.bf16 %v2437_v37, %v2435_v22 }
 0x3f0   : > { %v2998_v23 = vmax.f32 %v2852_v26, 0.0  ;;  %v2482_v19 = vpack.c.bf16 %v2382_v2, %v2380_v29 }
 0x3f1   : > { %v2138_v24 = vpop.f32.mrf.mxu0 }
 0x3f2   : > { %2893 = vmatmul.bf16.gmra.mxu3 %v2482_v19  ;;  %v3057_v0 = vpack.c.bf16 %v2998_v23, %v2997_v13  ;;  %v2139_v61 = vadd.f32 %v2138_v24, %v5138_v30  ;;  %v5790_v29 = vpop.f32.mrf.mxu2  ;;  %v2691_v13 = vadd.f32 %v5697_v6, %v5649_v8  ;;  %v2693_v24 = vadd.f32 %v5697_v6, %v5656_v42 }
 0x3f3   : > { %v2237_v3 = vpop.f32.mrf.mxu1 }
 0x3f4   : > { %3181 = vmatmul.bf16.gmra.mxu0 %v3057_v0  ;;  %v2238_v55 = vadd.f32 %v2237_v3, %v5517_v20  ;;  %v2439_v35 = vmax.f32 %v2139_v61, 0.0 }
 0x3f5   : > { %v2854_v52 = vpop.f32.mrf.mxu3 }
 0x3f6   : > { %2276 = vmatmul.bf16.gmra.mxu1 %v5511_v60  ;;  %v2855_v10 = vadd.f32 %v2854_v52, %v2686_v43  ;;  %v2384_v14 = vmax.f32 %v2238_v55, 0.0 }
 0x3f8   : > { %v2999_v22 = vmax.f32 %v2855_v10, 0.0 }
 0x3f9   : > { %v2140_v33 = vpop.f32.mrf.mxu0 }
 0x3fa   : > { %v2141_v38 = vadd.f32 %v2140_v33, %v5138_v30  ;;  %2769 = vmatmul.bf16.gmra.mxu2 %v5687_v34 }
 0x3fb   : > { %v2239_v44 = vpop.f32.mrf.mxu1 }
 0x3fc   : > { %v2441_v15 = vmax.f32 %v2141_v38, 0.0  ;;  %v2240_v60 = vadd.f32 %v2239_v44, %v5517_v20 }
 0x3fd   : > { %v2856_v28 = vpop.f32.mrf.mxu3 }
 0x3fe   : > { %v2386_v51 = vmax.f32 %v2240_v60, 0.0  ;;  %v2857_v58 = vadd.f32 %v2856_v28, %v2688_v16  ;;  %v5787_v27 = vpack.c.bf16 %v2441_v15, %v2439_v35 }
 0x400   : > { %v3000_v32 = vmax.f32 %v2857_v58, 0.0  ;;  %v2484_v34 = vpack.c.bf16 %v2386_v51, %v2384_v14  ;;  %v2696_v51 = vadd.f32 %v5697_v6, %v5670_v56 }
 0x401   : > { %v2143_v37 = vpop.f32.mrf.mxu0 }
 0x402   : > { %2898 = vmatmul.bf16.gmra.mxu3 %v2484_v34  ;;  %v3058_v5 = vpack.c.bf16 %v3000_v32, %v2999_v22  ;;  %v2144_v2 = vadd.f32 %v2143_v37, %v5138_v30  ;;  %v2698_v32 = vadd.f32 %v5697_v6, %v5680_v21 }
 0x403   : > { %v2242_v53 = vpop.f32.mrf.mxu1 }
 0x404   : > { %3186 = vmatmul.bf16.gmra.mxu0 %v3058_v5  ;;  %v2243_v23 = vadd.f32 %v2242_v53, %v5517_v20  ;;  %v2443_v3 = vmax.f32 %v2144_v2, 0.0 }
 0x405   : > { %v2859_v12 = vpop.f32.mrf.mxu3 }
 0x406   : > { %2281 = vmatmul.bf16.gmra.mxu1 %v5533_v49  ;;  %v2860_v49 = vadd.f32 %v2859_v12, %v2691_v13  ;;  %v2388_v43 = vmax.f32 %v2243_v23, 0.0 }
 0x408   : > { %v3001_v16 = vmax.f32 %v2860_v49, 0.0 }
 0x409   : > { %v2145_v26 = vpop.f32.mrf.mxu0 }
 0x40a   : > { %v2146_v19 = vadd.f32 %v2145_v26, %v5138_v30  ;;  %2774 = vmatmul.bf16.gmra.mxu2 %v5711_v1  ;;  %v5803_v1 = vpop.f32.mrf.mxu2 }
 0x40b   : > { %v2244_v0 = vpop.f32.mrf.mxu1 }
 0x40c   : > { %v2445_v52 = vmax.f32 %v2146_v19, 0.0  ;;  %v2245_v61 = vadd.f32 %v2244_v0, %v5517_v20 }
 0x40d   : > { %v2861_v33 = vpop.f32.mrf.mxu3 }
 0x40e   : > { %v2390_v55 = vmax.f32 %v2245_v61, 0.0  ;;  %v2862_v38 = vadd.f32 %v2861_v33, %v2693_v24  ;;  %v5801_v8 = vpack.c.bf16 %v2445_v52, %v2443_v3 }
 0x410   : > { %v3002_v44 = vmax.f32 %v2862_v38, 0.0  ;;  %v2486_v35 = vpack.c.bf16 %v2390_v55, %v2388_v43  ;;  %v2701_v43 = vadd.f32 %v5697_v6, %v5691_v50 }
 0x411   : > { %v2148_v10 = vpop.f32.mrf.mxu0 }
 0x412   : > { %2903 = vmatmul.bf16.gmra.mxu3 %v2486_v35  ;;  %v3059_v42 = vpack.c.bf16 %v3002_v44, %v3001_v16  ;;  %v2149_v28 = vadd.f32 %v2148_v10, %v5138_v30  ;;  %v5814_v37 = vpop.f32.mrf.mxu2  ;;  %v2703_v16 = vadd.f32 %v5697_v6, %v5709_v46 }
 0x413   : > { %v2247_v15 = vpop.f32.mrf.mxu1 }
 0x414   : > { %3191 = vmatmul.bf16.gmra.mxu0 %v3059_v42  ;;  %v2248_v58 = vadd.f32 %v2247_v15, %v5517_v20  ;;  %v2447_v5 = vmax.f32 %v2149_v28, 0.0 }
 0x415   : > { %v2864_v60 = vpop.f32.mrf.mxu3 }
 0x416   : > { %2286 = vmatmul.bf16.gmra.mxu1 %v5555_v7  ;;  %v2865_v7 = vadd.f32 %v2864_v60, %v2696_v51  ;;  %v2392_v26 = vmax.f32 %v2248_v58, 0.0 }
 0x418   : > { %v3003_v19 = vmax.f32 %v2865_v7, 0.0 }
 0x419   : > { %v2150_v14 = vpop.f32.mrf.mxu0 }
 0x41a   : > { %v2151_v22 = vadd.f32 %v2150_v14, %v5138_v30  ;;  %2779 = vmatmul.bf16.gmra.mxu2 %v5725_v9  ;;  %v5819_v52 = vpop.f32.mrf.mxu2 }
 0x41b   : > { %v2249_v34 = vpop.f32.mrf.mxu1 }
 0x41c   : > { %v2449_v53 = vmax.f32 %v2151_v22, 0.0  ;;  %v2250_v12 = vadd.f32 %v2249_v34, %v5517_v20 }
 0x41d   : > { %v2866_v2 = vpop.f32.mrf.mxu3 }
 0x41e   : > { %v2394_v56 = vmax.f32 %v2250_v12, 0.0  ;;  %v2867_v13 = vadd.f32 %v2866_v2, %v2698_v32  ;;  %v5817_v23 = vpack.c.bf16 %v2449_v53, %v2447_v5  ;;  %v2706_v12 = vadd.f32 %v5697_v6, %v5714_v54 }
 0x420   : > { %v3004_v24 = vmax.f32 %v2867_v13, 0.0  ;;  %v2488_v9 = vpack.c.bf16 %v2394_v56, %v2392_v26 }
 0x421   : > { %v2153_v0 = vpop.f32.mrf.mxu0 }
 0x422   : > { %2908 = vmatmul.bf16.gmra.mxu3 %v2488_v9  ;;  %v3060_v21 = vpack.c.bf16 %v3004_v24, %v3003_v19  ;;  %v2154_v61 = vadd.f32 %v2153_v0, %v5138_v30  ;;  %v2708_v19 = vadd.f32 %v5697_v6, %v5727_v62 }
 0x423   : > { %v2252_v3 = vpop.f32.mrf.mxu1 }
 0x424   : > { %3196 = vmatmul.bf16.gmra.mxu0 %v3060_v21  ;;  %v2253_v55 = vadd.f32 %v2252_v3, %v5517_v20  ;;  %v2451_v35 = vmax.f32 %v2154_v61, 0.0 }
 0x425   : > { %v2869_v49 = vpop.f32.mrf.mxu3 }
 0x426   : > { %2291 = vmatmul.bf16.gmra.mxu1 %v5574_v11  ;;  %v2870_v10 = vadd.f32 %v2869_v49, %v2701_v43  ;;  %v2396_v60 = vmax.f32 %v2253_v55, 0.0 }
 0x428   : > { %v3005_v46 = vmax.f32 %v2870_v10, 0.0 }
 0x429   : > { %v2155_v33 = vpop.f32.mrf.mxu0 }
 0x42a   : > { %v2156_v38 = vadd.f32 %v2155_v33, %v5138_v30  ;;  %2784 = vmatmul.bf16.gmra.mxu2 %v5741_v59  ;;  %v5835_v30 = vld [vmem:[%s6211_s10] ss:$0 sm:$0xff]  ;;  %v5839_v59 = vpop.f32.mrf.mxu2 }
 0x42b   : > { %v2254_v44 = vpop.f32.mrf.mxu1 }
 0x42c   : > { %v2453_v11 = vmax.f32 %v2156_v38, 0.0  ;;  %v2255_v42 = vadd.f32 %v2254_v44, %v5517_v20  ;;  %v2711_v44 = vadd.f32 %v5697_v6, %v5738_v63 }
 0x42d   : > { %v2871_v15 = vpop.f32.mrf.mxu3 }
 0x42e   : > { %v2398_v28 = vmax.f32 %v2255_v42, 0.0  ;;  %v2872_v14 = vadd.f32 %v2871_v15, %v2703_v16  ;;  %v5837_v50 = vpack.c.bf16 %v2453_v11, %v2451_v35  ;;  %v2713_v42 = vadd.f32 %v5697_v6, %v5743_v48 }
 0x430   : > { %v3006_v51 = vmax.f32 %v2872_v14, 0.0  ;;  %v2490_v58 = vpack.c.bf16 %v2398_v28, %v2396_v60 }
 0x431   : > { %v3162_v22 = vpop.f32.mrf.mxu0 }
 0x432   : > { %v3163_v32 = vadd.f32 %v5835_v30, %v3162_v22  ;;  %2913 = vmatmul.bf16.gmra.mxu3 %v2490_v58  ;;  %v3061_v34 = vpack.c.bf16 %v3006_v51, %v3005_v46  ;;  %v5852_v2 = vpop.f32.mrf.mxu2 }
 0x433   : > { %v2257_v5 = vpop.f32.mrf.mxu1 }
 0x434   : > { %3322 = vst.msk [vmem:[%s5844_s26] sm:$0xff] %vm519_vm0, %v3163_v32  ;;  %3201 = vmatmul.bf16.gmra.mxu0 %v3061_v34  ;;  %v2258_v26 = vadd.f32 %v2257_v5, %v5517_v20 }
 0x435   : > { %v2874_v7 = vpop.f32.mrf.mxu3 }
 0x436   : > { %2296 = vmatmul.bf16.gmra.mxu1 %v5593_v18  ;;  %v2875_v24 = vadd.f32 %v2874_v7, %v2706_v12  ;;  %v2400_v54 = vmax.f32 %v2258_v26, 0.0  ;;  %v2716_v12 = vadd.f32 %v5697_v6, %v5757_v4 }
 0x438   : > { %v3007_v3 = vmax.f32 %v2875_v24, 0.0 }
 0x439   : > { %v3164_v53 = vpop.f32.mrf.mxu0 }
 0x43a   : > { %v3165_v56 = vadd.f32 %v5835_v30, %v3164_v53  ;;  %2789 = vmatmul.bf16.gmra.mxu2 %v5755_v41  ;;  %v5863_v55 = vpop.f32.mrf.mxu2 }
 0x43b   : > { %v2259_v13 = vpop.f32.mrf.mxu1 }
 0x43c   : > { %3323 = vst.msk [vmem:[%s5844_s26 + $0x8] sm:$0xff] %vm519_vm0, %v3165_v56  ;;  %v2260_v18 = vadd.f32 %v2259_v13, %v5517_v20 }
 0x43d   : > { %v2876_v9 = vpop.f32.mrf.mxu3 }
 0x43e   : > { %v2402_v0 = vmax.f32 %v2260_v18, 0.0  ;;  %v2877_v21 = vadd.f32 %v2876_v9, %v2708_v19  ;;  %v2718_v19 = vadd.f32 %v5697_v6, %v5763_v57 }
 0x440   : > { %v3008_v49 = vmax.f32 %v2877_v21, 0.0  ;;  %v2492_v61 = vpack.c.bf16 %v2402_v0, %v2400_v54 }
 0x441   : > { %v3167_v33 = vpop.f32.mrf.mxu0 }
 0x442   : > { %v3168_v41 = vadd.f32 %v5835_v30, %v3167_v33  ;;  %2918 = vmatmul.bf16.gmra.mxu3 %v2492_v61  ;;  %v3062_v43 = vpack.c.bf16 %v3008_v49, %v3007_v3  ;;  %v5878_v28 = vpop.f32.mrf.mxu2 }
 0x443   : > { %v2262_v62 = vpop.f32.mrf.mxu1 }
 0x444   : > { %3324 = vst.msk [vmem:[%s5844_s26 + $0x10] sm:$0xff] %vm519_vm0, %v3168_v41  ;;  %3206 = vmatmul.bf16.gmra.mxu0 %v3062_v43  ;;  %v2263_v35 = vadd.f32 %v2262_v62, %v5517_v20  ;;  %v2721_v62 = vadd.f32 %v5697_v6, %v5773_v17 }
 0x445   : > { %v2879_v38 = vpop.f32.mrf.mxu3 }
 0x446   : > { %2301 = vmatmul.bf16.gmra.mxu1 %v5612_v47  ;;  %v2880_v15 = vadd.f32 %v2879_v38, %v2711_v44  ;;  %v2404_v63 = vmax.f32 %v2263_v35, 0.0  ;;  %v2723_v35 = vadd.f32 %v5697_v6, %v5785_v31 }
 0x448   : > { %v3009_v51 = vmax.f32 %v2880_v15, 0.0 }
 0x449   : > { %v3169_v16 = vpop.f32.mrf.mxu0 }
 0x44a   : > { %v3170_v10 = vadd.f32 %v5835_v30, %v3169_v16  ;;  %2794 = vmatmul.bf16.gmra.mxu2 %v5771_v40  ;;  %v5884_v7 = vpop.f32.mrf.mxu2 }
 0x44b   : > { %v2264_v11 = vpop.f32.mrf.mxu1 }
 0x44c   : > { %3325 = vst.msk [vmem:[%s5844_s26 + $0x18] sm:$0xff] %vm519_vm0, %v3170_v10  ;;  %v2265_v47 = vadd.f32 %v2264_v11, %v5517_v20 }
 0x44d   : > { %v2881_v60 = vpop.f32.mrf.mxu3 }
 0x44e   : > { %v2406_v14 = vmax.f32 %v2265_v47, 0.0  ;;  %v2882_v46 = vadd.f32 %v2881_v60, %v2713_v42 }
 0x450   : > { %v3010_v58 = vmax.f32 %v2882_v46, 0.0  ;;  %v2494_v22 = vpack.c.bf16 %v2406_v14, %v2404_v63 }
 0x451   : > { %v3172_v40 = vpop.f32.mrf.mxu0 }
 0x452   : > { %v3173_v32 = vadd.f32 %v5835_v30, %v3172_v40  ;;  %2923 = vmatmul.bf16.gmra.mxu3 %v2494_v22  ;;  %v3063_v48 = vpack.c.bf16 %v3010_v58, %v3009_v51  ;;  %v5896_v61 = vpop.f32.mrf.mxu2 }
 0x453   : > { %v2267_v34 = vpop.f32.mrf.mxu1 }
 0x454   : > { %3326 = vst.msk [vmem:[%s5844_s26 + $0x20] sm:$0xff] %vm519_vm0, %v3173_v32  ;;  %3211 = vmatmul.bf16.gmra.mxu0 %v3063_v48  ;;  %v2268_v26 = vadd.f32 %v2267_v34, %v5517_v20  ;;  %v2726_v32 = vadd.f32 %v5697_v6, %v5790_v29 }
 0x455   : > { %v2884_v5 = vpop.f32.mrf.mxu3 }
 0x456   : > { %2306 = vmatmul.bf16.gmra.mxu1 %v5634_v45  ;;  %v2885_v24 = vadd.f32 %v2884_v5, %v2716_v12  ;;  %v2408_v9 = vmax.f32 %v2268_v26, 0.0 }
 0x458   : > { %v3011_v0 = vmax.f32 %v2885_v24, 0.0 }
 0x459   : > { %v3174_v53 = vpop.f32.mrf.mxu0 }
 0x45a   : > { %v3175_v56 = vadd.f32 %v5835_v30, %v3174_v53  ;;  %2799 = vmatmul.bf16.gmra.mxu2 %v5787_v27  ;;  %v5909_v10 = vpop.f32.mrf.mxu2  ;;  %v2728_v53 = vadd.f32 %v5697_v6, %v5803_v1 }
 0x45b   : > { %v2269_v13 = vpop.f32.mrf.mxu1 }
 0x45c   : > { %3327 = vst.msk [vmem:[%s5844_s26 + $0x28] sm:$0xff] %vm519_vm0, %v3175_v56  ;;  %v2270_v45 = vadd.f32 %v2269_v13, %v5517_v20 }
 0x45d   : > { %v2886_v18 = vpop.f32.mrf.mxu3 }
 0x45e   : > { %v2410_v54 = vmax.f32 %v2270_v45, 0.0  ;;  %v2887_v4 = vadd.f32 %v2886_v18, %v2718_v19 }
 0x460   : > { %v2496_v21 = vpack.c.bf16 %v2410_v54, %v2408_v9  ;;  %v3012_v3 = vmax.f32 %v2887_v4, 0.0 }
 0x461   : > { %v3177_v49 = vpop.f32.mrf.mxu0 }
 0x462   : > { %v3178_v27 = vadd.f32 %v5835_v30, %v3177_v49  ;;  %2928 = vmatmul.bf16.gmra.mxu3 %v2496_v21  ;;  %v3064_v57 = vpack.c.bf16 %v3012_v3, %v3011_v0  ;;  %v5917_v22 = vpop.f32.mrf.mxu2  ;;  %v2731_v21 = vadd.f32 %v5697_v6, %v5814_v37 }
 0x463   : > { %v2272_v33 = vpop.f32.mrf.mxu1 }
 0x464   : > { %3328 = vst.msk [vmem:[%s5844_s26 + $0x30] sm:$0xff] %vm519_vm0, %v3178_v27  ;;  %3216 = vmatmul.bf16.gmra.mxu0 %v3064_v57  ;;  %v2273_v38 = vadd.f32 %v2272_v33, %v5517_v20  ;;  %v2733_v33 = vadd.f32 %v5697_v6, %v5819_v52 }
 0x465   : > { %v2889_v41 = vpop.f32.mrf.mxu3 }
 0x466   : > { %2311 = vmatmul.bf16.gmra.mxu1 %v5653_v25  ;;  %v2890_v11 = vadd.f32 %v2889_v41, %v2721_v62  ;;  %v2412_v17 = vmax.f32 %v2273_v38, 0.0 }
 0x468   : > { %v3013_v60 = vmax.f32 %v2890_v11, 0.0 }
 0x469   : > { %v3179_v43 = vpop.f32.mrf.mxu0 }
 0x46a   : > { %v3180_v16 = vadd.f32 %v5835_v30, %v3179_v43  ;;  %2804 = vmatmul.bf16.gmra.mxu2 %v5801_v8  ;;  %v5930_v19 = vpop.f32.mrf.mxu2 }
 0x46b   : > { %v2274_v44 = vpop.f32.mrf.mxu1 }
 0x46c   : > { %3329 = vst.msk [vmem:[%s5844_s26 + $0x38] sm:$0xff] %vm519_vm0, %v3180_v16  ;;  %v2275_v25 = vadd.f32 %v2274_v44, %v5517_v20 }
 0x46d   : > { %v2891_v42 = vpop.f32.mrf.mxu3 }
 0x46e   : > { %v2414_v15 = vmax.f32 %v2275_v25, 0.0  ;;  %v2892_v47 = vadd.f32 %v2891_v42, %v2723_v35 }
 0x470   : > { %v2498_v63 = vpack.c.bf16 %v2414_v15, %v2412_v17  ;;  %v3014_v14 = vmax.f32 %v2892_v47, 0.0  ;;  %v2736_v15 = vadd.f32 %v5697_v6, %v5839_v59 }
 0x471   : > { %v3182_v8 = vpop.f32.mrf.mxu0 }
 0x472   : > { %v3183_v46 = vadd.f32 %v5835_v30, %v3182_v8  ;;  %2933 = vmatmul.bf16.gmra.mxu3 %v2498_v63  ;;  %v3065_v31 = vpack.c.bf16 %v3014_v14, %v3013_v60  ;;  %v5938_v3 = vpop.f32.mrf.mxu2  ;;  %v2738_v14 = vadd.f32 %v5697_v6, %v5852_v2 }
 0x473   : > { %v2277_v51 = vpop.f32.mrf.mxu1 }
 0x474   : > { %3330 = vst.msk [vmem:[%s5844_s26 + $0x40] sm:$0xff] %vm519_vm0, %v3183_v46  ;;  %3221 = vmatmul.bf16.gmra.mxu0 %v3065_v31  ;;  %v2278_v48 = vadd.f32 %v2277_v51, %v5517_v20 }
 0x475   : > { %v2894_v58 = vpop.f32.mrf.mxu3 }
 0x476   : > { %2316 = vmatmul.bf16.gmra.mxu1 %v5672_v39  ;;  %v2895_v12 = vadd.f32 %v2894_v58, %v2726_v32  ;;  %v2416_v56 = vmax.f32 %v2278_v48, 0.0 }
 0x478   : > { %v3015_v24 = vmax.f32 %v2895_v12, 0.0 }
 0x479   : > { %v3184_v40 = vpop.f32.mrf.mxu0 }
 0x47a   : > { %v3185_v34 = vadd.f32 %v5835_v30, %v3184_v40  ;;  %2809 = vmatmul.bf16.gmra.mxu2 %v5817_v23 }
 0x47b   : > { %v2279_v5 = vpop.f32.mrf.mxu1 }
 0x47c   : > { %3331 = vst.msk [vmem:[%s5844_s26 + $0x48] sm:$0xff] %vm519_vm0, %v3185_v34  ;;  %v2280_v39 = vadd.f32 %v2279_v5, %v5517_v20 }
 0x47d   : > { %v2896_v26 = vpop.f32.mrf.mxu3 }
 0x47e   : > { %v2418_v13 = vmax.f32 %v2280_v39, 0.0  ;;  %v2897_v29 = vadd.f32 %v2896_v26, %v2728_v53  ;;  %v2741_v26 = vadd.f32 %v5697_v6, %v5863_v55 }
 0x480   : > { %v2500_v45 = vpack.c.bf16 %v2418_v13, %v2416_v56  ;;  %v3016_v18 = vmax.f32 %v2897_v29, 0.0 }
 0x481   : > { %v3187_v23 = vpop.f32.mrf.mxu0 }
 0x482   : > { %v3188_v9 = vadd.f32 %v5835_v30, %v3187_v23  ;;  %2938 = vmatmul.bf16.gmra.mxu3 %v2500_v45  ;;  %v3066_v1 = vpack.c.bf16 %v3016_v18, %v3015_v24  ;;  %v2743_v24 = vadd.f32 %v5697_v6, %v5878_v28  ;;  %v5973_v28 = vpop.f32.mrf.mxu2 }
 0x483   : > { %v2282_v54 = vpop.f32.mrf.mxu1 }
 0x484   : > { %3332 = vst.msk [vmem:[%s5844_s26 + $0x50] sm:$0xff] %vm519_vm0, %v3188_v9  ;;  %3226 = vmatmul.bf16.gmra.mxu0 %v3066_v1  ;;  %v2283_v49 = vadd.f32 %v2282_v54, %v5517_v20 }
 0x485   : > { %v2899_v4 = vpop.f32.mrf.mxu3 }
 0x486   : > { %2321 = vmatmul.bf16.gmra.mxu1 %v5689_v36  ;;  %v2900_v41 = vadd.f32 %v2899_v4, %v2731_v21  ;;  %v2420_v37 = vmax.f32 %v2283_v49, 0.0 }
 0x488   : > { %v3017_v16 = vmax.f32 %v2900_v41, 0.0 }
 0x489   : > { %v3189_v0 = vpop.f32.mrf.mxu0 }
 0x48a   : > { %v3190_v27 = vadd.f32 %v5835_v30, %v3189_v0  ;;  %2814 = vmatmul.bf16.gmra.mxu2 %v5837_v50 }
 0x48b   : > { %v2284_v57 = vpop.f32.mrf.mxu1 }
 0x48c   : > { %3333 = vst.msk [vmem:[%s5844_s26 + $0x58] sm:$0xff] %vm519_vm0, %v3190_v27  ;;  %v2285_v36 = vadd.f32 %v2284_v57, %v5517_v20 }
 0x48d   : > { %v2901_v43 = vpop.f32.mrf.mxu3 }
 0x48e   : > { %v2422_v62 = vmax.f32 %v2285_v36, 0.0  ;;  %v2902_v38 = vadd.f32 %v2901_v43, %v2733_v33  ;;  %v2746_v36 = vadd.f32 %v5697_v6, %v5884_v7 }
 0x490   : > { %v2502_v44 = vpack.c.bf16 %v2422_v62, %v2420_v37  ;;  %v3018_v35 = vmax.f32 %v2902_v38, 0.0  ;;  %v2748_v38 = vadd.f32 %v5697_v6, %v5896_v61 }
 0x491   : > { %v3192_v11 = vpop.f32.mrf.mxu0 }
 0x492   : > { %v3193_v50 = vadd.f32 %v5835_v30, %v3192_v11  ;;  %2943 = vmatmul.bf16.gmra.mxu3 %v2502_v44  ;;  %v3067_v25 = vpack.c.bf16 %v3018_v35, %v3017_v16  ;;  %v5986_v35 = vpop.f32.mrf.mxu2 }
 0x493   : > { %v2287_v52 = vpop.f32.mrf.mxu1 }
 0x494   : > { %3334 = vst.msk [vmem:[%s5844_s26 + $0x60] sm:$0xff] %vm519_vm0, %v3193_v50  ;;  %3231 = vmatmul.bf16.gmra.mxu0 %v3067_v25  ;;  %v2288_v47 = vadd.f32 %v2287_v52, %v5517_v20 }
 0x495   : > { %v2904_v42 = vpop.f32.mrf.mxu3 }
 0x496   : > { %v2905_v8 = vadd.f32 %v2904_v42, %v2736_v15  ;;  %v2424_v51 = vmax.f32 %v2288_v47, 0.0 }
 0x498   : > { %v3019_v32 = vmax.f32 %v2905_v8, 0.0 }
 0x499   : > { %v3194_v17 = vpop.f32.mrf.mxu0 }
 0x49a   : > { %v3195_v60 = vadd.f32 %v5835_v30, %v3194_v17 }
 0x49b   : > { %v2289_v63 = vpop.f32.mrf.mxu1 }
 0x49c   : > { %3335 = vst.msk [vmem:[%s5844_s26 + $0x68] sm:$0xff] %vm519_vm0, %v3195_v60  ;;  %v2290_v46 = vadd.f32 %v2289_v63, %v5517_v20 }
 0x49d   : > { %v2906_v31 = vpop.f32.mrf.mxu3 }
 0x49e   : > { %v2426_v58 = vmax.f32 %v2290_v46, 0.0  ;;  %v2907_v40 = vadd.f32 %v2906_v31, %v2738_v14  ;;  %v5991_v14 = vpop.f32.mrf.mxu2  ;;  %v2751_v46 = vadd.f32 %v5697_v6, %v5909_v10 }
 0x4a0   : > { %v2504_v59 = vpack.c.bf16 %v2426_v58, %v2424_v51  ;;  %v3020_v48 = vmax.f32 %v2907_v40, 0.0  ;;  %v2753_v40 = vadd.f32 %v5697_v6, %v5917_v22 }
 0x4a1   : > { %v3197_v34 = vpop.f32.mrf.mxu0 }
 0x4a2   : > { %v3198_v5 = vadd.f32 %v5835_v30, %v3197_v34  ;;  %2948 = vmatmul.bf16.gmra.mxu3 %v2504_v59  ;;  %v3068_v53 = vpack.c.bf16 %v3020_v48, %v3019_v32 }
 0x4a3   : > { %v2292_v2 = vpop.f32.mrf.mxu1 }
 0x4a4   : > { %3336 = vst.msk [vmem:[%s5844_s26 + $0x70] sm:$0xff] %vm519_vm0, %v3198_v5  ;;  %3236 = vmatmul.bf16.gmra.mxu0 %v3068_v53  ;;  %v2293_v56 = vadd.f32 %v2292_v2, %v5517_v20 }
 0x4a5   : > { %v2909_v12 = vpop.f32.mrf.mxu3 }
 0x4a6   : > { %v2910_v45 = vadd.f32 %v2909_v12, %v2741_v26  ;;  %v2428_v9 = vmax.f32 %v2293_v56, 0.0 }
 0x4a8   : > { %v3021_v4 = vmax.f32 %v2910_v45, 0.0 }
 0x4a9   : > { %v3199_v39 = vpop.f32.mrf.mxu0 }
 0x4aa   : > { %v3200_v13 = vadd.f32 %v5835_v30, %v3199_v39  ;;  %v6002_v39 = vpop.f32.mrf.mxu2 }
 0x4ab   : > { %v2294_v29 = vpop.f32.mrf.mxu1 }
 0x4ac   : > { %3337 = vst.msk [vmem:[%s5844_s26 + $0x78] sm:$0xff] %vm519_vm0, %v3200_v13  ;;  %v2295_v18 = vadd.f32 %v2294_v29, %v5517_v20 }
 0x4ad   : > { %v2911_v23 = vpop.f32.mrf.mxu3 }
 0x4ae   : > { %v2430_v1 = vmax.f32 %v2295_v18, 0.0  ;;  %v2912_v54 = vadd.f32 %v2911_v23, %v2743_v24  ;;  %v6010_v24 = vld [vmem:[%s6209_s8] ss:$0 sm:$0xff] }
 0x4af   : > { %v2756_v45 = vadd.f32 %v6010_v24, %v5930_v19 }
 0x4b0   : > { %v2506_v55 = vpack.c.bf16 %v2430_v1, %v2428_v9  ;;  %v3022_v0 = vmax.f32 %v2912_v54, 0.0  ;;  %v2758_v54 = vadd.f32 %v6010_v24, %v5938_v3 }
 0x4b1   : > { %v3202_v21 = vpop.f32.mrf.mxu0 }
 0x4b2   : > { %v3203_v49 = vadd.f32 %v5835_v30, %v3202_v21  ;;  %2953 = vmatmul.bf16.gmra.mxu3 %v2506_v55  ;;  %v3069_v27 = vpack.c.bf16 %v3022_v0, %v3021_v4  ;;  %v6016_v9 = vpop.f32.mrf.mxu2 }
 0x4b3   : > { %v2297_v57 = vpop.f32.mrf.mxu1 }
 0x4b4   : > { %3338 = vst.msk [vmem:[%s5844_s26 + $0x80] sm:$0xff] %vm519_vm0, %v3203_v49  ;;  %3241 = vmatmul.bf16.gmra.mxu0 %v3069_v27  ;;  %v2298_v43 = vadd.f32 %v2297_v57, %v5517_v20 }
 0x4b5   : > { %v2914_v33 = vpop.f32.mrf.mxu3 }
 0x4b6   : > { %v2915_v16 = vadd.f32 %v2914_v33, %v2746_v36  ;;  %v2432_v50 = vmax.f32 %v2298_v43, 0.0 }
 0x4b8   : > { %v3023_v52 = vmax.f32 %v2915_v16, 0.0  ;;  %v2761_v16 = vadd.f32 %v6010_v24, %v5973_v28 }
 0x4b9   : > { %v3204_v41 = vpop.f32.mrf.mxu0 }
 0x4ba   : > { %v3205_v37 = vadd.f32 %v5835_v30, %v3204_v41 }
 0x4bb   : > { %v2299_v62 = vpop.f32.mrf.mxu1 }
 0x4bc   : > { %3339 = vst.msk [vmem:[%s5844_s26 + $0x88] sm:$0xff] %vm519_vm0, %v3205_v37  ;;  %v2300_v44 = vadd.f32 %v2299_v62, %v5517_v20  ;;  %v2772_v37 = vpop.f32.mrf.mxu2 }
 0x4bd   : > { %v2916_v11 = vpop.f32.mrf.mxu3 }
 0x4be   : > { %v2434_v25 = vmax.f32 %v2300_v44, 0.0  ;;  %v2917_v7 = vadd.f32 %v2916_v11, %v2748_v38 }
 0x4c0   : > { %v2508_v42 = vpack.c.bf16 %v2434_v25, %v2432_v50  ;;  %v3024_v17 = vmax.f32 %v2917_v7, 0.0  ;;  %v2763_v25 = vadd.f32 %v6010_v24, %v5986_v35 }
 0x4c1   : > { %v3207_v15 = vpop.f32.mrf.mxu0 }
 0x4c2   : > { %v3208_v47 = vadd.f32 %v5835_v30, %v3207_v15  ;;  %2958 = vmatmul.bf16.gmra.mxu3 %v2508_v42  ;;  %v3070_v61 = vpack.c.bf16 %v3024_v17, %v3023_v52 }
 0x4c3   : > { %v2302_v60 = vpop.f32.mrf.mxu1 }
 0x4c4   : > { %3340 = vst.msk [vmem:[%s5844_s26 + $0x90] sm:$0xff] %vm519_vm0, %v3208_v47  ;;  %3246 = vmatmul.bf16.gmra.mxu0 %v3070_v61  ;;  %v2303_v31 = vadd.f32 %v2302_v60, %v5517_v20  ;;  %v6035_v61 = vpop.f32.mrf.mxu2 }
 0x4c5   : > { %v2919_v63 = vpop.f32.mrf.mxu3 }
 0x4c6   : > { %v2920_v32 = vadd.f32 %v2919_v63, %v2751_v46  ;;  %v2436_v34 = vmax.f32 %v2303_v31, 0.0 }
 0x4c8   : > { %v3025_v2 = vmax.f32 %v2920_v32, 0.0  ;;  %v2766_v32 = vadd.f32 %v6010_v24, %v5991_v14 }
 0x4c9   : > { %v3209_v8 = vpop.f32.mrf.mxu0 }
 0x4ca   : > { %v3210_v51 = vadd.f32 %v5835_v30, %v3209_v8 }
 0x4cb   : > { %v2304_v58 = vpop.f32.mrf.mxu1 }
 0x4cc   : > { %3341 = vst.msk [vmem:[%s5844_s26 + $0x98] sm:$0xff] %vm519_vm0, %v3210_v51  ;;  %v2305_v59 = vadd.f32 %v2304_v58, %v5517_v20  ;;  %v2777_v58 = vpop.f32.mrf.mxu2 }
 0x4cd   : > { %v2921_v48 = vpop.f32.mrf.mxu3 }
 0x4ce   : > { %v2438_v5 = vmax.f32 %v2305_v59, 0.0  ;;  %v2922_v53 = vadd.f32 %v2921_v48, %v2753_v40 }
 0x4d0   : > { %v2510_v10 = vpack.c.bf16 %v2438_v5, %v2436_v34  ;;  %v3026_v12 = vmax.f32 %v2922_v53, 0.0  ;;  %v2768_v5 = vadd.f32 %v6010_v24, %v6002_v39 }
 0x4d1   : > { %v3212_v26 = vpop.f32.mrf.mxu0 }
 0x4d2   : > { %v3213_v56 = vadd.f32 %v5835_v30, %v3212_v26  ;;  %2963 = vmatmul.bf16.gmra.mxu3 %v2510_v10  ;;  %v3071_v6 = vpack.c.bf16 %v3026_v12, %v3025_v2 }
 0x4d3   : > { %v2307_v22 = vpop.f32.mrf.mxu1 }
 0x4d4   : > { %3342 = vst.msk [vmem:[%s5844_s26 + $0xa0] sm:$0xff] %vm519_vm0, %v3213_v56  ;;  %3251 = vmatmul.bf16.gmra.mxu0 %v3071_v6  ;;  %v2308_v18 = vadd.f32 %v2307_v22, %v5517_v20  ;;  %v2780_v39 = vpop.f32.mrf.mxu2 }
 0x4d5   : > { %v2924_v13 = vpop.f32.mrf.mxu3 }
 0x4d6   : > { %v2925_v4 = vadd.f32 %v2924_v13, %v2756_v45  ;;  %v2440_v21 = vmax.f32 %v2308_v18, 0.0 }
 0x4d8   : > { %v3027_v27 = vmax.f32 %v2925_v4, 0.0 }
 0x4d9   : > { %v3214_v29 = vpop.f32.mrf.mxu0 }
 0x4da   : > { %v3215_v23 = vadd.f32 %v5835_v30, %v3214_v29 }
 0x4db   : > { %v2309_v1 = vpop.f32.mrf.mxu1 }
 0x4dc   : > { %3343 = vst.msk [vmem:[%s5844_s26 + $0xa8] sm:$0xff] %vm519_vm0, %v3215_v23  ;;  %v2310_v55 = vadd.f32 %v2309_v1, %v5517_v20 }
 0x4dd   : > { %v2926_v0 = vpop.f32.mrf.mxu3 }
 0x4de   : > { %v2442_v49 = vmax.f32 %v2310_v55, 0.0  ;;  %v2927_v19 = vadd.f32 %v2926_v0, %v2758_v54  ;;  %v2771_v54 = vadd.f32 %v6010_v24, %v6016_v9 }
 0x4e0   : > { %v2512_v57 = vpack.c.bf16 %v2442_v49, %v2440_v21  ;;  %v3028_v33 = vmax.f32 %v2927_v19, 0.0  ;;  %v2773_v21 = vadd.f32 %v6010_v24, %v2772_v37 }
 0x4e1   : > { %v3217_v41 = vpop.f32.mrf.mxu0 }
 0x4e2   : > { %v3218_v36 = vadd.f32 %v5835_v30, %v3217_v41  ;;  %2968 = vmatmul.bf16.gmra.mxu3 %v2512_v57  ;;  %v3072_v43 = vpack.c.bf16 %v3028_v33, %v3027_v27  ;;  %v2782_v27 = vpop.f32.mrf.mxu2 }
 0x4e3   : > { %v2312_v3 = vpop.f32.mrf.mxu1 }
 0x4e4   : > { %3344 = vst.msk [vmem:[%s5844_s26 + $0xb0] sm:$0xff] %vm519_vm0, %v3218_v36  ;;  %3256 = vmatmul.bf16.gmra.mxu0 %v3072_v43  ;;  %v2313_v44 = vadd.f32 %v2312_v3, %v5517_v20 }
 0x4e5   : > { %v2929_v62 = vpop.f32.mrf.mxu3 }
 0x4e6   : > { %v2930_v7 = vadd.f32 %v2929_v62, %v2761_v16  ;;  %v2444_v17 = vmax.f32 %v2313_v44, 0.0 }
 0x4e8   : > { %v3029_v28 = vmax.f32 %v2930_v7, 0.0 }
 0x4e9   : > { %v3219_v38 = vpop.f32.mrf.mxu0 }
 0x4ea   : > { %v3220_v11 = vadd.f32 %v5835_v30, %v3219_v38 }
 0x4eb   : > { %v2314_v50 = vpop.f32.mrf.mxu1 }
 0x4ec   : > { %3345 = vst.msk [vmem:[%s5844_s26 + $0xb8] sm:$0xff] %vm519_vm0, %v3220_v11  ;;  %v2315_v52 = vadd.f32 %v2314_v50, %v5517_v20  ;;  %v2776_v11 = vadd.f32 %v6010_v24, %v6035_v61 }
 0x4ed   : > { %v2931_v42 = vpop.f32.mrf.mxu3 }
 0x4ee   : > { %v2446_v15 = vmax.f32 %v2315_v52, 0.0  ;;  %v2932_v47 = vadd.f32 %v2931_v42, %v2763_v25  ;;  %v2778_v25 = vadd.f32 %v6010_v24, %v2777_v58 }
 0x4f0   : > { %v2514_v60 = vpack.c.bf16 %v2446_v15, %v2444_v17  ;;  %v3030_v63 = vmax.f32 %v2932_v47, 0.0 }
 0x4f1   : > { %v3222_v8 = vpop.f32.mrf.mxu0 }
 0x4f2   : > { %v3223_v46 = vadd.f32 %v5835_v30, %v3222_v8  ;;  %2973 = vmatmul.bf16.gmra.mxu3 %v2514_v60  ;;  %v3073_v35 = vpack.c.bf16 %v3030_v63, %v3029_v28 }
 0x4f3   : > { %v2317_v31 = vpop.f32.mrf.mxu1 }
 0x4f4   : > { %3346 = vst.msk [vmem:[%s5844_s26 + $0xc0] sm:$0xff] %vm519_vm0, %v3223_v46  ;;  %3261 = vmatmul.bf16.gmra.mxu0 %v3073_v35  ;;  %v2318_v59 = vadd.f32 %v2317_v31, %v5517_v20  ;;  %v2781_v46 = vadd.f32 %v6010_v24, %v2780_v39 }
 0x4f5   : > { %v2934_v51 = vpop.f32.mrf.mxu3 }
 0x4f6   : > { %v2935_v53 = vadd.f32 %v2934_v51, %v2766_v32  ;;  %v2448_v12 = vmax.f32 %v2318_v59, 0.0  ;;  %v2783_v51 = vadd.f32 %v6010_v24, %v2782_v27 }
 0x4f8   : > { %v3031_v6 = vmax.f32 %v2935_v53, 0.0 }
 0x4f9   : > { %v3224_v40 = vpop.f32.mrf.mxu0 }
 0x4fa   : > { %v3225_v48 = vadd.f32 %v5835_v30, %v3224_v40 }
 0x4fb   : > { %v2319_v34 = vpop.f32.mrf.mxu1 }
 0x4fc   : > { %3347 = vst.msk [vmem:[%s5844_s26 + $0xc8] sm:$0xff] %vm519_vm0, %v3225_v48  ;;  %v2320_v2 = vadd.f32 %v2319_v34, %v5517_v20 }
 0x4fd   : > { %v2936_v10 = vpop.f32.mrf.mxu3 }
 0x4fe   : > { %v2450_v26 = vmax.f32 %v2320_v2, 0.0  ;;  %v2937_v56 = vadd.f32 %v2936_v10, %v2768_v5 }
 0x500   : > { %v2516_v14 = vpack.c.bf16 %v2450_v26, %v2448_v12  ;;  %v3032_v22 = vmax.f32 %v2937_v56, 0.0 }
 0x501   : > { %v3227_v13 = vpop.f32.mrf.mxu0 }
 0x502   : > { %v3074_v29 = vpack.c.bf16 %v3032_v22, %v3031_v6  ;;  %v3228_v45 = vadd.f32 %v5835_v30, %v3227_v13  ;;  %2978 = vmatmul.bf16.gmra.mxu3 %v2516_v14 }
 0x503   : > { %v2322_v18 = vpop.f32.mrf.mxu1 }
 0x504   : > { %3348 = vst.msk [vmem:[%s5844_s26 + $0xd0] sm:$0xff] %vm519_vm0, %v3228_v45  ;;  %3266 = vmatmul.bf16.gmra.mxu0 %v3074_v29  ;;  %v2323_v4 = vadd.f32 %v2322_v18, %v5517_v20 }
 0x505   : > { %v2939_v23 = vpop.f32.mrf.mxu3 }
 0x506   : > { %v2940_v49 = vadd.f32 %v2939_v23, %v2771_v54  ;;  %v2452_v33 = vmax.f32 %v2323_v4, 0.0 }
 0x508   : > { %v3033_v43 = vmax.f32 %v2940_v49, 0.0 }
 0x509   : > { %v3229_v1 = vpop.f32.mrf.mxu0 }
 0x50a   : > { %v3230_v55 = vadd.f32 %v5835_v30, %v3229_v1 }
 0x50b   : > { %v2324_v0 = vpop.f32.mrf.mxu1 }
 0x50c   : > { %3349 = vst.msk [vmem:[%s5844_s26 + $0xd8] sm:$0xff] %vm519_vm0, %v3230_v55  ;;  %v2325_v19 = vadd.f32 %v2324_v0, %v5517_v20  ;;  %v2785_v20 = vpop.f32.mrf.mxu2 }
 0x50d   : > { %v2941_v57 = vpop.f32.mrf.mxu3  ;;  %v2786_v26 = vadd.f32 %v6010_v24, %v2785_v20 }
 0x50e   : > { %v2454_v41 = vmax.f32 %v2325_v19, 0.0  ;;  %v2942_v36 = vadd.f32 %v2941_v57, %v2773_v21 }
 0x510   : > { %v2518_v9 = vpack.c.bf16 %v2454_v41, %v2452_v33  ;;  %v3034_v3 = vmax.f32 %v2942_v36, 0.0 }
 0x511   : > { %v3232_v62 = vpop.f32.mrf.mxu0 }
 0x512   : > { %v3075_v38 = vpack.c.bf16 %v3034_v3, %v3033_v43  ;;  %v3233_v16 = vadd.f32 %v5835_v30, %v3232_v62  ;;  %2983 = vmatmul.bf16.gmra.mxu3 %v2518_v9 }
 0x514   : > { %3350 = vst.msk [vmem:[%s5844_s26 + $0xe0] sm:$0xff] %vm519_vm0, %v3233_v16  ;;  %3271 = vmatmul.bf16.gmra.mxu0 %v3075_v38  ;;  %v2787_v47 = vpop.f32.mrf.mxu2 }
 0x515   : > { %v2944_v37 = vpop.f32.mrf.mxu3  ;;  %v2788_v6 = vadd.f32 %v6010_v24, %v2787_v47 }
 0x516   : > { %v2945_v7 = vadd.f32 %v2944_v37, %v2776_v11 }
 0x518   : > { %v3035_v17 = vmax.f32 %v2945_v7, 0.0 }
 0x519   : > { %v3234_v44 = vpop.f32.mrf.mxu0 }
 0x51a   : > { %v3235_v50 = vadd.f32 %v5835_v30, %v3234_v44 }
 0x51c   : > { %3351 = vst.msk [vmem:[%s5844_s26 + $0xe8] sm:$0xff] %vm519_vm0, %v3235_v50  ;;  %v2790_v31 = vpop.f32.mrf.mxu2 }
 0x51d   : > { %v2946_v52 = vpop.f32.mrf.mxu3  ;;  %v2791_v0 = vadd.f32 %v6010_v24, %v2790_v31 }
 0x51e   : > { %v2947_v42 = vadd.f32 %v2946_v52, %v2778_v25 }
 0x520   : > { %v3036_v15 = vmax.f32 %v2947_v42, 0.0 }
 0x521   : > { %v3237_v28 = vpop.f32.mrf.mxu0 }
 0x522   : > { %v3076_v60 = vpack.c.bf16 %v3036_v15, %v3035_v17  ;;  %v3238_v63 = vadd.f32 %v5835_v30, %v3237_v28 }
 0x524   : > { %3352 = vst.msk [vmem:[%s5844_s26 + $0xf0] sm:$0xff] %vm519_vm0, %v3238_v63  ;;  %3276 = vmatmul.bf16.gmra.mxu0 %v3076_v60  ;;  %v2792_v2 = vpop.f32.mrf.mxu2 }
 0x525   : > { %v2949_v61 = vpop.f32.mrf.mxu3  ;;  %v2793_v49 = vadd.f32 %v6010_v24, %v2792_v2 }
 0x526   : > { %v2950_v58 = vadd.f32 %v2949_v61, %v2781_v46 }
 0x528   : > { %v3037_v59 = vmax.f32 %v2950_v58, 0.0 }
 0x529   : > { %v3239_v8 = vpop.f32.mrf.mxu0 }
 0x52a   : > { %v3240_v35 = vadd.f32 %v5835_v30, %v3239_v8 }
 0x52c   : > { %3353 = vst.msk [vmem:[%s5844_s26 + $0xf8] sm:$0xff] %vm519_vm0, %v3240_v35  ;;  %v2795_v29 = vpop.f32.mrf.mxu2 }
 0x52d   : > { %v2951_v40 = vpop.f32.mrf.mxu3  ;;  %v2796_v16 = vadd.f32 %v6010_v24, %v2795_v29 }
 0x52e   : > { %v2952_v32 = vadd.f32 %v2951_v40, %v2783_v51 }
 0x530   : > { %v3038_v48 = vmax.f32 %v2952_v32, 0.0 }
 0x531   : > { %v3242_v34 = vpop.f32.mrf.mxu0 }
 0x532   : > { %v3077_v5 = vpack.c.bf16 %v3038_v48, %v3037_v59  ;;  %v3243_v53 = vadd.f32 %v5835_v30, %v3242_v34 }
 0x534   : > { %3354 = vst.msk [vmem:[%s5844_s26 + $0x100] sm:$0xff] %vm519_vm0, %v3243_v53  ;;  %3281 = vmatmul.bf16.gmra.mxu0 %v3077_v5  ;;  %v2797_v4 = vpop.f32.mrf.mxu2 }
 0x535   : > { %v2954_v10 = vpop.f32.mrf.mxu3  ;;  %v2798_v20 = vadd.f32 %v6010_v24, %v2797_v4 }
 0x536   : > { %v2955_v14 = vadd.f32 %v2954_v10, %v2786_v26 }
 0x538   : > { %v3039_v45 = vmax.f32 %v2955_v14, 0.0 }
 0x539   : > { %v3244_v12 = vpop.f32.mrf.mxu0 }
 0x53a   : > { %v3245_v56 = vadd.f32 %v5835_v30, %v3244_v12 }
 0x53c   : > { %3355 = vst.msk [vmem:[%s5844_s26 + $0x108] sm:$0xff] %vm519_vm0, %v3245_v56  ;;  %v2800_v3 = vpop.f32.mrf.mxu2 }
 0x53d   : > { %v2956_v22 = vpop.f32.mrf.mxu3  ;;  %v2801_v63 = vadd.f32 %v6010_v24, %v2800_v3 }
 0x53e   : > { %v2957_v13 = vadd.f32 %v2956_v22, %v2788_v6 }
 0x540   : > { %v3040_v39 = vmax.f32 %v2957_v13, 0.0 }
 0x541   : > { %v3247_v18 = vpop.f32.mrf.mxu0 }
 0x542   : > { %v3078_v23 = vpack.c.bf16 %v3040_v39, %v3039_v45  ;;  %v3248_v1 = vadd.f32 %v5835_v30, %v3247_v18 }
 0x544   : > { %3356 = vst.msk [vmem:[%s5844_s26 + $0x110] sm:$0xff] %vm519_vm0, %v3248_v1  ;;  %3286 = vmatmul.bf16.gmra.mxu0 %v3078_v23  ;;  %v2802_v11 = vpop.f32.mrf.mxu2 }
 0x545   : > { %v2959_v54 = vpop.f32.mrf.mxu3  ;;  %v2803_v8 = vadd.f32 %v6010_v24, %v2802_v11 }
 0x546   : > { %v2960_v19 = vadd.f32 %v2959_v54, %v2791_v0 }
 0x548   : > { %v3041_v33 = vmax.f32 %v2960_v19, 0.0 }
 0x549   : > { %v3249_v55 = vpop.f32.mrf.mxu0 }
 0x54a   : > { %v3250_v21 = vadd.f32 %v5835_v30, %v3249_v55 }
 0x54c   : > { %3357 = vst.msk [vmem:[%s5844_s26 + $0x118] sm:$0xff] %vm519_vm0, %v3250_v21  ;;  %v2805_v28 = vpop.f32.mrf.mxu2 }
 0x54d   : > { %v2961_v27 = vpop.f32.mrf.mxu3  ;;  %v2806_v53 = vadd.f32 %v6010_v24, %v2805_v28 }
 0x54e   : > { %v2962_v57 = vadd.f32 %v2961_v27, %v2793_v49 }
 0x550   : > { %v3042_v41 = vmax.f32 %v2962_v57, 0.0 }
 0x551   : > { %v3252_v36 = vpop.f32.mrf.mxu0 }
 0x552   : > { %v3079_v43 = vpack.c.bf16 %v3042_v41, %v3041_v33  ;;  %v3253_v9 = vadd.f32 %v5835_v30, %v3252_v36  ;;  %v6128_v41 = vld [vmem:[%s6211_s10] ss:$0 sm:$0xff] }
 0x554   : > { %3358 = vst.msk [vmem:[%s5844_s26 + $0x120] sm:$0xff] %vm519_vm0, %v3253_v9  ;;  %3291 = vmatmul.bf16.gmra.mxu0 %v3079_v43  ;;  %v2807_v40 = vpop.f32.mrf.mxu2 }
 0x555   : > { %v2964_v62 = vpop.f32.mrf.mxu3  ;;  %v2808_v12 = vadd.f32 %v6010_v24, %v2807_v40 }
 0x556   : > { %v2965_v44 = vadd.f32 %v2964_v62, %v2796_v16 }
 0x558   : > { %v3043_v7 = vmax.f32 %v2965_v44, 0.0 }
 0x559   : > { %v3254_v38 = vpop.f32.mrf.mxu0 }
 0x55a   : > { %v3255_v37 = vadd.f32 %v5835_v30, %v3254_v38 }
 0x55c   : > { %3359 = vst.msk [vmem:[%s5844_s26 + $0x128] sm:$0xff] %vm519_vm0, %v3255_v37  ;;  %v2810_v10 = vpop.f32.mrf.mxu2 }
 0x55d   : > { %v2966_v50 = vpop.f32.mrf.mxu3  ;;  %v2811_v1 = vadd.f32 %v6010_v24, %v2810_v10 }
 0x55e   : > { %v2967_v25 = vadd.f32 %v2966_v50, %v2798_v20 }
 0x560   : > { %v3044_v52 = vmax.f32 %v2967_v25, 0.0 }
 0x561   : > { %v3257_v42 = vpop.f32.mrf.mxu0 }
 0x562   : > { %v3080_v17 = vpack.c.bf16 %v3044_v52, %v3043_v7  ;;  %v3258_v15 = vadd.f32 %v5835_v30, %v3257_v42 }
 0x564   : > { %3360 = vst.msk [vmem:[%s5844_s26 + $0x130] sm:$0xff] %vm519_vm0, %v3258_v15  ;;  %3296 = vmatmul.bf16.gmra.mxu0 %v3080_v17  ;;  %v2812_v39 = vpop.f32.mrf.mxu2 }
 0x565   : > { %v2969_v47 = vpop.f32.mrf.mxu3  ;;  %v2813_v4 = vadd.f32 %v6010_v24, %v2812_v39 }
 0x566   : > { %v2970_v46 = vadd.f32 %v2969_v47, %v2801_v63 }
 0x568   : > { %v3045_v51 = vmax.f32 %v2970_v46, 0.0 }
 0x569   : > { %v3259_v60 = vpop.f32.mrf.mxu0 }
 0x56a   : > { %v3260_v61 = vadd.f32 %v5835_v30, %v3259_v60 }
 0x56c   : > { %3361 = vst.msk [vmem:[%s5844_s26 + $0x138] sm:$0xff] %vm519_vm0, %v3260_v61  ;;  %v2815_v49 = vpop.f32.mrf.mxu2 }
 0x56d   : > { %v2971_v35 = vpop.f32.mrf.mxu3  ;;  %v2816_v3 = vadd.f32 %v6010_v24, %v2815_v49 }
 0x56e   : > { %v2972_v31 = vadd.f32 %v2971_v35, %v2803_v8 }
 0x570   : > { %v3046_v58 = vmax.f32 %v2972_v31, 0.0 }
 0x571   : > { %v3262_v32 = vpop.f32.mrf.mxu0 }
 0x572   : > { %v3081_v59 = vpack.c.bf16 %v3046_v58, %v3045_v51  ;;  %v3263_v48 = vadd.f32 %v5835_v30, %v3262_v32 }
 0x574   : > { %3362 = vst.msk [vmem:[%s5844_s26 + $0x140] sm:$0xff] %vm519_vm0, %v3263_v48  ;;  %3301 = vmatmul.bf16.gmra.mxu0 %v3081_v59  ;;  %v2817_v43 = vpop.f32.mrf.mxu2 }
 0x575   : > { %v2974_v34 = vpop.f32.mrf.mxu3  ;;  %v2818_v38 = vadd.f32 %v6010_v24, %v2817_v43 }
 0x576   : > { %v2975_v26 = vadd.f32 %v2974_v34, %v2806_v53 }
 0x578   : > { %v3047_v14 = vmax.f32 %v2975_v26, 0.0 }
 0x579   : > { %v3264_v5 = vpop.f32.mrf.mxu0 }
 0x57a   : > { %v3265_v2 = vadd.f32 %v5835_v30, %v3264_v5 }
 0x57c   : > { %3363 = vst.msk [vmem:[%s5844_s26 + $0x148] sm:$0xff] %vm519_vm0, %v3265_v2 }
 0x57d   : > { %v2976_v56 = vpop.f32.mrf.mxu3 }
 0x57e   : > { %v2977_v6 = vadd.f32 %v2976_v56, %v2808_v12 }
 0x580   : > { %v3048_v22 = vmax.f32 %v2977_v6, 0.0 }
 0x581   : > { %v3267_v13 = vpop.f32.mrf.mxu0 }
 0x582   : > { %v3082_v29 = vpack.c.bf16 %v3048_v22, %v3047_v14  ;;  %v3268_v45 = vadd.f32 %v5835_v30, %v3267_v13 }
 0x584   : > { %3364 = vst.msk [vmem:[%s5844_s26 + $0x150] sm:$0xff] %vm519_vm0, %v3268_v45  ;;  %3306 = vmatmul.bf16.gmra.mxu0 %v3082_v29 }
 0x585   : > { %v2979_v18 = vpop.f32.mrf.mxu3 }
 0x586   : > { %v2980_v55 = vadd.f32 %v2979_v18, %v2811_v1 }
 0x588   : > { %v3049_v19 = vmax.f32 %v2980_v55, 0.0 }
 0x589   : > { %v3269_v23 = vpop.f32.mrf.mxu0 }
 0x58a   : > { %v3270_v54 = vadd.f32 %v5835_v30, %v3269_v23 }
 0x58c   : > { %3365 = vst.msk [vmem:[%s5844_s26 + $0x158] sm:$0xff] %vm519_vm0, %v3270_v54 }
 0x58d   : > { %v2981_v0 = vpop.f32.mrf.mxu3 }
 0x58e   : > { %v2982_v21 = vadd.f32 %v2981_v0, %v2813_v4 }
 0x590   : > { %v3050_v27 = vmax.f32 %v2982_v21, 0.0 }
 0x591   : > { %v3272_v57 = vpop.f32.mrf.mxu0 }
 0x592   : > { %v3083_v33 = vpack.c.bf16 %v3050_v27, %v3049_v19  ;;  %v3273_v30 = vadd.f32 %v6128_v41, %v3272_v57 }
 0x594   : > { %3366 = vst.msk [vmem:[%s5844_s26 + $0x160] sm:$0xff] %vm519_vm0, %v3273_v30  ;;  %3311 = vmatmul.bf16.gmra.mxu0 %v3083_v33 }
 0x595   : > { %v2984_v36 = vpop.f32.mrf.mxu3 }
 0x596   : > { %v2985_v16 = vadd.f32 %v2984_v36, %v2816_v3 }
 0x598   : > { %v3051_v44 = vmax.f32 %v2985_v16, 0.0 }
 0x599   : > { %v3274_v9 = vpop.f32.mrf.mxu0 }
 0x59a   : > { %v3275_v62 = vadd.f32 %v6128_v41, %v3274_v9 }
 0x59c   : > { %3367 = vst.msk [vmem:[%s5844_s26 + $0x168] sm:$0xff] %vm519_vm0, %v3275_v62 }
 0x59d   : > { %v2986_v37 = vpop.f32.mrf.mxu3 }
 0x59e   : > { %v2987_v20 = vadd.f32 %v2986_v37, %v2818_v38 }
 0x5a0   : > { %v3052_v11 = vmax.f32 %v2987_v20, 0.0 }
 0x5a1   : > { %v3277_v50 = vpop.f32.mrf.mxu0 }
 0x5a2   : > { %v3084_v25 = vpack.c.bf16 %v3052_v11, %v3051_v44  ;;  %v3278_v7 = vadd.f32 %v6128_v41, %v3277_v50 }
 0x5a4   : > { %3368 = vst.msk [vmem:[%s5844_s26 + $0x170] sm:$0xff] %vm519_vm0, %v3278_v7  ;;  %3316 = vmatmul.bf16.vlgmr.msrb.gmra.mxu3 %v3084_v25 }
 0x5a9   : > { %v3279_v52 = vpop.f32.mrf.mxu0 }
 0x5aa   : > { %v3280_v24 = vadd.f32 %v6128_v41, %v3279_v52 }
 0x5ac   : > { %3369 = vst.msk [vmem:[%s5844_s26 + $0x178] sm:$0xff] %vm519_vm0, %v3280_v24 }
 0x5b1   : > { %v3282_v42 = vpop.f32.mrf.mxu0 }
 0x5b2   : > { %v3283_v17 = vadd.f32 %v6128_v41, %v3282_v42 }
 0x5b4   : > { %3370 = vst.msk [vmem:[%s5844_s26 + $0x180] sm:$0xff] %vm519_vm0, %v3283_v17 }
 0x5b9   : > { %v3284_v15 = vpop.f32.mrf.mxu0 }
 0x5ba   : > { %v3285_v47 = vadd.f32 %v6128_v41, %v3284_v15 }
 0x5bc   : > { %3371 = vst.msk [vmem:[%s5844_s26 + $0x188] sm:$0xff] %vm519_vm0, %v3285_v47 }
 0x5c1   : > { %v3287_v28 = vpop.f32.mrf.mxu0 }
 0x5c2   : > { %v3288_v60 = vadd.f32 %v6128_v41, %v3287_v28 }
 0x5c4   : > { %3372 = vst.msk [vmem:[%s5844_s26 + $0x190] sm:$0xff] %vm519_vm0, %v3288_v60 }
 0x5c9   : > { %v3289_v63 = vpop.f32.mrf.mxu0 }
 0x5ca   : > { %v3290_v61 = vadd.f32 %v6128_v41, %v3289_v63 }
 0x5cc   : > { %3373 = vst.msk [vmem:[%s5844_s26 + $0x198] sm:$0xff] %vm519_vm0, %v3290_v61 }
 0x5d1   : > { %v3292_v8 = vpop.f32.mrf.mxu0 }
 0x5d2   : > { %v3293_v46 = vadd.f32 %v6128_v41, %v3292_v8 }
 0x5d4   : > { %3374 = vst.msk [vmem:[%s5844_s26 + $0x1a0] sm:$0xff] %vm519_vm0, %v3293_v46 }
 0x5d9   : > { %v3294_v35 = vpop.f32.mrf.mxu0 }
 0x5da   : > { %v3295_v31 = vadd.f32 %v6128_v41, %v3294_v35 }
 0x5dc   : > { %3375 = vst.msk [vmem:[%s5844_s26 + $0x1a8] sm:$0xff] %vm519_vm0, %v3295_v31 }
 0x5e1   : > { %v3297_v51 = vpop.f32.mrf.mxu0 }
 0x5e2   : > { %v3298_v58 = vadd.f32 %v6128_v41, %v3297_v51 }
 0x5e4   : > { %3376 = vst.msk [vmem:[%s5844_s26 + $0x1b0] sm:$0xff] %vm519_vm0, %v3298_v58 }
 0x5e9   : > { %v3299_v40 = vpop.f32.mrf.mxu0 }
 0x5ea   : > { %v3300_v32 = vadd.f32 %v6128_v41, %v3299_v40 }
 0x5ec   : > { %3377 = vst.msk [vmem:[%s5844_s26 + $0x1b8] sm:$0xff] %vm519_vm0, %v3300_v32 }
 0x5f1   : > { %v3302_v59 = vpop.f32.mrf.mxu0 }
 0x5f2   : > { %v3303_v48 = vadd.f32 %v6128_v41, %v3302_v59 }
 0x5f4   : > { %3378 = vst.msk [vmem:[%s5844_s26 + $0x1c0] sm:$0xff] %vm519_vm0, %v3303_v48 }
 0x5f9   : > { %v3304_v34 = vpop.f32.mrf.mxu0 }
 0x5fa   : > { %v3305_v5 = vadd.f32 %v6128_v41, %v3304_v34 }
 0x5fc   : > { %3379 = vst.msk [vmem:[%s5844_s26 + $0x1c8] sm:$0xff] %vm519_vm0, %v3305_v5 }
 0x601   : > { %v3307_v53 = vpop.f32.mrf.mxu0 }
 0x602   : > { %v3308_v2 = vadd.f32 %v6128_v41, %v3307_v53 }
 0x604   : > { %3380 = vst.msk [vmem:[%s5844_s26 + $0x1d0] sm:$0xff] %vm519_vm0, %v3308_v2 }
 0x609   : > { %v3309_v10 = vpop.f32.mrf.mxu0 }
 0x60a   : > { %v3310_v12 = vadd.f32 %v6128_v41, %v3309_v10 }
 0x60c   : > { %3381 = vst.msk [vmem:[%s5844_s26 + $0x1d8] sm:$0xff] %vm519_vm0, %v3310_v12 }
 0x611   : > { %v3312_v26 = vpop.f32.mrf.mxu0 }
 0x612   : > { %v3313_v56 = vadd.f32 %v6128_v41, %v3312_v26 }
 0x614   : > { %3382 = vst.msk [vmem:[%s5844_s26 + $0x1e0] sm:$0xff] %vm519_vm0, %v3313_v56 }
 0x619   : > { %v3314_v6 = vpop.f32.mrf.mxu0 }
 0x61a   : > { %v3315_v14 = vadd.f32 %v6128_v41, %v3314_v6 }
 0x61c   : > { %3383 = vst.msk [vmem:[%s5844_s26 + $0x1e8] sm:$0xff] %vm519_vm0, %v3315_v14 }
 0x627   : > { %v3317_v22 = vpop.f32.mrf.mxu3 }
 0x628   : > { %v3318_v13 = vadd.f32 %v6128_v41, %v3317_v22 }
 0x62a   : > { %3384 = vst.msk [vmem:[%s5844_s26 + $0x1f0] sm:$0xff] %vm519_vm0, %v3318_v13 }
 0x62f   : > { %v3319_v29 = vpop.f32.mrf.mxu3 }
 0x630   : > { %v3320_v45 = vadd.f32 %v6128_v41, %v3319_v29 }
 0x632   : > { %3385 = vst.msk [vmem:[%s5844_s26 + $0x1f8] sm:$0xff] %vm519_vm0, %v3320_v45 }
 0x633 PF: > { %s21_s19 = sadd.s32 1, %s4008_s19   ;;  %s6216_s17 = smov %s4004_s18 }
 0x634   : > { %p18_p5 = scmp.ge.s32.totalorder %s21_s19, 4   ;;  %s6217_s18 = smov %s6219_s20 }
 0x636   :  { %20 = sbr.rel (!%p18_p5) target bundleno = 2 (0x2), region = 100 }

</bundles_post_ra>
